<compile_context>
chip_gen: v7x
topology: tpu7x:2x2x1
jax: 0.10.0
libtpu: 0.0.40
codegen_flags: <defaults>
</compile_context>

<pallas_src>
import functools

import jax
import jax.numpy as jnp
from jax.experimental import pallas as pl
from jax.experimental.pallas import tpu as pltpu

_VMEM_LIMIT = 48 * 1024 * 1024  # safe on v7x (64 MiB/TC), ample on v5e/v6e.


def _round_up(x, m):
    return (x + m - 1) // m * m


def _apply_act(y, act):
    if act == "none":
        return y
    if act == "leaky_relu":
        return jnp.where(y >= 0, y, 0.2 * y)
    if act == "relu":
        return jnp.maximum(y, 0.0)
    if act == "tanh":
        return jnp.tanh(y)
    raise ValueError(act)


# ---------- phase-stacked tiled matmul + bias + activation + BN stats --------

def _conv_mm_kernel(a_ref, b_ref, bias_ref, *refs, act, nk_minus_1, with_stats):
    if with_stats:
        o_ref, sum_ref, ssq_ref, acc_ref = refs
    else:
        o_ref, acc_ref = refs

    @pl.when(pl.program_id(3) == 0)
    def _():
        acc_ref[...] = jnp.zeros_like(acc_ref)

    acc_ref[...] += jnp.dot(a_ref[...], b_ref[...],
                            preferred_element_type=jnp.float32)

    @pl.when(pl.program_id(3) == nk_minus_1)
    def _():
        y = acc_ref[...] + bias_ref[...]
        o_ref[...] = _apply_act(y, act).astype(o_ref.dtype)
        if with_stats:
            # Per-(phase, i, j) partial column statistics of the conv output
            # (bias is zero for every BN-fed conv, so padded rows contribute 0).
            cs = jnp.sum(y, axis=0, keepdims=True)
            cq = jnp.sum(y * y, axis=0, keepdims=True)
            sum_ref[...] = jnp.broadcast_to(cs, sum_ref.shape)
            ssq_ref[...] = jnp.broadcast_to(cq, ssq_ref.shape)


def _pick_tm(M):
    if M >= 1024:
        return 1024
    if M >= 128:
        return _round_up(M, 128)
    return _round_up(M, 16)


def conv_matmul(a, b, bias, act, *, out_dtype=jnp.bfloat16, compute_stats=False):
    """a: (P, M, K), b: (P, K, N) bf16 weights, bias: (N,) f32.

    Returns (y_padded (P, Mp, Np) out_dtype, stats) where stats is None or
    (colsum, colsumsq) each of shape (Np,) f32 summed over all P*M real rows.
    """
    P, M, K = a.shape
    Pb, Kb, Nc = b.shape
    assert P == Pb and K == Kb
    tm = _pick_tm(M)
    tk = min(512, _round_up(K, 128))
    tn = min(512, _round_up(Nc, 128))
    Mp, Kp, Np = _round_up(M, tm), _round_up(K, tk), _round_up(Nc, tn)

    a_p = jnp.pad(a.astype(jnp.bfloat16), ((0, 0), (0, Mp - M), (0, Kp - K)))
    b_p = jnp.pad(b.astype(jnp.bfloat16), ((0, 0), (0, Kp - K), (0, Np - Nc)))
    bias_p = jnp.pad(bias.astype(jnp.float32).reshape(1, Nc),
                     ((0, 0), (0, Np - Nc)))
    ni, nj, nk = Mp // tm, Np // tn, Kp // tk

    out_shapes = [jax.ShapeDtypeStruct((P, Mp, Np), out_dtype)]
    out_specs = [pl.BlockSpec((None, tm, tn), lambda p, i, j, k: (p, i, j))]
    if compute_stats:
        out_shapes += [jax.ShapeDtypeStruct((P, ni * 8, Np), jnp.float32)] * 2
        out_specs += [pl.BlockSpec((None, 8, tn),
                                   lambda p, i, j, k: (p, i, j))] * 2

    outs = pl.pallas_call(
        functools.partial(_conv_mm_kernel, act=act, nk_minus_1=nk - 1,
                          with_stats=compute_stats),
        out_shape=tuple(out_shapes),
        grid=(P, ni, nj, nk),
        in_specs=[
            pl.BlockSpec((None, tm, tk), lambda p, i, j, k: (p, i, k)),
            pl.BlockSpec((None, tk, tn), lambda p, i, j, k: (p, k, j)),
            pl.BlockSpec((1, tn), lambda p, i, j, k: (0, j)),
        ],
        out_specs=tuple(out_specs),
        scratch_shapes=[pltpu.VMEM((tm, tn), jnp.float32)],
        compiler_params=pltpu.CompilerParams(
            dimension_semantics=("parallel", "parallel", "parallel", "arbitrary"),
            vmem_limit_bytes=_VMEM_LIMIT,
        ),
    )(a_p, b_p, bias_p)

    y = outs[0]
    if compute_stats:
        colsum = jnp.sum(outs[1][:, ::8, :], axis=(0, 1))
        colsumsq = jnp.sum(outs[2][:, ::8, :], axis=(0, 1))
        return y, (colsum, colsumsq)
    return y, None


# ------------------ BatchNorm apply (affine) + fused activation --------------

def _affine_act_kernel(x_ref, scale_ref, shift_ref, o_ref, *, act):
    y = x_ref[...].astype(jnp.float32) * scale_ref[...] + shift_ref[...]
    o_ref[...] = _apply_act(y, act).astype(o_ref.dtype)


def bn_affine_act(x_pad, stats, gamma, beta, count, act, eps=1e-5):
    """x_pad: (R, Cp) bf16 padded conv output (padded rows/cols are zero).
    stats: (colsum, colsumsq) each (Cp,) f32 over the `count` real rows."""
    colsum, colsumsq = stats
    R, Cp = x_pad.shape
    C = gamma.shape[0]
    g = jnp.pad(gamma.astype(jnp.float32), (0, Cp - C))
    b = jnp.pad(beta.astype(jnp.float32), (0, Cp - C))
    inv = 1.0 / float(count)
    mean = colsum * inv
    # TODO(synk): E[x^2]-E[x]^2 in f32 can lose precision for very large N*H*W;
    #             fine at these sizes, guard with max(.,0).
    var = jnp.maximum(colsumsq * inv - mean * mean, 0.0)
    scale = g * jax.lax.rsqrt(var + eps)
    shift = b - mean * scale

    tm = min(1024, _round_up(R, 16))
    Rp = _round_up(R, tm)
    x_p = jnp.pad(x_pad, ((0, Rp - R), (0, 0)))
    out = pl.pallas_call(
        functools.partial(_affine_act_kernel, act=act),
        out_shape=jax.ShapeDtypeStruct((Rp, Cp), jnp.bfloat16),
        grid=(Rp // tm,),
        in_specs=[pl.BlockSpec((tm, Cp), lambda i: (i, 0)),
                  pl.BlockSpec((1, Cp), lambda i: (0, 0)),
                  pl.BlockSpec((1, Cp), lambda i: (0, 0))],
        out_specs=pl.BlockSpec((tm, Cp), lambda i: (i, 0)),
        compiler_params=pltpu.CompilerParams(
            dimension_semantics=("parallel",),
            vmem_limit_bytes=_VMEM_LIMIT,
        ),
    )(x_p, scale.reshape(1, Cp), shift.reshape(1, Cp))
    return out[:R]


# --------------------- convolutions (NHWC, XLA im2col glue) ------------------

def conv_down(x, w, bias, act, *, compute_stats, out_dtype=jnp.bfloat16):
    """Conv2d k=4, s=2, p=1 on NHWC bf16 input. w: (1, 16*C, Cout) bf16."""
    N, H, W, C = x.shape
    Ho, Wo = H // 2, W // 2
    xp = jnp.pad(x, ((0, 0), (1, 1), (1, 1), (0, 0)))
    cols = [xp[:, ki:ki + 2 * Ho:2, kj:kj + 2 * Wo:2, :]
            for ki in range(4) for kj in range(4)]
    col = jnp.stack(cols, axis=3).reshape(1, N * Ho * Wo, 16 * C)
    return conv_matmul(col, w, bias, act,
                       out_dtype=out_dtype, compute_stats=compute_stats)


def conv_up(x, w_ph, bias, act, *, compute_stats, out_dtype=jnp.bfloat16):
    """ConvTranspose2d k=4, s=2, p=1 via polyphase decomposition: all four
    output phases run in ONE pallas_call with a leading phase grid axis."""
    N, H, W, C = x.shape
    xp = jnp.pad(x, ((0, 0), (1, 1), (1, 1), (0, 0)))
    phase_cols = []
    for a in range(2):
        for b in range(2):
            taps = [xp[:, a + dy:a + dy + H, b + dx:b + dx + W, :]
                    for dy in range(2) for dx in range(2)]
            phase_cols.append(jnp.stack(taps, axis=3).reshape(N * H * W, 4 * C))
    col = jnp.stack(phase_cols, axis=0)                 # (4, M, 4C)
    return conv_matmul(col, w_ph, bias, act,
                       out_dtype=out_dtype, compute_stats=compute_stats)


def interleave_phases(y4, N, H, W, Cout):
    """(4, N*H*W, Cout) phase outputs -> (N, 2H, 2W, Cout)."""
    ph = y4.reshape(2, 2, N, H, W, Cout)
    return ph.transpose(2, 3, 0, 4, 1, 5).reshape(N, 2 * H, 2 * W, Cout)


# ----------------------------- weight preparation ----------------------------

def _prep_conv_w(w):
    # PyTorch Conv2d weight (C_out, C_in, 4, 4) -> (1, 16*C_in, C_out) bf16,
    # rows ordered (ki*4+kj)*C_in + cin to match conv_down's im2col.
    return w.transpose(2, 3, 1, 0).reshape(1, -1, w.shape[0]).astype(jnp.bfloat16)


_TAPS = ((3, 1), (2, 0))  # kernel-tap indices per output phase / window offset


def _prep_convT_w(w):
    # PyTorch ConvTranspose2d weight (C_in, C_out, 4, 4), stride 2, pad 1.
    # Phase (a,b): out[2i+a, 2j+b] = sum_{dy,dx} xp[i+a+dy, j+b+dx] *
    #              w[:, :, _TAPS[a][dy], _TAPS[b][dx]]
    C_in, C_out = w.shape[0], w.shape[1]
    phases = []
    for a in range(2):
        for b in range(2):
            taps = [w[:, :, _TAPS[a][dy], _TAPS[b][dx]]
                    for dy in range(2) for dx in range(2)]
            phases.append(jnp.stack(taps, axis=0).reshape(4 * C_in, C_out))
    return jnp.stack(phases, axis=0).astype(jnp.bfloat16)  # (4, 4*C_in, C_out)


# -------------------------- U-Net params & forward ---------------------------

def init_unet_params(key, input_nc, output_nc, num_downs, ngf):
    """Deterministic synthetic init (weights ~ N(0, 0.02), BN gamma=1, beta=0).
    Weight matrices stored in matmul-ready (bf16, phase-stacked) form."""
    def conv_w(k_, cout, cin):
        return jax.random.normal(k_, (cout, cin, 4, 4), jnp.float32) * 0.02

    def convT_w(k_, cin, cout):
        return jax.random.normal(k_, (cin, cout, 4, 4), jnp.float32) * 0.02

    specs = [dict(kind="innermost", outer=ngf * 8, inner=ngf * 8, inp=ngf * 8)]
    for _ in range(num_downs - 5):
        specs.append(dict(kind="middle", outer=ngf * 8, inner=ngf * 8, inp=ngf * 8))
    specs.append(dict(kind="middle", outer=ngf * 4, inner=ngf * 8, inp=ngf * 4))
    specs.append(dict(kind="middle", outer=ngf * 2, inner=ngf * 4, inp=ngf * 2))
    specs.append(dict(kind="middle", outer=ngf, inner=ngf * 2, inp=ngf))
    specs.append(dict(kind="outermost", outer=output_nc, inner=ngf, inp=input_nc))

    blocks = []
    for s in specs:
        key, k1, k2, k3 = jax.random.split(key, 4)
        inner, outer, inp = s["inner"], s["outer"], s["inp"]
        p = dict(kind=s["kind"])
        p["down_w"] = _prep_conv_w(conv_w(k1, inner, inp))   # bias=False (BN)
        p["down_b"] = jnp.zeros((inner,), jnp.float32)
        up_in = inner if s["kind"] == "innermost" else inner * 2
        p["up_w"] = _prep_convT_w(convT_w(k2, up_in, outer))
        if s["kind"] == "outermost":
            p["up_b"] = jax.random.normal(k3, (outer,), jnp.float32) * 0.02
        else:
            p["up_b"] = jnp.zeros((outer,), jnp.float32)
        if s["kind"] == "middle":
            p["dn_gamma"] = jnp.ones((inner,), jnp.float32)
            p["dn_beta"] = jnp.zeros((inner,), jnp.float32)
        if s["kind"] in ("middle", "innermost"):
            p["up_gamma"] = jnp.ones((outer,), jnp.float32)
            p["up_beta"] = jnp.zeros((outer,), jnp.float32)
        blocks.append(p)
    return blocks  # innermost-first, outermost last


def unet_forward(blocks, x_nchw):
    # NCHW at the boundary (PyTorch convention); NHWC bf16 internally.
    x = x_nchw.transpose(0, 2, 3, 1).astype(jnp.bfloat16)

    # Each block receives leakyrelu(input) (its downrelu, fused in the producer
    # epilogue) and returns relu(cat([input, model(input)])) (the parent's
    # uprelu, using relu(cat)=cat(relu) and relu(x)=max(leakyrelu(x),0)).
    def run(idx, x_leaky):
        p = blocks[idx]
        N, H, W, _ = x_leaky.shape
        Ho, Wo = H // 2, W // 2
        inner = p["down_w"].shape[-1]
        Mdn = N * Ho * Wo

        if p["kind"] == "innermost":
            y_pad, _ = conv_down(x_leaky, p["down_w"], p["down_b"], "relu",
                                 compute_stats=False)
            u_in = y_pad[0, :Mdn, :inner].reshape(N, Ho, Wo, inner)
        else:
            y_pad, stats = conv_down(x_leaky, p["down_w"], p["down_b"], "none",
                                     compute_stats=True)
            c_pad = bn_affine_act(y_pad[0], stats, p["dn_gamma"], p["dn_beta"],
                                  Mdn, "leaky_relu")
            c_leaky = c_pad[:Mdn, :inner].reshape(N, Ho, Wo, inner)
            u_in = run(idx - 1, c_leaky)

        # up conv (4 phases in one call) + BN + fused parent's relu
        u_pad, u_stats = conv_up(u_in, p["up_w"], p["up_b"], "none",
                                 compute_stats=True)
        nh, hh, wh, _ = u_in.shape
        Mup = nh * hh * wh
        outer = p["up_w"].shape[-1]
        P_, Mp_, Np_ = u_pad.shape
        u_act = bn_affine_act(u_pad.reshape(P_ * Mp_, Np_), u_stats,
                              p["up_gamma"], p["up_beta"], 4 * Mup, "relu")
        u_relu = interleave_phases(
            u_act.reshape(P_, Mp_, Np_)[:, :Mup, :outer], nh, hh, wh, outer)
        return jnp.concatenate([jnp.maximum(x_leaky, 0), u_relu], axis=-1)

    p_out = blocks[-1]
    # Outermost down conv: no norm; leaky for the child, relu derived lazily.
    Nb, Hb, Wb, _ = x.shape
    Ho, Wo = Hb // 2, Wb // 2
    c1 = p_out["down_w"].shape[-1]
    y_pad, _ = conv_down(x, p_out["down_w"], p_out["down_b"], "leaky_relu",
                         compute_stats=False)
    x1_leaky = y_pad[0, :Nb * Ho * Wo, :c1].reshape(Nb, Ho, Wo, c1)

    mid_relu = run(len(blocks) - 2, x1_leaky)   # == relu(cat([x1, model(x1)]))

    # Outermost up conv: bias=True, tanh fused in the epilogue, f32 output.
    u_pad, _ = conv_up(mid_relu, p_out["up_w"], p_out["up_b"], "tanh",
                       compute_stats=False, out_dtype=jnp.float32)
    nh, hh, wh, _ = mid_relu.shape
    cout = p_out["up_w"].shape[-1]
    y = interleave_phases(u_pad[:, :nh * hh * wh, :cout], nh, hh, wh, cout)
    return y.transpose(0, 3, 1, 2)


if __name__ == "__main__":
    # Small but structurally faithful config: 5 downsamplings need spatial >= 32.
    input_nc, output_nc, num_downs, ngf = 3, 3, 5, 8
    N, H, W = 2, 32, 32

    key = jax.random.PRNGKey(0)
    kp, kx = jax.random.split(key)
    blocks = init_unet_params(kp, input_nc, output_nc, num_downs, ngf)
    x = jax.random.normal(kx, (N, input_nc, H, W), jnp.float32)

    fwd = jax.jit(lambda inp: unet_forward(blocks, inp))
    y = fwd(x)
    jax.block_until_ready(y)

    assert y.shape == (N, output_nc, H, W), y.shape
    assert bool(jnp.all(jnp.isfinite(y)))
    print("KERNEL_OK")
</pallas_src>

<mosaic_0001>
module attributes {stable_mosaic.version = 11 : i64} {
  func.func @_conv_mm_kernel(%arg0: i32, %arg1: i32, %arg2: i32, %arg3: i32, %arg4: memref<1x512x128xbf16, #tpu.memory_space<vmem>>, %arg5: memref<1x128x128xbf16, #tpu.memory_space<vmem>>, %arg6: memref<1x128xf32, #tpu.memory_space<vmem>>, %arg7: memref<1x512x128xbf16, #tpu.memory_space<vmem>>, %arg8: memref<512x128xf32, #tpu.memory_space<vmem>>) attributes {dimension_semantics = [#tpu.dimension_semantics<parallel>, #tpu.dimension_semantics<parallel>, #tpu.dimension_semantics<parallel>, #tpu.dimension_semantics<arbitrary>], iteration_bounds = array<i64: 1, 1, 1, 1>, scalar_prefetch = 0 : i64, scratch_operands = 1 : i64, tpu.core_type = #tpu.core_type<tc>, window_params = [{transform_indices = @transform_0, window_bounds = array<i64: 1, 512, 128>}, {transform_indices = @transform_1, window_bounds = array<i64: 1, 128, 128>}, {transform_indices = @transform_2, window_bounds = array<i64: 1, 128>}, {transform_indices = @transform_3, window_bounds = array<i64: 1, 512, 128>}]} {
    %c0_i32 = arith.constant 0 : i32
    %0 = arith.cmpi eq, %arg3, %c0_i32 : i32
    %1 = arith.extui %0 : i1 to i32
    %c0_i32_0 = arith.constant 0 : i32
    %2 = arith.cmpi ne, %1, %c0_i32_0 : i32
    scf.if %2 {
      %cst_12 = arith.constant 0.000000e+00 : f32
      %14 = vector.broadcast %cst_12 : f32 to vector<512x128xf32>
      %c0_13 = arith.constant 0 : index
      %c0_14 = arith.constant 0 : index
      %15 = vector.load %arg8[%c0_13, %c0_14] : memref<512x128xf32, #tpu.memory_space<vmem>>, vector<512x128xf32>
      tpu.vector_store %arg8[%c0_13, %c0_14], %14 {strides = array<i32>} : memref<512x128xf32, #tpu.memory_space<vmem>>, vector<512x128xf32>,
    } else {
    }
    %c0 = arith.constant 0 : index
    %c0_1 = arith.constant 0 : index
    %3 = vector.load %arg8[%c0, %c0_1] : memref<512x128xf32, #tpu.memory_space<vmem>>, vector<512x128xf32>
    %c0_2 = arith.constant 0 : index
    %c0_3 = arith.constant 0 : index
    %c0_4 = arith.constant 0 : index
    %4 = vector.load %arg4[%c0_2, %c0_3, %c0_4] : memref<1x512x128xbf16, #tpu.memory_space<vmem>>, vector<1x512x128xbf16>
    %5 = vector.shape_cast %4 : vector<1x512x128xbf16> to vector<512x128xbf16>
    %c0_5 = arith.constant 0 : index
    %c0_6 = arith.constant 0 : index
    %c0_7 = arith.constant 0 : index
    %6 = vector.load %arg5[%c0_5, %c0_6, %c0_7] : memref<1x128x128xbf16, #tpu.memory_space<vmem>>, vector<1x128x128xbf16>
    %7 = vector.shape_cast %6 : vector<1x128x128xbf16> to vector<128x128xbf16>
    %cst = arith.constant dense<0.000000e+00> : vector<512x128xf32>
    %8 = tpu.matmul %5, %7, %cst {dimension_numbers = #tpu.dot_dimension_numbers<[1], [0], [0], [1], [0, 0, 1, 1], [], []>} : vector<512x128xbf16>, vector<128x128xbf16>, vector<512x128xf32> -> vector<512x128xf32>
    %9 = arith.addf %3, %8 : vector<512x128xf32>
    %c0_8 = arith.constant 0 : index
    %c0_9 = arith.constant 0 : index
    %10 = vector.load %arg8[%c0_8, %c0_9] : memref<512x128xf32, #tpu.memory_space<vmem>>, vector<512x128xf32>
    tpu.vector_store %arg8[%c0_8, %c0_9], %9 {strides = array<i32>} : memref<512x128xf32, #tpu.memory_space<vmem>>, vector<512x128xf32>,
    %c0_i32_10 = arith.constant 0 : i32
    %11 = arith.cmpi eq, %arg3, %c0_i32_10 : i32
    %12 = arith.extui %11 : i1 to i32
    %c0_i32_11 = arith.constant 0 : i32
    %13 = arith.cmpi ne, %12, %c0_i32_11 : i32
    scf.if %13 {
      %c0_12 = arith.constant 0 : index
      %c0_13 = arith.constant 0 : index
      %14 = vector.load %arg8[%c0_12, %c0_13] : memref<512x128xf32, #tpu.memory_space<vmem>>, vector<512x128xf32>
      %c0_14 = arith.constant 0 : index
      %c0_15 = arith.constant 0 : index
      %15 = vector.load %arg6[%c0_14, %c0_15] : memref<1x128xf32, #tpu.memory_space<vmem>>, vector<1x128xf32>
      %16 = vector.broadcast %15 : vector<1x128xf32> to vector<512x128xf32>
      %17 = arith.addf %14, %16 : vector<512x128xf32>
      %cst_16 = arith.constant 0.000000e+00 : f32
      %18 = vector.broadcast %cst_16 : f32 to vector<512x128xf32>
      %19 = arith.cmpf oge, %17, %18 : vector<512x128xf32>
      %cst_17 = arith.constant 2.000000e-01 : f32
      %20 = vector.broadcast %cst_17 : f32 to vector<512x128xf32>
      %21 = arith.mulf %20, %17 : vector<512x128xf32>
      %22 = arith.select %19, %17, %21 : vector<512x128xi1>, vector<512x128xf32>
      %23 = arith.truncf %22 : vector<512x128xf32> to vector<512x128xbf16>
      %c0_18 = arith.constant 0 : index
      %c0_19 = arith.constant 0 : index
      %c0_20 = arith.constant 0 : index
      %24 = vector.load %arg7[%c0_18, %c0_19, %c0_20] : memref<1x512x128xbf16, #tpu.memory_space<vmem>>, vector<1x512x128xbf16>
      %25 = vector.shape_cast %24 : vector<1x512x128xbf16> to vector<512x128xbf16>
      %26 = vector.shape_cast %23 : vector<512x128xbf16> to vector<1x512x128xbf16>
      tpu.vector_store %arg7[%c0_18, %c0_19, %c0_20], %26 {strides = array<i32>} : memref<1x512x128xbf16, #tpu.memory_space<vmem>>, vector<1x512x128xbf16>,
    } else {
    }
    return
  }
  func.func @transform_0(%arg0: i32, %arg1: i32, %arg2: i32, %arg3: i32) -> (i32, i32, i32) {
    %c0_i32 = arith.constant 0 : i32
    return %arg0, %arg1, %arg3 : i32, i32, i32
  }
  func.func @transform_1(%arg0: i32, %arg1: i32, %arg2: i32, %arg3: i32) -> (i32, i32, i32) {
    %c0_i32 = arith.constant 0 : i32
    return %arg0, %arg3, %arg2 : i32, i32, i32
  }
  func.func @transform_2(%arg0: i32, %arg1: i32, %arg2: i32, %arg3: i32) -> (i32, i32) {
    %c0_i32 = arith.constant 0 : i32
    %c0_i32_0 = arith.constant 0 : i32
    return %c0_i32, %arg2 : i32, i32
  }
  func.func @transform_3(%arg0: i32, %arg1: i32, %arg2: i32, %arg3: i32) -> (i32, i32, i32) {
    %c0_i32 = arith.constant 0 : i32
    return %arg0, %arg1, %arg2 : i32, i32, i32
  }
}

module attributes {stable_mosaic.version = 11 : i64} {
  func.func @_conv_mm_kernel(%arg0: i32, %arg1: i32, %arg2: i32, %arg3: i32, %arg4: memref<1x128x128xbf16, #tpu.memory_space<vmem>>, %arg5: memref<1x128x128xbf16, #tpu.memory_space<vmem>>, %arg6: memref<1x128xf32, #tpu.memory_space<vmem>>, %arg7: memref<1x128x128xbf16, #tpu.memory_space<vmem>>, %arg8: memref<1x8x128xf32, #tpu.memory_space<vmem>>, %arg9: memref<1x8x128xf32, #tpu.memory_space<vmem>>, %arg10: memref<128x128xf32, #tpu.memory_space<vmem>>) attributes {dimension_semantics = [#tpu.dimension_semantics<parallel>, #tpu.dimension_semantics<parallel>, #tpu.dimension_semantics<parallel>, #tpu.dimension_semantics<arbitrary>], iteration_bounds = array<i64: 1, 1, 1, 1>, scalar_prefetch = 0 : i64, scratch_operands = 1 : i64, tpu.core_type = #tpu.core_type<tc>, window_params = [{transform_indices = @transform_0, window_bounds = array<i64: 1, 128, 128>}, {transform_indices = @transform_1, window_bounds = array<i64: 1, 128, 128>}, {transform_indices = @transform_2, window_bounds = array<i64: 1, 128>}, {transform_indices = @transform_3, window_bounds = array<i64: 1, 128, 128>}, {transform_indices = @transform_4, window_bounds = array<i64: 1, 8, 128>}, {transform_indices = @transform_5, window_bounds = array<i64: 1, 8, 128>}]} {
    %c0_i32 = arith.constant 0 : i32
    %0 = arith.cmpi eq, %arg3, %c0_i32 : i32
    %1 = arith.extui %0 : i1 to i32
    %c0_i32_0 = arith.constant 0 : i32
    %2 = arith.cmpi ne, %1, %c0_i32_0 : i32
    scf.if %2 {
      %cst_12 = arith.constant 0.000000e+00 : f32
      %14 = vector.broadcast %cst_12 : f32 to vector<128x128xf32>
      %c0_13 = arith.constant 0 : index
      %c0_14 = arith.constant 0 : index
      %15 = vector.load %arg10[%c0_13, %c0_14] : memref<128x128xf32, #tpu.memory_space<vmem>>, vector<128x128xf32>
      tpu.vector_store %arg10[%c0_13, %c0_14], %14 {strides = array<i32>} : memref<128x128xf32, #tpu.memory_space<vmem>>, vector<128x128xf32>,
    } else {
    }
    %c0 = arith.constant 0 : index
    %c0_1 = arith.constant 0 : index
    %3 = vector.load %arg10[%c0, %c0_1] : memref<128x128xf32, #tpu.memory_space<vmem>>, vector<128x128xf32>
    %c0_2 = arith.constant 0 : index
    %c0_3 = arith.constant 0 : index
    %c0_4 = arith.constant 0 : index
    %4 = vector.load %arg4[%c0_2, %c0_3, %c0_4] : memref<1x128x128xbf16, #tpu.memory_space<vmem>>, vector<1x128x128xbf16>
    %5 = vector.shape_cast %4 : vector<1x128x128xbf16> to vector<128x128xbf16>
    %c0_5 = arith.constant 0 : index
    %c0_6 = arith.constant 0 : index
    %c0_7 = arith.constant 0 : index
    %6 = vector.load %arg5[%c0_5, %c0_6, %c0_7] : memref<1x128x128xbf16, #tpu.memory_space<vmem>>, vector<1x128x128xbf16>
    %7 = vector.shape_cast %6 : vector<1x128x128xbf16> to vector<128x128xbf16>
    %cst = arith.constant dense<0.000000e+00> : vector<128x128xf32>
    %8 = tpu.matmul %5, %7, %cst {dimension_numbers = #tpu.dot_dimension_numbers<[1], [0], [0], [1], [0, 0, 1, 1], [], []>} : vector<128x128xbf16>, vector<128x128xbf16>, vector<128x128xf32> -> vector<128x128xf32>
    %9 = arith.addf %3, %8 : vector<128x128xf32>
    %c0_8 = arith.constant 0 : index
    %c0_9 = arith.constant 0 : index
    %10 = vector.load %arg10[%c0_8, %c0_9] : memref<128x128xf32, #tpu.memory_space<vmem>>, vector<128x128xf32>
    tpu.vector_store %arg10[%c0_8, %c0_9], %9 {strides = array<i32>} : memref<128x128xf32, #tpu.memory_space<vmem>>, vector<128x128xf32>,
    %c0_i32_10 = arith.constant 0 : i32
    %11 = arith.cmpi eq, %arg3, %c0_i32_10 : i32
    %12 = arith.extui %11 : i1 to i32
    %c0_i32_11 = arith.constant 0 : i32
    %13 = arith.cmpi ne, %12, %c0_i32_11 : i32
    scf.if %13 {
      %c0_12 = arith.constant 0 : index
      %c0_13 = arith.constant 0 : index
      %14 = vector.load %arg10[%c0_12, %c0_13] : memref<128x128xf32, #tpu.memory_space<vmem>>, vector<128x128xf32>
      %c0_14 = arith.constant 0 : index
      %c0_15 = arith.constant 0 : index
      %15 = vector.load %arg6[%c0_14, %c0_15] : memref<1x128xf32, #tpu.memory_space<vmem>>, vector<1x128xf32>
      %16 = vector.broadcast %15 : vector<1x128xf32> to vector<128x128xf32>
      %17 = arith.addf %14, %16 : vector<128x128xf32>
      %18 = arith.truncf %17 : vector<128x128xf32> to vector<128x128xbf16>
      %c0_16 = arith.constant 0 : index
      %c0_17 = arith.constant 0 : index
      %c0_18 = arith.constant 0 : index
      %19 = vector.load %arg7[%c0_16, %c0_17, %c0_18] : memref<1x128x128xbf16, #tpu.memory_space<vmem>>, vector<1x128x128xbf16>
      %20 = vector.shape_cast %19 : vector<1x128x128xbf16> to vector<128x128xbf16>
      %21 = vector.shape_cast %18 : vector<128x128xbf16> to vector<1x128x128xbf16>
      tpu.vector_store %arg7[%c0_16, %c0_17, %c0_18], %21 {strides = array<i32>} : memref<1x128x128xbf16, #tpu.memory_space<vmem>>, vector<1x128x128xbf16>,
      %cst_19 = arith.constant dense<0.000000e+00> : vector<128xf32>
      %22 = vector.multi_reduction <add>, %17, %cst_19 [0] : vector<128x128xf32> to vector<128xf32>
      %23 = vector.shape_cast %22 : vector<128xf32> to vector<1x128xf32>
      %24 = arith.mulf %17, %17 : vector<128x128xf32>
      %cst_20 = arith.constant dense<0.000000e+00> : vector<128xf32>
      %25 = vector.multi_reduction <add>, %24, %cst_20 [0] : vector<128x128xf32> to vector<128xf32>
      %26 = vector.shape_cast %25 : vector<128xf32> to vector<1x128xf32>
      %27 = vector.shape_cast %23 : vector<1x128xf32> to vector<1x128xf32>
      %28 = vector.broadcast %27 : vector<1x128xf32> to vector<8x128xf32>
      %c0_21 = arith.constant 0 : index
      %c0_22 = arith.constant 0 : index
      %c0_23 = arith.constant 0 : index
      %29 = vector.load %arg8[%c0_21, %c0_22, %c0_23] : memref<1x8x128xf32, #tpu.memory_space<vmem>>, vector<1x8x128xf32>
      %30 = vector.shape_cast %29 : vector<1x8x128xf32> to vector<8x128xf32>
      %31 = vector.shape_cast %28 : vector<8x128xf32> to vector<1x8x128xf32>
      tpu.vector_store %arg8[%c0_21, %c0_22, %c0_23], %31 {strides = array<i32>} : memref<1x8x128xf32, #tpu.memory_space<vmem>>, vector<1x8x128xf32>,
      %32 = vector.shape_cast %26 : vector<1x128xf32> to vector<1x128xf32>
      %33 = vector.broadcast %32 : vector<1x128xf32> to vector<8x128xf32>
      %c0_24 = arith.constant 0 : index
      %c0_25 = arith.constant 0 : index
      %c0_26 = arith.constant 0 : index
      %34 = vector.load %arg9[%c0_24, %c0_25, %c0_26] : memref<1x8x128xf32, #tpu.memory_space<vmem>>, vector<1x8x128xf32>
      %35 = vector.shape_cast %34 : vector<1x8x128xf32> to vector<8x128xf32>
      %36 = vector.shape_cast %33 : vector<8x128xf32> to vector<1x8x128xf32>
      tpu.vector_store %arg9[%c0_24, %c0_25, %c0_26], %36 {strides = array<i32>} : memref<1x8x128xf32, #tpu.memory_space<vmem>>, vector<1x8x128xf32>,
    } else {
    }
    return
  }
  func.func @transform_0(%arg0: i32, %arg1: i32, %arg2: i32, %arg3: i32) -> (i32, i32, i32) {
    %c0_i32 = arith.constant 0 : i32
    return %arg0, %arg1, %arg3 : i32, i32, i32
  }
  func.func @transform_1(%arg0: i32, %arg1: i32, %arg2: i32, %arg3: i32) -> (i32, i32, i32) {
    %c0_i32 = arith.constant 0 : i32
    return %arg0, %arg3, %arg2 : i32, i32, i32
  }
  func.func @transform_2(%arg0: i32, %arg1: i32, %arg2: i32, %arg3: i32) -> (i32, i32) {
    %c0_i32 = arith.constant 0 : i32
    %c0_i32_0 = arith.constant 0 : i32
    return %c0_i32, %arg2 : i32, i32
  }
  func.func @transform_3(%arg0: i32, %arg1: i32, %arg2: i32, %arg3: i32) -> (i32, i32, i32) {
    %c0_i32 = arith.constant 0 : i32
    return %arg0, %arg1, %arg2 : i32, i32, i32
  }
  func.func @transform_4(%arg0: i32, %arg1: i32, %arg2: i32, %arg3: i32) -> (i32, i32, i32) {
    %c0_i32 = arith.constant 0 : i32
    return %arg0, %arg1, %arg2 : i32, i32, i32
  }
  func.func @transform_5(%arg0: i32, %arg1: i32, %arg2: i32, %arg3: i32) -> (i32, i32, i32) {
    %c0_i32 = arith.constant 0 : i32
    return %arg0, %arg1, %arg2 : i32, i32, i32
  }
}

module attributes {stable_mosaic.version = 11 : i64} {
  func.func @_affine_act_kernel(%arg0: i32, %arg1: memref<128x128xbf16, #tpu.memory_space<vmem>>, %arg2: memref<1x128xf32, #tpu.memory_space<vmem>>, %arg3: memref<1x128xf32, #tpu.memory_space<vmem>>, %arg4: memref<128x128xbf16, #tpu.memory_space<vmem>>) attributes {dimension_semantics = [#tpu.dimension_semantics<parallel>], iteration_bounds = array<i64: 1>, scalar_prefetch = 0 : i64, scratch_operands = 0 : i64, tpu.core_type = #tpu.core_type<tc>, window_params = [{transform_indices = @transform_0, window_bounds = array<i64: 128, 128>}, {pipeline_mode = #tpu.pipeline_mode<synchronous>, transform_indices = @transform_1, window_bounds = array<i64: 1, 128>}, {pipeline_mode = #tpu.pipeline_mode<synchronous>, transform_indices = @transform_2, window_bounds = array<i64: 1, 128>}, {transform_indices = @transform_3, window_bounds = array<i64: 128, 128>}]} {
    %c0 = arith.constant 0 : index
    %c0_0 = arith.constant 0 : index
    %0 = vector.load %arg1[%c0, %c0_0] : memref<128x128xbf16, #tpu.memory_space<vmem>>, vector<128x128xbf16>
    %1 = arith.extf %0 : vector<128x128xbf16> to vector<128x128xf32>
    %c0_1 = arith.constant 0 : index
    %c0_2 = arith.constant 0 : index
    %2 = vector.load %arg2[%c0_1, %c0_2] : memref<1x128xf32, #tpu.memory_space<vmem>>, vector<1x128xf32>
    %3 = vector.broadcast %2 : vector<1x128xf32> to vector<128x128xf32>
    %4 = arith.mulf %1, %3 : vector<128x128xf32>
    %c0_3 = arith.constant 0 : index
    %c0_4 = arith.constant 0 : index
    %5 = vector.load %arg3[%c0_3, %c0_4] : memref<1x128xf32, #tpu.memory_space<vmem>>, vector<1x128xf32>
    %6 = vector.broadcast %5 : vector<1x128xf32> to vector<128x128xf32>
    %7 = arith.addf %4, %6 : vector<128x128xf32>
    %cst = arith.constant 0.000000e+00 : f32
    %8 = vector.broadcast %cst : f32 to vector<128x128xf32>
    %9 = arith.cmpf oge, %7, %8 : vector<128x128xf32>
    %cst_5 = arith.constant 2.000000e-01 : f32
    %10 = vector.broadcast %cst_5 : f32 to vector<128x128xf32>
    %11 = arith.mulf %10, %7 : vector<128x128xf32>
    %12 = arith.select %9, %7, %11 : vector<128x128xi1>, vector<128x128xf32>
    %13 = arith.truncf %12 : vector<128x128xf32> to vector<128x128xbf16>
    %c0_6 = arith.constant 0 : index
    %c0_7 = arith.constant 0 : index
    %14 = vector.load %arg4[%c0_6, %c0_7] : memref<128x128xbf16, #tpu.memory_space<vmem>>, vector<128x128xbf16>
    tpu.vector_store %arg4[%c0_6, %c0_7], %13 {strides = array<i32>} : memref<128x128xbf16, #tpu.memory_space<vmem>>, vector<128x128xbf16>,
    return
  }
  func.func @transform_0(%arg0: i32) -> (i32, i32) {
    %c0_i32 = arith.constant 0 : i32
    %c0_i32_0 = arith.constant 0 : i32
    return %arg0, %c0_i32 : i32, i32
  }
  func.func @transform_1(%arg0: i32) -> (i32, i32) {
    %c0_i32 = arith.constant 0 : i32
    %c0_i32_0 = arith.constant 0 : i32
    %c0_i32_1 = arith.constant 0 : i32
    return %c0_i32, %c0_i32_0 : i32, i32
  }
  func.func @transform_2(%arg0: i32) -> (i32, i32) {
    %c0_i32 = arith.constant 0 : i32
    %c0_i32_0 = arith.constant 0 : i32
    %c0_i32_1 = arith.constant 0 : i32
    return %c0_i32, %c0_i32_0 : i32, i32
  }
  func.func @transform_3(%arg0: i32) -> (i32, i32) {
    %c0_i32 = arith.constant 0 : i32
    %c0_i32_0 = arith.constant 0 : i32
    return %arg0, %c0_i32 : i32, i32
  }
}

module attributes {stable_mosaic.version = 11 : i64} {
  func.func @_conv_mm_kernel(%arg0: i32, %arg1: i32, %arg2: i32, %arg3: i32, %arg4: memref<1x32x256xbf16, #tpu.memory_space<vmem>>, %arg5: memref<1x256x128xbf16, #tpu.memory_space<vmem>>, %arg6: memref<1x128xf32, #tpu.memory_space<vmem>>, %arg7: memref<1x32x128xbf16, #tpu.memory_space<vmem>>, %arg8: memref<1x8x128xf32, #tpu.memory_space<vmem>>, %arg9: memref<1x8x128xf32, #tpu.memory_space<vmem>>, %arg10: memref<32x128xf32, #tpu.memory_space<vmem>>) attributes {dimension_semantics = [#tpu.dimension_semantics<parallel>, #tpu.dimension_semantics<parallel>, #tpu.dimension_semantics<parallel>, #tpu.dimension_semantics<arbitrary>], iteration_bounds = array<i64: 1, 1, 1, 1>, scalar_prefetch = 0 : i64, scratch_operands = 1 : i64, tpu.core_type = #tpu.core_type<tc>, window_params = [{transform_indices = @transform_0, window_bounds = array<i64: 1, 32, 256>}, {transform_indices = @transform_1, window_bounds = array<i64: 1, 256, 128>}, {transform_indices = @transform_2, window_bounds = array<i64: 1, 128>}, {transform_indices = @transform_3, window_bounds = array<i64: 1, 32, 128>}, {transform_indices = @transform_4, window_bounds = array<i64: 1, 8, 128>}, {transform_indices = @transform_5, window_bounds = array<i64: 1, 8, 128>}]} {
    %c0_i32 = arith.constant 0 : i32
    %0 = arith.cmpi eq, %arg3, %c0_i32 : i32
    %1 = arith.extui %0 : i1 to i32
    %c0_i32_0 = arith.constant 0 : i32
    %2 = arith.cmpi ne, %1, %c0_i32_0 : i32
    scf.if %2 {
      %cst_12 = arith.constant 0.000000e+00 : f32
      %14 = vector.broadcast %cst_12 : f32 to vector<32x128xf32>
      %c0_13 = arith.constant 0 : index
      %c0_14 = arith.constant 0 : index
      %15 = vector.load %arg10[%c0_13, %c0_14] : memref<32x128xf32, #tpu.memory_space<vmem>>, vector<32x128xf32>
      tpu.vector_store %arg10[%c0_13, %c0_14], %14 {strides = array<i32>} : memref<32x128xf32, #tpu.memory_space<vmem>>, vector<32x128xf32>,
    } else {
    }
    %c0 = arith.constant 0 : index
    %c0_1 = arith.constant 0 : index
    %3 = vector.load %arg10[%c0, %c0_1] : memref<32x128xf32, #tpu.memory_space<vmem>>, vector<32x128xf32>
    %c0_2 = arith.constant 0 : index
    %c0_3 = arith.constant 0 : index
    %c0_4 = arith.constant 0 : index
    %4 = vector.load %arg4[%c0_2, %c0_3, %c0_4] : memref<1x32x256xbf16, #tpu.memory_space<vmem>>, vector<1x32x256xbf16>
    %5 = vector.shape_cast %4 : vector<1x32x256xbf16> to vector<32x256xbf16>
    %c0_5 = arith.constant 0 : index
    %c0_6 = arith.constant 0 : index
    %c0_7 = arith.constant 0 : index
    %6 = vector.load %arg5[%c0_5, %c0_6, %c0_7] : memref<1x256x128xbf16, #tpu.memory_space<vmem>>, vector<1x256x128xbf16>
    %7 = vector.shape_cast %6 : vector<1x256x128xbf16> to vector<256x128xbf16>
    %cst = arith.constant dense<0.000000e+00> : vector<32x128xf32>
    %8 = tpu.matmul %5, %7, %cst {dimension_numbers = #tpu.dot_dimension_numbers<[1], [0], [0], [1], [0, 0, 1, 1], [], []>} : vector<32x256xbf16>, vector<256x128xbf16>, vector<32x128xf32> -> vector<32x128xf32>
    %9 = arith.addf %3, %8 : vector<32x128xf32>
    %c0_8 = arith.constant 0 : index
    %c0_9 = arith.constant 0 : index
    %10 = vector.load %arg10[%c0_8, %c0_9] : memref<32x128xf32, #tpu.memory_space<vmem>>, vector<32x128xf32>
    tpu.vector_store %arg10[%c0_8, %c0_9], %9 {strides = array<i32>} : memref<32x128xf32, #tpu.memory_space<vmem>>, vector<32x128xf32>,
    %c0_i32_10 = arith.constant 0 : i32
    %11 = arith.cmpi eq, %arg3, %c0_i32_10 : i32
    %12 = arith.extui %11 : i1 to i32
    %c0_i32_11 = arith.constant 0 : i32
    %13 = arith.cmpi ne, %12, %c0_i32_11 : i32
    scf.if %13 {
      %c0_12 = arith.constant 0 : index
      %c0_13 = arith.constant 0 : index
      %14 = vector.load %arg10[%c0_12, %c0_13] : memref<32x128xf32, #tpu.memory_space<vmem>>, vector<32x128xf32>
      %c0_14 = arith.constant 0 : index
      %c0_15 = arith.constant 0 : index
      %15 = vector.load %arg6[%c0_14, %c0_15] : memref<1x128xf32, #tpu.memory_space<vmem>>, vector<1x128xf32>
      %16 = vector.broadcast %15 : vector<1x128xf32> to vector<32x128xf32>
      %17 = arith.addf %14, %16 : vector<32x128xf32>
      %18 = arith.truncf %17 : vector<32x128xf32> to vector<32x128xbf16>
      %c0_16 = arith.constant 0 : index
      %c0_17 = arith.constant 0 : index
      %c0_18 = arith.constant 0 : index
      %19 = vector.load %arg7[%c0_16, %c0_17, %c0_18] : memref<1x32x128xbf16, #tpu.memory_space<vmem>>, vector<1x32x128xbf16>
      %20 = vector.shape_cast %19 : vector<1x32x128xbf16> to vector<32x128xbf16>
      %21 = vector.shape_cast %18 : vector<32x128xbf16> to vector<1x32x128xbf16>
      tpu.vector_store %arg7[%c0_16, %c0_17, %c0_18], %21 {strides = array<i32>} : memref<1x32x128xbf16, #tpu.memory_space<vmem>>, vector<1x32x128xbf16>,
      %cst_19 = arith.constant dense<0.000000e+00> : vector<128xf32>
      %22 = vector.multi_reduction <add>, %17, %cst_19 [0] : vector<32x128xf32> to vector<128xf32>
      %23 = vector.shape_cast %22 : vector<128xf32> to vector<1x128xf32>
      %24 = arith.mulf %17, %17 : vector<32x128xf32>
      %cst_20 = arith.constant dense<0.000000e+00> : vector<128xf32>
      %25 = vector.multi_reduction <add>, %24, %cst_20 [0] : vector<32x128xf32> to vector<128xf32>
      %26 = vector.shape_cast %25 : vector<128xf32> to vector<1x128xf32>
      %27 = vector.shape_cast %23 : vector<1x128xf32> to vector<1x128xf32>
      %28 = vector.broadcast %27 : vector<1x128xf32> to vector<8x128xf32>
      %c0_21 = arith.constant 0 : index
      %c0_22 = arith.constant 0 : index
      %c0_23 = arith.constant 0 : index
      %29 = vector.load %arg8[%c0_21, %c0_22, %c0_23] : memref<1x8x128xf32, #tpu.memory_space<vmem>>, vector<1x8x128xf32>
      %30 = vector.shape_cast %29 : vector<1x8x128xf32> to vector<8x128xf32>
      %31 = vector.shape_cast %28 : vector<8x128xf32> to vector<1x8x128xf32>
      tpu.vector_store %arg8[%c0_21, %c0_22, %c0_23], %31 {strides = array<i32>} : memref<1x8x128xf32, #tpu.memory_space<vmem>>, vector<1x8x128xf32>,
      %32 = vector.shape_cast %26 : vector<1x128xf32> to vector<1x128xf32>
      %33 = vector.broadcast %32 : vector<1x128xf32> to vector<8x128xf32>
      %c0_24 = arith.constant 0 : index
      %c0_25 = arith.constant 0 : index
      %c0_26 = arith.constant 0 : index
      %34 = vector.load %arg9[%c0_24, %c0_25, %c0_26] : memref<1x8x128xf32, #tpu.memory_space<vmem>>, vector<1x8x128xf32>
      %35 = vector.shape_cast %34 : vector<1x8x128xf32> to vector<8x128xf32>
      %36 = vector.shape_cast %33 : vector<8x128xf32> to vector<1x8x128xf32>
      tpu.vector_store %arg9[%c0_24, %c0_25, %c0_26], %36 {strides = array<i32>} : memref<1x8x128xf32, #tpu.memory_space<vmem>>, vector<1x8x128xf32>,
    } else {
    }
    return
  }
  func.func @transform_0(%arg0: i32, %arg1: i32, %arg2: i32, %arg3: i32) -> (i32, i32, i32) {
    %c0_i32 = arith.constant 0 : i32
    return %arg0, %arg1, %arg3 : i32, i32, i32
  }
  func.func @transform_1(%arg0: i32, %arg1: i32, %arg2: i32, %arg3: i32) -> (i32, i32, i32) {
    %c0_i32 = arith.constant 0 : i32
    return %arg0, %arg3, %arg2 : i32, i32, i32
  }
  func.func @transform_2(%arg0: i32, %arg1: i32, %arg2: i32, %arg3: i32) -> (i32, i32) {
    %c0_i32 = arith.constant 0 : i32
    %c0_i32_0 = arith.constant 0 : i32
    return %c0_i32, %arg2 : i32, i32
  }
  func.func @transform_3(%arg0: i32, %arg1: i32, %arg2: i32, %arg3: i32) -> (i32, i32, i32) {
    %c0_i32 = arith.constant 0 : i32
    return %arg0, %arg1, %arg2 : i32, i32, i32
  }
  func.func @transform_4(%arg0: i32, %arg1: i32, %arg2: i32, %arg3: i32) -> (i32, i32, i32) {
    %c0_i32 = arith.constant 0 : i32
    return %arg0, %arg1, %arg2 : i32, i32, i32
  }
  func.func @transform_5(%arg0: i32, %arg1: i32, %arg2: i32, %arg3: i32) -> (i32, i32, i32) {
    %c0_i32 = arith.constant 0 : i32
    return %arg0, %arg1, %arg2 : i32, i32, i32
  }
}

module attributes {stable_mosaic.version = 11 : i64} {
  func.func @_affine_act_kernel(%arg0: i32, %arg1: memref<32x128xbf16, #tpu.memory_space<vmem>>, %arg2: memref<1x128xf32, #tpu.memory_space<vmem>>, %arg3: memref<1x128xf32, #tpu.memory_space<vmem>>, %arg4: memref<32x128xbf16, #tpu.memory_space<vmem>>) attributes {dimension_semantics = [#tpu.dimension_semantics<parallel>], iteration_bounds = array<i64: 1>, scalar_prefetch = 0 : i64, scratch_operands = 0 : i64, tpu.core_type = #tpu.core_type<tc>, window_params = [{transform_indices = @transform_0, window_bounds = array<i64: 32, 128>}, {pipeline_mode = #tpu.pipeline_mode<synchronous>, transform_indices = @transform_1, window_bounds = array<i64: 1, 128>}, {pipeline_mode = #tpu.pipeline_mode<synchronous>, transform_indices = @transform_2, window_bounds = array<i64: 1, 128>}, {transform_indices = @transform_3, window_bounds = array<i64: 32, 128>}]} {
    %c0 = arith.constant 0 : index
    %c0_0 = arith.constant 0 : index
    %0 = vector.load %arg1[%c0, %c0_0] : memref<32x128xbf16, #tpu.memory_space<vmem>>, vector<32x128xbf16>
    %1 = arith.extf %0 : vector<32x128xbf16> to vector<32x128xf32>
    %c0_1 = arith.constant 0 : index
    %c0_2 = arith.constant 0 : index
    %2 = vector.load %arg2[%c0_1, %c0_2] : memref<1x128xf32, #tpu.memory_space<vmem>>, vector<1x128xf32>
    %3 = vector.broadcast %2 : vector<1x128xf32> to vector<32x128xf32>
    %4 = arith.mulf %1, %3 : vector<32x128xf32>
    %c0_3 = arith.constant 0 : index
    %c0_4 = arith.constant 0 : index
    %5 = vector.load %arg3[%c0_3, %c0_4] : memref<1x128xf32, #tpu.memory_space<vmem>>, vector<1x128xf32>
    %6 = vector.broadcast %5 : vector<1x128xf32> to vector<32x128xf32>
    %7 = arith.addf %4, %6 : vector<32x128xf32>
    %cst = arith.constant 0.000000e+00 : f32
    %8 = vector.broadcast %cst : f32 to vector<32x128xf32>
    %9 = arith.cmpf oge, %7, %8 : vector<32x128xf32>
    %cst_5 = arith.constant 2.000000e-01 : f32
    %10 = vector.broadcast %cst_5 : f32 to vector<32x128xf32>
    %11 = arith.mulf %10, %7 : vector<32x128xf32>
    %12 = arith.select %9, %7, %11 : vector<32x128xi1>, vector<32x128xf32>
    %13 = arith.truncf %12 : vector<32x128xf32> to vector<32x128xbf16>
    %c0_6 = arith.constant 0 : index
    %c0_7 = arith.constant 0 : index
    %14 = vector.load %arg4[%c0_6, %c0_7] : memref<32x128xbf16, #tpu.memory_space<vmem>>, vector<32x128xbf16>
    tpu.vector_store %arg4[%c0_6, %c0_7], %13 {strides = array<i32>} : memref<32x128xbf16, #tpu.memory_space<vmem>>, vector<32x128xbf16>,
    return
  }
  func.func @transform_0(%arg0: i32) -> (i32, i32) {
    %c0_i32 = arith.constant 0 : i32
    %c0_i32_0 = arith.constant 0 : i32
    return %arg0, %c0_i32 : i32, i32
  }
  func.func @transform_1(%arg0: i32) -> (i32, i32) {
    %c0_i32 = arith.constant 0 : i32
    %c0_i32_0 = arith.constant 0 : i32
    %c0_i32_1 = arith.constant 0 : i32
    return %c0_i32, %c0_i32_0 : i32, i32
  }
  func.func @transform_2(%arg0: i32) -> (i32, i32) {
    %c0_i32 = arith.constant 0 : i32
    %c0_i32_0 = arith.constant 0 : i32
    %c0_i32_1 = arith.constant 0 : i32
    return %c0_i32, %c0_i32_0 : i32, i32
  }
  func.func @transform_3(%arg0: i32) -> (i32, i32) {
    %c0_i32 = arith.constant 0 : i32
    %c0_i32_0 = arith.constant 0 : i32
    return %arg0, %c0_i32 : i32, i32
  }
}

module attributes {stable_mosaic.version = 11 : i64} {
  func.func @_conv_mm_kernel(%arg0: i32, %arg1: i32, %arg2: i32, %arg3: i32, %arg4: memref<1x16x512xbf16, #tpu.memory_space<vmem>>, %arg5: memref<1x512x128xbf16, #tpu.memory_space<vmem>>, %arg6: memref<1x128xf32, #tpu.memory_space<vmem>>, %arg7: memref<1x16x128xbf16, #tpu.memory_space<vmem>>, %arg8: memref<1x8x128xf32, #tpu.memory_space<vmem>>, %arg9: memref<1x8x128xf32, #tpu.memory_space<vmem>>, %arg10: memref<16x128xf32, #tpu.memory_space<vmem>>) attributes {dimension_semantics = [#tpu.dimension_semantics<parallel>, #tpu.dimension_semantics<parallel>, #tpu.dimension_semantics<parallel>, #tpu.dimension_semantics<arbitrary>], iteration_bounds = array<i64: 1, 1, 1, 1>, scalar_prefetch = 0 : i64, scratch_operands = 1 : i64, tpu.core_type = #tpu.core_type<tc>, window_params = [{transform_indices = @transform_0, window_bounds = array<i64: 1, 16, 512>}, {transform_indices = @transform_1, window_bounds = array<i64: 1, 512, 128>}, {transform_indices = @transform_2, window_bounds = array<i64: 1, 128>}, {transform_indices = @transform_3, window_bounds = array<i64: 1, 16, 128>}, {transform_indices = @transform_4, window_bounds = array<i64: 1, 8, 128>}, {transform_indices = @transform_5, window_bounds = array<i64: 1, 8, 128>}]} {
    %c0_i32 = arith.constant 0 : i32
    %0 = arith.cmpi eq, %arg3, %c0_i32 : i32
    %1 = arith.extui %0 : i1 to i32
    %c0_i32_0 = arith.constant 0 : i32
    %2 = arith.cmpi ne, %1, %c0_i32_0 : i32
    scf.if %2 {
      %cst_12 = arith.constant 0.000000e+00 : f32
      %14 = vector.broadcast %cst_12 : f32 to vector<16x128xf32>
      %c0_13 = arith.constant 0 : index
      %c0_14 = arith.constant 0 : index
      %15 = vector.load %arg10[%c0_13, %c0_14] : memref<16x128xf32, #tpu.memory_space<vmem>>, vector<16x128xf32>
      tpu.vector_store %arg10[%c0_13, %c0_14], %14 {strides = array<i32>} : memref<16x128xf32, #tpu.memory_space<vmem>>, vector<16x128xf32>,
    } else {
    }
    %c0 = arith.constant 0 : index
    %c0_1 = arith.constant 0 : index
    %3 = vector.load %arg10[%c0, %c0_1] : memref<16x128xf32, #tpu.memory_space<vmem>>, vector<16x128xf32>
    %c0_2 = arith.constant 0 : index
    %c0_3 = arith.constant 0 : index
    %c0_4 = arith.constant 0 : index
    %4 = vector.load %arg4[%c0_2, %c0_3, %c0_4] : memref<1x16x512xbf16, #tpu.memory_space<vmem>>, vector<1x16x512xbf16>
    %5 = vector.shape_cast %4 : vector<1x16x512xbf16> to vector<16x512xbf16>
    %c0_5 = arith.constant 0 : index
    %c0_6 = arith.constant 0 : index
    %c0_7 = arith.constant 0 : index
    %6 = vector.load %arg5[%c0_5, %c0_6, %c0_7] : memref<1x512x128xbf16, #tpu.memory_space<vmem>>, vector<1x512x128xbf16>
    %7 = vector.shape_cast %6 : vector<1x512x128xbf16> to vector<512x128xbf16>
    %cst = arith.constant dense<0.000000e+00> : vector<16x128xf32>
    %8 = tpu.matmul %5, %7, %cst {dimension_numbers = #tpu.dot_dimension_numbers<[1], [0], [0], [1], [0, 0, 1, 1], [], []>} : vector<16x512xbf16>, vector<512x128xbf16>, vector<16x128xf32> -> vector<16x128xf32>
    %9 = arith.addf %3, %8 : vector<16x128xf32>
    %c0_8 = arith.constant 0 : index
    %c0_9 = arith.constant 0 : index
    %10 = vector.load %arg10[%c0_8, %c0_9] : memref<16x128xf32, #tpu.memory_space<vmem>>, vector<16x128xf32>
    tpu.vector_store %arg10[%c0_8, %c0_9], %9 {strides = array<i32>} : memref<16x128xf32, #tpu.memory_space<vmem>>, vector<16x128xf32>,
    %c0_i32_10 = arith.constant 0 : i32
    %11 = arith.cmpi eq, %arg3, %c0_i32_10 : i32
    %12 = arith.extui %11 : i1 to i32
    %c0_i32_11 = arith.constant 0 : i32
    %13 = arith.cmpi ne, %12, %c0_i32_11 : i32
    scf.if %13 {
      %c0_12 = arith.constant 0 : index
      %c0_13 = arith.constant 0 : index
      %14 = vector.load %arg10[%c0_12, %c0_13] : memref<16x128xf32, #tpu.memory_space<vmem>>, vector<16x128xf32>
      %c0_14 = arith.constant 0 : index
      %c0_15 = arith.constant 0 : index
      %15 = vector.load %arg6[%c0_14, %c0_15] : memref<1x128xf32, #tpu.memory_space<vmem>>, vector<1x128xf32>
      %16 = vector.broadcast %15 : vector<1x128xf32> to vector<16x128xf32>
      %17 = arith.addf %14, %16 : vector<16x128xf32>
      %18 = arith.truncf %17 : vector<16x128xf32> to vector<16x128xbf16>
      %c0_16 = arith.constant 0 : index
      %c0_17 = arith.constant 0 : index
      %c0_18 = arith.constant 0 : index
      %19 = vector.load %arg7[%c0_16, %c0_17, %c0_18] : memref<1x16x128xbf16, #tpu.memory_space<vmem>>, vector<1x16x128xbf16>
      %20 = vector.shape_cast %19 : vector<1x16x128xbf16> to vector<16x128xbf16>
      %21 = vector.shape_cast %18 : vector<16x128xbf16> to vector<1x16x128xbf16>
      tpu.vector_store %arg7[%c0_16, %c0_17, %c0_18], %21 {strides = array<i32>} : memref<1x16x128xbf16, #tpu.memory_space<vmem>>, vector<1x16x128xbf16>,
      %cst_19 = arith.constant dense<0.000000e+00> : vector<128xf32>
      %22 = vector.multi_reduction <add>, %17, %cst_19 [0] : vector<16x128xf32> to vector<128xf32>
      %23 = vector.shape_cast %22 : vector<128xf32> to vector<1x128xf32>
      %24 = arith.mulf %17, %17 : vector<16x128xf32>
      %cst_20 = arith.constant dense<0.000000e+00> : vector<128xf32>
      %25 = vector.multi_reduction <add>, %24, %cst_20 [0] : vector<16x128xf32> to vector<128xf32>
      %26 = vector.shape_cast %25 : vector<128xf32> to vector<1x128xf32>
      %27 = vector.shape_cast %23 : vector<1x128xf32> to vector<1x128xf32>
      %28 = vector.broadcast %27 : vector<1x128xf32> to vector<8x128xf32>
      %c0_21 = arith.constant 0 : index
      %c0_22 = arith.constant 0 : index
      %c0_23 = arith.constant 0 : index
      %29 = vector.load %arg8[%c0_21, %c0_22, %c0_23] : memref<1x8x128xf32, #tpu.memory_space<vmem>>, vector<1x8x128xf32>
      %30 = vector.shape_cast %29 : vector<1x8x128xf32> to vector<8x128xf32>
      %31 = vector.shape_cast %28 : vector<8x128xf32> to vector<1x8x128xf32>
      tpu.vector_store %arg8[%c0_21, %c0_22, %c0_23], %31 {strides = array<i32>} : memref<1x8x128xf32, #tpu.memory_space<vmem>>, vector<1x8x128xf32>,
      %32 = vector.shape_cast %26 : vector<1x128xf32> to vector<1x128xf32>
      %33 = vector.broadcast %32 : vector<1x128xf32> to vector<8x128xf32>
      %c0_24 = arith.constant 0 : index
      %c0_25 = arith.constant 0 : index
      %c0_26 = arith.constant 0 : index
      %34 = vector.load %arg9[%c0_24, %c0_25, %c0_26] : memref<1x8x128xf32, #tpu.memory_space<vmem>>, vector<1x8x128xf32>
      %35 = vector.shape_cast %34 : vector<1x8x128xf32> to vector<8x128xf32>
      %36 = vector.shape_cast %33 : vector<8x128xf32> to vector<1x8x128xf32>
      tpu.vector_store %arg9[%c0_24, %c0_25, %c0_26], %36 {strides = array<i32>} : memref<1x8x128xf32, #tpu.memory_space<vmem>>, vector<1x8x128xf32>,
    } else {
    }
    return
  }
  func.func @transform_0(%arg0: i32, %arg1: i32, %arg2: i32, %arg3: i32) -> (i32, i32, i32) {
    %c0_i32 = arith.constant 0 : i32
    return %arg0, %arg1, %arg3 : i32, i32, i32
  }
  func.func @transform_1(%arg0: i32, %arg1: i32, %arg2: i32, %arg3: i32) -> (i32, i32, i32) {
    %c0_i32 = arith.constant 0 : i32
    return %arg0, %arg3, %arg2 : i32, i32, i32
  }
  func.func @transform_2(%arg0: i32, %arg1: i32, %arg2: i32, %arg3: i32) -> (i32, i32) {
    %c0_i32 = arith.constant 0 : i32
    %c0_i32_0 = arith.constant 0 : i32
    return %c0_i32, %arg2 : i32, i32
  }
  func.func @transform_3(%arg0: i32, %arg1: i32, %arg2: i32, %arg3: i32) -> (i32, i32, i32) {
    %c0_i32 = arith.constant 0 : i32
    return %arg0, %arg1, %arg2 : i32, i32, i32
  }
  func.func @transform_4(%arg0: i32, %arg1: i32, %arg2: i32, %arg3: i32) -> (i32, i32, i32) {
    %c0_i32 = arith.constant 0 : i32
    return %arg0, %arg1, %arg2 : i32, i32, i32
  }
  func.func @transform_5(%arg0: i32, %arg1: i32, %arg2: i32, %arg3: i32) -> (i32, i32, i32) {
    %c0_i32 = arith.constant 0 : i32
    return %arg0, %arg1, %arg2 : i32, i32, i32
  }
}

module attributes {stable_mosaic.version = 11 : i64} {
  func.func @_affine_act_kernel(%arg0: i32, %arg1: memref<16x128xbf16, #tpu.memory_space<vmem>>, %arg2: memref<1x128xf32, #tpu.memory_space<vmem>>, %arg3: memref<1x128xf32, #tpu.memory_space<vmem>>, %arg4: memref<16x128xbf16, #tpu.memory_space<vmem>>) attributes {dimension_semantics = [#tpu.dimension_semantics<parallel>], iteration_bounds = array<i64: 1>, scalar_prefetch = 0 : i64, scratch_operands = 0 : i64, tpu.core_type = #tpu.core_type<tc>, window_params = [{transform_indices = @transform_0, window_bounds = array<i64: 16, 128>}, {pipeline_mode = #tpu.pipeline_mode<synchronous>, transform_indices = @transform_1, window_bounds = array<i64: 1, 128>}, {pipeline_mode = #tpu.pipeline_mode<synchronous>, transform_indices = @transform_2, window_bounds = array<i64: 1, 128>}, {transform_indices = @transform_3, window_bounds = array<i64: 16, 128>}]} {
    %c0 = arith.constant 0 : index
    %c0_0 = arith.constant 0 : index
    %0 = vector.load %arg1[%c0, %c0_0] : memref<16x128xbf16, #tpu.memory_space<vmem>>, vector<16x128xbf16>
    %1 = arith.extf %0 : vector<16x128xbf16> to vector<16x128xf32>
    %c0_1 = arith.constant 0 : index
    %c0_2 = arith.constant 0 : index
    %2 = vector.load %arg2[%c0_1, %c0_2] : memref<1x128xf32, #tpu.memory_space<vmem>>, vector<1x128xf32>
    %3 = vector.broadcast %2 : vector<1x128xf32> to vector<16x128xf32>
    %4 = arith.mulf %1, %3 : vector<16x128xf32>
    %c0_3 = arith.constant 0 : index
    %c0_4 = arith.constant 0 : index
    %5 = vector.load %arg3[%c0_3, %c0_4] : memref<1x128xf32, #tpu.memory_space<vmem>>, vector<1x128xf32>
    %6 = vector.broadcast %5 : vector<1x128xf32> to vector<16x128xf32>
    %7 = arith.addf %4, %6 : vector<16x128xf32>
    %cst = arith.constant 0.000000e+00 : f32
    %8 = vector.broadcast %cst : f32 to vector<16x128xf32>
    %9 = arith.cmpf oge, %7, %8 : vector<16x128xf32>
    %cst_5 = arith.constant 2.000000e-01 : f32
    %10 = vector.broadcast %cst_5 : f32 to vector<16x128xf32>
    %11 = arith.mulf %10, %7 : vector<16x128xf32>
    %12 = arith.select %9, %7, %11 : vector<16x128xi1>, vector<16x128xf32>
    %13 = arith.truncf %12 : vector<16x128xf32> to vector<16x128xbf16>
    %c0_6 = arith.constant 0 : index
    %c0_7 = arith.constant 0 : index
    %14 = vector.load %arg4[%c0_6, %c0_7] : memref<16x128xbf16, #tpu.memory_space<vmem>>, vector<16x128xbf16>
    tpu.vector_store %arg4[%c0_6, %c0_7], %13 {strides = array<i32>} : memref<16x128xbf16, #tpu.memory_space<vmem>>, vector<16x128xbf16>,
    return
  }
  func.func @transform_0(%arg0: i32) -> (i32, i32) {
    %c0_i32 = arith.constant 0 : i32
    %c0_i32_0 = arith.constant 0 : i32
    return %arg0, %c0_i32 : i32, i32
  }
  func.func @transform_1(%arg0: i32) -> (i32, i32) {
    %c0_i32 = arith.constant 0 : i32
    %c0_i32_0 = arith.constant 0 : i32
    %c0_i32_1 = arith.constant 0 : i32
    return %c0_i32, %c0_i32_0 : i32, i32
  }
  func.func @transform_2(%arg0: i32) -> (i32, i32) {
    %c0_i32 = arith.constant 0 : i32
    %c0_i32_0 = arith.constant 0 : i32
    %c0_i32_1 = arith.constant 0 : i32
    return %c0_i32, %c0_i32_0 : i32, i32
  }
  func.func @transform_3(%arg0: i32) -> (i32, i32) {
    %c0_i32 = arith.constant 0 : i32
    %c0_i32_0 = arith.constant 0 : i32
    return %arg0, %c0_i32 : i32, i32
  }
}

module attributes {stable_mosaic.version = 11 : i64} {
  func.func @_conv_mm_kernel(%arg0: i32, %arg1: i32, %arg2: i32, %arg3: i32, %arg4: memref<1x16x512xbf16, #tpu.memory_space<vmem>>, %arg5: memref<1x512x128xbf16, #tpu.memory_space<vmem>>, %arg6: memref<1x128xf32, #tpu.memory_space<vmem>>, %arg7: memref<1x16x128xbf16, #tpu.memory_space<vmem>>, %arg8: memref<16x128xf32, #tpu.memory_space<vmem>>) attributes {dimension_semantics = [#tpu.dimension_semantics<parallel>, #tpu.dimension_semantics<parallel>, #tpu.dimension_semantics<parallel>, #tpu.dimension_semantics<arbitrary>], iteration_bounds = array<i64: 1, 1, 1, 2>, scalar_prefetch = 0 : i64, scratch_operands = 1 : i64, tpu.core_type = #tpu.core_type<tc>, window_params = [{transform_indices = @transform_0, window_bounds = array<i64: 1, 16, 512>}, {transform_indices = @transform_1, window_bounds = array<i64: 1, 512, 128>}, {transform_indices = @transform_2, window_bounds = array<i64: 1, 128>}, {transform_indices = @transform_3, window_bounds = array<i64: 1, 16, 128>}]} {
    %c0_i32 = arith.constant 0 : i32
    %0 = arith.cmpi eq, %arg3, %c0_i32 : i32
    %1 = arith.extui %0 : i1 to i32
    %c0_i32_0 = arith.constant 0 : i32
    %2 = arith.cmpi ne, %1, %c0_i32_0 : i32
    scf.if %2 {
      %cst_11 = arith.constant 0.000000e+00 : f32
      %14 = vector.broadcast %cst_11 : f32 to vector<16x128xf32>
      %c0_12 = arith.constant 0 : index
      %c0_13 = arith.constant 0 : index
      %15 = vector.load %arg8[%c0_12, %c0_13] : memref<16x128xf32, #tpu.memory_space<vmem>>, vector<16x128xf32>
      tpu.vector_store %arg8[%c0_12, %c0_13], %14 {strides = array<i32>} : memref<16x128xf32, #tpu.memory_space<vmem>>, vector<16x128xf32>,
    } else {
    }
    %c0 = arith.constant 0 : index
    %c0_1 = arith.constant 0 : index
    %3 = vector.load %arg8[%c0, %c0_1] : memref<16x128xf32, #tpu.memory_space<vmem>>, vector<16x128xf32>
    %c0_2 = arith.constant 0 : index
    %c0_3 = arith.constant 0 : index
    %c0_4 = arith.constant 0 : index
    %4 = vector.load %arg4[%c0_2, %c0_3, %c0_4] : memref<1x16x512xbf16, #tpu.memory_space<vmem>>, vector<1x16x512xbf16>
    %5 = vector.shape_cast %4 : vector<1x16x512xbf16> to vector<16x512xbf16>
    %c0_5 = arith.constant 0 : index
    %c0_6 = arith.constant 0 : index
    %c0_7 = arith.constant 0 : index
    %6 = vector.load %arg5[%c0_5, %c0_6, %c0_7] : memref<1x512x128xbf16, #tpu.memory_space<vmem>>, vector<1x512x128xbf16>
    %7 = vector.shape_cast %6 : vector<1x512x128xbf16> to vector<512x128xbf16>
    %cst = arith.constant dense<0.000000e+00> : vector<16x128xf32>
    %8 = tpu.matmul %5, %7, %cst {dimension_numbers = #tpu.dot_dimension_numbers<[1], [0], [0], [1], [0, 0, 1, 1], [], []>} : vector<16x512xbf16>, vector<512x128xbf16>, vector<16x128xf32> -> vector<16x128xf32>
    %9 = arith.addf %3, %8 : vector<16x128xf32>
    %c0_8 = arith.constant 0 : index
    %c0_9 = arith.constant 0 : index
    %10 = vector.load %arg8[%c0_8, %c0_9] : memref<16x128xf32, #tpu.memory_space<vmem>>, vector<16x128xf32>
    tpu.vector_store %arg8[%c0_8, %c0_9], %9 {strides = array<i32>} : memref<16x128xf32, #tpu.memory_space<vmem>>, vector<16x128xf32>,
    %c1_i32 = arith.constant 1 : i32
    %11 = arith.cmpi eq, %arg3, %c1_i32 : i32
    %12 = arith.extui %11 : i1 to i32
    %c0_i32_10 = arith.constant 0 : i32
    %13 = arith.cmpi ne, %12, %c0_i32_10 : i32
    scf.if %13 {
      %c0_11 = arith.constant 0 : index
      %c0_12 = arith.constant 0 : index
      %14 = vector.load %arg8[%c0_11, %c0_12] : memref<16x128xf32, #tpu.memory_space<vmem>>, vector<16x128xf32>
      %c0_13 = arith.constant 0 : index
      %c0_14 = arith.constant 0 : index
      %15 = vector.load %arg6[%c0_13, %c0_14] : memref<1x128xf32, #tpu.memory_space<vmem>>, vector<1x128xf32>
      %16 = vector.broadcast %15 : vector<1x128xf32> to vector<16x128xf32>
      %17 = arith.addf %14, %16 : vector<16x128xf32>
      %cst_15 = arith.constant 0.000000e+00 : f32
      %18 = vector.broadcast %cst_15 : f32 to vector<16x128xf32>
      %19 = arith.maximumf %17, %18 : vector<16x128xf32>
      %20 = arith.truncf %19 : vector<16x128xf32> to vector<16x128xbf16>
      %c0_16 = arith.constant 0 : index
      %c0_17 = arith.constant 0 : index
      %c0_18 = arith.constant 0 : index
      %21 = vector.load %arg7[%c0_16, %c0_17, %c0_18] : memref<1x16x128xbf16, #tpu.memory_space<vmem>>, vector<1x16x128xbf16>
      %22 = vector.shape_cast %21 : vector<1x16x128xbf16> to vector<16x128xbf16>
      %23 = vector.shape_cast %20 : vector<16x128xbf16> to vector<1x16x128xbf16>
      tpu.vector_store %arg7[%c0_16, %c0_17, %c0_18], %23 {strides = array<i32>} : memref<1x16x128xbf16, #tpu.memory_space<vmem>>, vector<1x16x128xbf16>,
    } else {
    }
    return
  }
  func.func @transform_0(%arg0: i32, %arg1: i32, %arg2: i32, %arg3: i32) -> (i32, i32, i32) {
    %c0_i32 = arith.constant 0 : i32
    return %arg0, %arg1, %arg3 : i32, i32, i32
  }
  func.func @transform_1(%arg0: i32, %arg1: i32, %arg2: i32, %arg3: i32) -> (i32, i32, i32) {
    %c0_i32 = arith.constant 0 : i32
    return %arg0, %arg3, %arg2 : i32, i32, i32
  }
  func.func @transform_2(%arg0: i32, %arg1: i32, %arg2: i32, %arg3: i32) -> (i32, i32) {
    %c0_i32 = arith.constant 0 : i32
    %c0_i32_0 = arith.constant 0 : i32
    return %c0_i32, %arg2 : i32, i32
  }
  func.func @transform_3(%arg0: i32, %arg1: i32, %arg2: i32, %arg3: i32) -> (i32, i32, i32) {
    %c0_i32 = arith.constant 0 : i32
    return %arg0, %arg1, %arg2 : i32, i32, i32
  }
}

module attributes {stable_mosaic.version = 11 : i64} {
  func.func @_conv_mm_kernel(%arg0: i32, %arg1: i32, %arg2: i32, %arg3: i32, %arg4: memref<1x16x256xbf16, #tpu.memory_space<vmem>>, %arg5: memref<1x256x128xbf16, #tpu.memory_space<vmem>>, %arg6: memref<1x128xf32, #tpu.memory_space<vmem>>, %arg7: memref<1x16x128xbf16, #tpu.memory_space<vmem>>, %arg8: memref<1x8x128xf32, #tpu.memory_space<vmem>>, %arg9: memref<1x8x128xf32, #tpu.memory_space<vmem>>, %arg10: memref<16x128xf32, #tpu.memory_space<vmem>>) attributes {dimension_semantics = [#tpu.dimension_semantics<parallel>, #tpu.dimension_semantics<parallel>, #tpu.dimension_semantics<parallel>, #tpu.dimension_semantics<arbitrary>], iteration_bounds = array<i64: 4, 1, 1, 1>, scalar_prefetch = 0 : i64, scratch_operands = 1 : i64, tpu.core_type = #tpu.core_type<tc>, window_params = [{transform_indices = @transform_0, window_bounds = array<i64: 1, 16, 256>}, {transform_indices = @transform_1, window_bounds = array<i64: 1, 256, 128>}, {transform_indices = @transform_2, window_bounds = array<i64: 1, 128>}, {transform_indices = @transform_3, window_bounds = array<i64: 1, 16, 128>}, {transform_indices = @transform_4, window_bounds = array<i64: 1, 8, 128>}, {transform_indices = @transform_5, window_bounds = array<i64: 1, 8, 128>}]} {
    %c0_i32 = arith.constant 0 : i32
    %0 = arith.cmpi eq, %arg3, %c0_i32 : i32
    %1 = arith.extui %0 : i1 to i32
    %c0_i32_0 = arith.constant 0 : i32
    %2 = arith.cmpi ne, %1, %c0_i32_0 : i32
    scf.if %2 {
      %cst_12 = arith.constant 0.000000e+00 : f32
      %14 = vector.broadcast %cst_12 : f32 to vector<16x128xf32>
      %c0_13 = arith.constant 0 : index
      %c0_14 = arith.constant 0 : index
      %15 = vector.load %arg10[%c0_13, %c0_14] : memref<16x128xf32, #tpu.memory_space<vmem>>, vector<16x128xf32>
      tpu.vector_store %arg10[%c0_13, %c0_14], %14 {strides = array<i32>} : memref<16x128xf32, #tpu.memory_space<vmem>>, vector<16x128xf32>,
    } else {
    }
    %c0 = arith.constant 0 : index
    %c0_1 = arith.constant 0 : index
    %3 = vector.load %arg10[%c0, %c0_1] : memref<16x128xf32, #tpu.memory_space<vmem>>, vector<16x128xf32>
    %c0_2 = arith.constant 0 : index
    %c0_3 = arith.constant 0 : index
    %c0_4 = arith.constant 0 : index
    %4 = vector.load %arg4[%c0_2, %c0_3, %c0_4] : memref<1x16x256xbf16, #tpu.memory_space<vmem>>, vector<1x16x256xbf16>
    %5 = vector.shape_cast %4 : vector<1x16x256xbf16> to vector<16x256xbf16>
    %c0_5 = arith.constant 0 : index
    %c0_6 = arith.constant 0 : index
    %c0_7 = arith.constant 0 : index
    %6 = vector.load %arg5[%c0_5, %c0_6, %c0_7] : memref<1x256x128xbf16, #tpu.memory_space<vmem>>, vector<1x256x128xbf16>
    %7 = vector.shape_cast %6 : vector<1x256x128xbf16> to vector<256x128xbf16>
    %cst = arith.constant dense<0.000000e+00> : vector<16x128xf32>
    %8 = tpu.matmul %5, %7, %cst {dimension_numbers = #tpu.dot_dimension_numbers<[1], [0], [0], [1], [0, 0, 1, 1], [], []>} : vector<16x256xbf16>, vector<256x128xbf16>, vector<16x128xf32> -> vector<16x128xf32>
    %9 = arith.addf %3, %8 : vector<16x128xf32>
    %c0_8 = arith.constant 0 : index
    %c0_9 = arith.constant 0 : index
    %10 = vector.load %arg10[%c0_8, %c0_9] : memref<16x128xf32, #tpu.memory_space<vmem>>, vector<16x128xf32>
    tpu.vector_store %arg10[%c0_8, %c0_9], %9 {strides = array<i32>} : memref<16x128xf32, #tpu.memory_space<vmem>>, vector<16x128xf32>,
    %c0_i32_10 = arith.constant 0 : i32
    %11 = arith.cmpi eq, %arg3, %c0_i32_10 : i32
    %12 = arith.extui %11 : i1 to i32
    %c0_i32_11 = arith.constant 0 : i32
    %13 = arith.cmpi ne, %12, %c0_i32_11 : i32
    scf.if %13 {
      %c0_12 = arith.constant 0 : index
      %c0_13 = arith.constant 0 : index
      %14 = vector.load %arg10[%c0_12, %c0_13] : memref<16x128xf32, #tpu.memory_space<vmem>>, vector<16x128xf32>
      %c0_14 = arith.constant 0 : index
      %c0_15 = arith.constant 0 : index
      %15 = vector.load %arg6[%c0_14, %c0_15] : memref<1x128xf32, #tpu.memory_space<vmem>>, vector<1x128xf32>
      %16 = vector.broadcast %15 : vector<1x128xf32> to vector<16x128xf32>
      %17 = arith.addf %14, %16 : vector<16x128xf32>
      %18 = arith.truncf %17 : vector<16x128xf32> to vector<16x128xbf16>
      %c0_16 = arith.constant 0 : index
      %c0_17 = arith.constant 0 : index
      %c0_18 = arith.constant 0 : index
      %19 = vector.load %arg7[%c0_16, %c0_17, %c0_18] : memref<1x16x128xbf16, #tpu.memory_space<vmem>>, vector<1x16x128xbf16>
      %20 = vector.shape_cast %19 : vector<1x16x128xbf16> to vector<16x128xbf16>
      %21 = vector.shape_cast %18 : vector<16x128xbf16> to vector<1x16x128xbf16>
      tpu.vector_store %arg7[%c0_16, %c0_17, %c0_18], %21 {strides = array<i32>} : memref<1x16x128xbf16, #tpu.memory_space<vmem>>, vector<1x16x128xbf16>,
      %cst_19 = arith.constant dense<0.000000e+00> : vector<128xf32>
      %22 = vector.multi_reduction <add>, %17, %cst_19 [0] : vector<16x128xf32> to vector<128xf32>
      %23 = vector.shape_cast %22 : vector<128xf32> to vector<1x128xf32>
      %24 = arith.mulf %17, %17 : vector<16x128xf32>
      %cst_20 = arith.constant dense<0.000000e+00> : vector<128xf32>
      %25 = vector.multi_reduction <add>, %24, %cst_20 [0] : vector<16x128xf32> to vector<128xf32>
      %26 = vector.shape_cast %25 : vector<128xf32> to vector<1x128xf32>
      %27 = vector.shape_cast %23 : vector<1x128xf32> to vector<1x128xf32>
      %28 = vector.broadcast %27 : vector<1x128xf32> to vector<8x128xf32>
      %c0_21 = arith.constant 0 : index
      %c0_22 = arith.constant 0 : index
      %c0_23 = arith.constant 0 : index
      %29 = vector.load %arg8[%c0_21, %c0_22, %c0_23] : memref<1x8x128xf32, #tpu.memory_space<vmem>>, vector<1x8x128xf32>
      %30 = vector.shape_cast %29 : vector<1x8x128xf32> to vector<8x128xf32>
      %31 = vector.shape_cast %28 : vector<8x128xf32> to vector<1x8x128xf32>
      tpu.vector_store %arg8[%c0_21, %c0_22, %c0_23], %31 {strides = array<i32>} : memref<1x8x128xf32, #tpu.memory_space<vmem>>, vector<1x8x128xf32>,
      %32 = vector.shape_cast %26 : vector<1x128xf32> to vector<1x128xf32>
      %33 = vector.broadcast %32 : vector<1x128xf32> to vector<8x128xf32>
      %c0_24 = arith.constant 0 : index
      %c0_25 = arith.constant 0 : index
      %c0_26 = arith.constant 0 : index
      %34 = vector.load %arg9[%c0_24, %c0_25, %c0_26] : memref<1x8x128xf32, #tpu.memory_space<vmem>>, vector<1x8x128xf32>
      %35 = vector.shape_cast %34 : vector<1x8x128xf32> to vector<8x128xf32>
      %36 = vector.shape_cast %33 : vector<8x128xf32> to vector<1x8x128xf32>
      tpu.vector_store %arg9[%c0_24, %c0_25, %c0_26], %36 {strides = array<i32>} : memref<1x8x128xf32, #tpu.memory_space<vmem>>, vector<1x8x128xf32>,
    } else {
    }
    return
  }
  func.func @transform_0(%arg0: i32, %arg1: i32, %arg2: i32, %arg3: i32) -> (i32, i32, i32) {
    %c0_i32 = arith.constant 0 : i32
    return %arg0, %arg1, %arg3 : i32, i32, i32
  }
  func.func @transform_1(%arg0: i32, %arg1: i32, %arg2: i32, %arg3: i32) -> (i32, i32, i32) {
    %c0_i32 = arith.constant 0 : i32
    return %arg0, %arg3, %arg2 : i32, i32, i32
  }
  func.func @transform_2(%arg0: i32, %arg1: i32, %arg2: i32, %arg3: i32) -> (i32, i32) {
    %c0_i32 = arith.constant 0 : i32
    %c0_i32_0 = arith.constant 0 : i32
    return %c0_i32, %arg2 : i32, i32
  }
  func.func @transform_3(%arg0: i32, %arg1: i32, %arg2: i32, %arg3: i32) -> (i32, i32, i32) {
    %c0_i32 = arith.constant 0 : i32
    return %arg0, %arg1, %arg2 : i32, i32, i32
  }
  func.func @transform_4(%arg0: i32, %arg1: i32, %arg2: i32, %arg3: i32) -> (i32, i32, i32) {
    %c0_i32 = arith.constant 0 : i32
    return %arg0, %arg1, %arg2 : i32, i32, i32
  }
  func.func @transform_5(%arg0: i32, %arg1: i32, %arg2: i32, %arg3: i32) -> (i32, i32, i32) {
    %c0_i32 = arith.constant 0 : i32
    return %arg0, %arg1, %arg2 : i32, i32, i32
  }
}

module attributes {stable_mosaic.version = 11 : i64} {
  func.func @_affine_act_kernel(%arg0: i32, %arg1: memref<64x128xbf16, #tpu.memory_space<vmem>>, %arg2: memref<1x128xf32, #tpu.memory_space<vmem>>, %arg3: memref<1x128xf32, #tpu.memory_space<vmem>>, %arg4: memref<64x128xbf16, #tpu.memory_space<vmem>>) attributes {dimension_semantics = [#tpu.dimension_semantics<parallel>], iteration_bounds = array<i64: 1>, scalar_prefetch = 0 : i64, scratch_operands = 0 : i64, tpu.core_type = #tpu.core_type<tc>, window_params = [{transform_indices = @transform_0, window_bounds = array<i64: 64, 128>}, {pipeline_mode = #tpu.pipeline_mode<synchronous>, transform_indices = @transform_1, window_bounds = array<i64: 1, 128>}, {pipeline_mode = #tpu.pipeline_mode<synchronous>, transform_indices = @transform_2, window_bounds = array<i64: 1, 128>}, {transform_indices = @transform_3, window_bounds = array<i64: 64, 128>}]} {
    %c0 = arith.constant 0 : index
    %c0_0 = arith.constant 0 : index
    %0 = vector.load %arg1[%c0, %c0_0] : memref<64x128xbf16, #tpu.memory_space<vmem>>, vector<64x128xbf16>
    %1 = arith.extf %0 : vector<64x128xbf16> to vector<64x128xf32>
    %c0_1 = arith.constant 0 : index
    %c0_2 = arith.constant 0 : index
    %2 = vector.load %arg2[%c0_1, %c0_2] : memref<1x128xf32, #tpu.memory_space<vmem>>, vector<1x128xf32>
    %3 = vector.broadcast %2 : vector<1x128xf32> to vector<64x128xf32>
    %4 = arith.mulf %1, %3 : vector<64x128xf32>
    %c0_3 = arith.constant 0 : index
    %c0_4 = arith.constant 0 : index
    %5 = vector.load %arg3[%c0_3, %c0_4] : memref<1x128xf32, #tpu.memory_space<vmem>>, vector<1x128xf32>
    %6 = vector.broadcast %5 : vector<1x128xf32> to vector<64x128xf32>
    %7 = arith.addf %4, %6 : vector<64x128xf32>
    %cst = arith.constant 0.000000e+00 : f32
    %8 = vector.broadcast %cst : f32 to vector<64x128xf32>
    %9 = arith.maximumf %7, %8 : vector<64x128xf32>
    %10 = arith.truncf %9 : vector<64x128xf32> to vector<64x128xbf16>
    %c0_5 = arith.constant 0 : index
    %c0_6 = arith.constant 0 : index
    %11 = vector.load %arg4[%c0_5, %c0_6] : memref<64x128xbf16, #tpu.memory_space<vmem>>, vector<64x128xbf16>
    tpu.vector_store %arg4[%c0_5, %c0_6], %10 {strides = array<i32>} : memref<64x128xbf16, #tpu.memory_space<vmem>>, vector<64x128xbf16>,
    return
  }
  func.func @transform_0(%arg0: i32) -> (i32, i32) {
    %c0_i32 = arith.constant 0 : i32
    %c0_i32_0 = arith.constant 0 : i32
    return %arg0, %c0_i32 : i32, i32
  }
  func.func @transform_1(%arg0: i32) -> (i32, i32) {
    %c0_i32 = arith.constant 0 : i32
    %c0_i32_0 = arith.constant 0 : i32
    %c0_i32_1 = arith.constant 0 : i32
    return %c0_i32, %c0_i32_0 : i32, i32
  }
  func.func @transform_2(%arg0: i32) -> (i32, i32) {
    %c0_i32 = arith.constant 0 : i32
    %c0_i32_0 = arith.constant 0 : i32
    %c0_i32_1 = arith.constant 0 : i32
    return %c0_i32, %c0_i32_0 : i32, i32
  }
  func.func @transform_3(%arg0: i32) -> (i32, i32) {
    %c0_i32 = arith.constant 0 : i32
    %c0_i32_0 = arith.constant 0 : i32
    return %arg0, %c0_i32 : i32, i32
  }
}

module attributes {stable_mosaic.version = 11 : i64} {
  func.func @_conv_mm_kernel(%arg0: i32, %arg1: i32, %arg2: i32, %arg3: i32, %arg4: memref<1x16x512xbf16, #tpu.memory_space<vmem>>, %arg5: memref<1x512x128xbf16, #tpu.memory_space<vmem>>, %arg6: memref<1x128xf32, #tpu.memory_space<vmem>>, %arg7: memref<1x16x128xbf16, #tpu.memory_space<vmem>>, %arg8: memref<1x8x128xf32, #tpu.memory_space<vmem>>, %arg9: memref<1x8x128xf32, #tpu.memory_space<vmem>>, %arg10: memref<16x128xf32, #tpu.memory_space<vmem>>) attributes {dimension_semantics = [#tpu.dimension_semantics<parallel>, #tpu.dimension_semantics<parallel>, #tpu.dimension_semantics<parallel>, #tpu.dimension_semantics<arbitrary>], iteration_bounds = array<i64: 4, 1, 1, 1>, scalar_prefetch = 0 : i64, scratch_operands = 1 : i64, tpu.core_type = #tpu.core_type<tc>, window_params = [{transform_indices = @transform_0, window_bounds = array<i64: 1, 16, 512>}, {transform_indices = @transform_1, window_bounds = array<i64: 1, 512, 128>}, {transform_indices = @transform_2, window_bounds = array<i64: 1, 128>}, {transform_indices = @transform_3, window_bounds = array<i64: 1, 16, 128>}, {transform_indices = @transform_4, window_bounds = array<i64: 1, 8, 128>}, {transform_indices = @transform_5, window_bounds = array<i64: 1, 8, 128>}]} {
    %c0_i32 = arith.constant 0 : i32
    %0 = arith.cmpi eq, %arg3, %c0_i32 : i32
    %1 = arith.extui %0 : i1 to i32
    %c0_i32_0 = arith.constant 0 : i32
    %2 = arith.cmpi ne, %1, %c0_i32_0 : i32
    scf.if %2 {
      %cst_12 = arith.constant 0.000000e+00 : f32
      %14 = vector.broadcast %cst_12 : f32 to vector<16x128xf32>
      %c0_13 = arith.constant 0 : index
      %c0_14 = arith.constant 0 : index
      %15 = vector.load %arg10[%c0_13, %c0_14] : memref<16x128xf32, #tpu.memory_space<vmem>>, vector<16x128xf32>
      tpu.vector_store %arg10[%c0_13, %c0_14], %14 {strides = array<i32>} : memref<16x128xf32, #tpu.memory_space<vmem>>, vector<16x128xf32>,
    } else {
    }
    %c0 = arith.constant 0 : index
    %c0_1 = arith.constant 0 : index
    %3 = vector.load %arg10[%c0, %c0_1] : memref<16x128xf32, #tpu.memory_space<vmem>>, vector<16x128xf32>
    %c0_2 = arith.constant 0 : index
    %c0_3 = arith.constant 0 : index
    %c0_4 = arith.constant 0 : index
    %4 = vector.load %arg4[%c0_2, %c0_3, %c0_4] : memref<1x16x512xbf16, #tpu.memory_space<vmem>>, vector<1x16x512xbf16>
    %5 = vector.shape_cast %4 : vector<1x16x512xbf16> to vector<16x512xbf16>
    %c0_5 = arith.constant 0 : index
    %c0_6 = arith.constant 0 : index
    %c0_7 = arith.constant 0 : index
    %6 = vector.load %arg5[%c0_5, %c0_6, %c0_7] : memref<1x512x128xbf16, #tpu.memory_space<vmem>>, vector<1x512x128xbf16>
    %7 = vector.shape_cast %6 : vector<1x512x128xbf16> to vector<512x128xbf16>
    %cst = arith.constant dense<0.000000e+00> : vector<16x128xf32>
    %8 = tpu.matmul %5, %7, %cst {dimension_numbers = #tpu.dot_dimension_numbers<[1], [0], [0], [1], [0, 0, 1, 1], [], []>} : vector<16x512xbf16>, vector<512x128xbf16>, vector<16x128xf32> -> vector<16x128xf32>
    %9 = arith.addf %3, %8 : vector<16x128xf32>
    %c0_8 = arith.constant 0 : index
    %c0_9 = arith.constant 0 : index
    %10 = vector.load %arg10[%c0_8, %c0_9] : memref<16x128xf32, #tpu.memory_space<vmem>>, vector<16x128xf32>
    tpu.vector_store %arg10[%c0_8, %c0_9], %9 {strides = array<i32>} : memref<16x128xf32, #tpu.memory_space<vmem>>, vector<16x128xf32>,
    %c0_i32_10 = arith.constant 0 : i32
    %11 = arith.cmpi eq, %arg3, %c0_i32_10 : i32
    %12 = arith.extui %11 : i1 to i32
    %c0_i32_11 = arith.constant 0 : i32
    %13 = arith.cmpi ne, %12, %c0_i32_11 : i32
    scf.if %13 {
      %c0_12 = arith.constant 0 : index
      %c0_13 = arith.constant 0 : index
      %14 = vector.load %arg10[%c0_12, %c0_13] : memref<16x128xf32, #tpu.memory_space<vmem>>, vector<16x128xf32>
      %c0_14 = arith.constant 0 : index
      %c0_15 = arith.constant 0 : index
      %15 = vector.load %arg6[%c0_14, %c0_15] : memref<1x128xf32, #tpu.memory_space<vmem>>, vector<1x128xf32>
      %16 = vector.broadcast %15 : vector<1x128xf32> to vector<16x128xf32>
      %17 = arith.addf %14, %16 : vector<16x128xf32>
      %18 = arith.truncf %17 : vector<16x128xf32> to vector<16x128xbf16>
      %c0_16 = arith.constant 0 : index
      %c0_17 = arith.constant 0 : index
      %c0_18 = arith.constant 0 : index
      %19 = vector.load %arg7[%c0_16, %c0_17, %c0_18] : memref<1x16x128xbf16, #tpu.memory_space<vmem>>, vector<1x16x128xbf16>
      %20 = vector.shape_cast %19 : vector<1x16x128xbf16> to vector<16x128xbf16>
      %21 = vector.shape_cast %18 : vector<16x128xbf16> to vector<1x16x128xbf16>
      tpu.vector_store %arg7[%c0_16, %c0_17, %c0_18], %21 {strides = array<i32>} : memref<1x16x128xbf16, #tpu.memory_space<vmem>>, vector<1x16x128xbf16>,
      %cst_19 = arith.constant dense<0.000000e+00> : vector<128xf32>
      %22 = vector.multi_reduction <add>, %17, %cst_19 [0] : vector<16x128xf32> to vector<128xf32>
      %23 = vector.shape_cast %22 : vector<128xf32> to vector<1x128xf32>
      %24 = arith.mulf %17, %17 : vector<16x128xf32>
      %cst_20 = arith.constant dense<0.000000e+00> : vector<128xf32>
      %25 = vector.multi_reduction <add>, %24, %cst_20 [0] : vector<16x128xf32> to vector<128xf32>
      %26 = vector.shape_cast %25 : vector<128xf32> to vector<1x128xf32>
      %27 = vector.shape_cast %23 : vector<1x128xf32> to vector<1x128xf32>
      %28 = vector.broadcast %27 : vector<1x128xf32> to vector<8x128xf32>
      %c0_21 = arith.constant 0 : index
      %c0_22 = arith.constant 0 : index
      %c0_23 = arith.constant 0 : index
      %29 = vector.load %arg8[%c0_21, %c0_22, %c0_23] : memref<1x8x128xf32, #tpu.memory_space<vmem>>, vector<1x8x128xf32>
      %30 = vector.shape_cast %29 : vector<1x8x128xf32> to vector<8x128xf32>
      %31 = vector.shape_cast %28 : vector<8x128xf32> to vector<1x8x128xf32>
      tpu.vector_store %arg8[%c0_21, %c0_22, %c0_23], %31 {strides = array<i32>} : memref<1x8x128xf32, #tpu.memory_space<vmem>>, vector<1x8x128xf32>,
      %32 = vector.shape_cast %26 : vector<1x128xf32> to vector<1x128xf32>
      %33 = vector.broadcast %32 : vector<1x128xf32> to vector<8x128xf32>
      %c0_24 = arith.constant 0 : index
      %c0_25 = arith.constant 0 : index
      %c0_26 = arith.constant 0 : index
      %34 = vector.load %arg9[%c0_24, %c0_25, %c0_26] : memref<1x8x128xf32, #tpu.memory_space<vmem>>, vector<1x8x128xf32>
      %35 = vector.shape_cast %34 : vector<1x8x128xf32> to vector<8x128xf32>
      %36 = vector.shape_cast %33 : vector<8x128xf32> to vector<1x8x128xf32>
      tpu.vector_store %arg9[%c0_24, %c0_25, %c0_26], %36 {strides = array<i32>} : memref<1x8x128xf32, #tpu.memory_space<vmem>>, vector<1x8x128xf32>,
    } else {
    }
    return
  }
  func.func @transform_0(%arg0: i32, %arg1: i32, %arg2: i32, %arg3: i32) -> (i32, i32, i32) {
    %c0_i32 = arith.constant 0 : i32
    return %arg0, %arg1, %arg3 : i32, i32, i32
  }
  func.func @transform_1(%arg0: i32, %arg1: i32, %arg2: i32, %arg3: i32) -> (i32, i32, i32) {
    %c0_i32 = arith.constant 0 : i32
    return %arg0, %arg3, %arg2 : i32, i32, i32
  }
  func.func @transform_2(%arg0: i32, %arg1: i32, %arg2: i32, %arg3: i32) -> (i32, i32) {
    %c0_i32 = arith.constant 0 : i32
    %c0_i32_0 = arith.constant 0 : i32
    return %c0_i32, %arg2 : i32, i32
  }
  func.func @transform_3(%arg0: i32, %arg1: i32, %arg2: i32, %arg3: i32) -> (i32, i32, i32) {
    %c0_i32 = arith.constant 0 : i32
    return %arg0, %arg1, %arg2 : i32, i32, i32
  }
  func.func @transform_4(%arg0: i32, %arg1: i32, %arg2: i32, %arg3: i32) -> (i32, i32, i32) {
    %c0_i32 = arith.constant 0 : i32
    return %arg0, %arg1, %arg2 : i32, i32, i32
  }
  func.func @transform_5(%arg0: i32, %arg1: i32, %arg2: i32, %arg3: i32) -> (i32, i32, i32) {
    %c0_i32 = arith.constant 0 : i32
    return %arg0, %arg1, %arg2 : i32, i32, i32
  }
}

module attributes {stable_mosaic.version = 11 : i64} {
  func.func @_conv_mm_kernel(%arg0: i32, %arg1: i32, %arg2: i32, %arg3: i32, %arg4: memref<1x32x256xbf16, #tpu.memory_space<vmem>>, %arg5: memref<1x256x128xbf16, #tpu.memory_space<vmem>>, %arg6: memref<1x128xf32, #tpu.memory_space<vmem>>, %arg7: memref<1x32x128xbf16, #tpu.memory_space<vmem>>, %arg8: memref<1x8x128xf32, #tpu.memory_space<vmem>>, %arg9: memref<1x8x128xf32, #tpu.memory_space<vmem>>, %arg10: memref<32x128xf32, #tpu.memory_space<vmem>>) attributes {dimension_semantics = [#tpu.dimension_semantics<parallel>, #tpu.dimension_semantics<parallel>, #tpu.dimension_semantics<parallel>, #tpu.dimension_semantics<arbitrary>], iteration_bounds = array<i64: 4, 1, 1, 1>, scalar_prefetch = 0 : i64, scratch_operands = 1 : i64, tpu.core_type = #tpu.core_type<tc>, window_params = [{transform_indices = @transform_0, window_bounds = array<i64: 1, 32, 256>}, {transform_indices = @transform_1, window_bounds = array<i64: 1, 256, 128>}, {transform_indices = @transform_2, window_bounds = array<i64: 1, 128>}, {transform_indices = @transform_3, window_bounds = array<i64: 1, 32, 128>}, {transform_indices = @transform_4, window_bounds = array<i64: 1, 8, 128>}, {transform_indices = @transform_5, window_bounds = array<i64: 1, 8, 128>}]} {
    %c0_i32 = arith.constant 0 : i32
    %0 = arith.cmpi eq, %arg3, %c0_i32 : i32
    %1 = arith.extui %0 : i1 to i32
    %c0_i32_0 = arith.constant 0 : i32
    %2 = arith.cmpi ne, %1, %c0_i32_0 : i32
    scf.if %2 {
      %cst_12 = arith.constant 0.000000e+00 : f32
      %14 = vector.broadcast %cst_12 : f32 to vector<32x128xf32>
      %c0_13 = arith.constant 0 : index
      %c0_14 = arith.constant 0 : index
      %15 = vector.load %arg10[%c0_13, %c0_14] : memref<32x128xf32, #tpu.memory_space<vmem>>, vector<32x128xf32>
      tpu.vector_store %arg10[%c0_13, %c0_14], %14 {strides = array<i32>} : memref<32x128xf32, #tpu.memory_space<vmem>>, vector<32x128xf32>,
    } else {
    }
    %c0 = arith.constant 0 : index
    %c0_1 = arith.constant 0 : index
    %3 = vector.load %arg10[%c0, %c0_1] : memref<32x128xf32, #tpu.memory_space<vmem>>, vector<32x128xf32>
    %c0_2 = arith.constant 0 : index
    %c0_3 = arith.constant 0 : index
    %c0_4 = arith.constant 0 : index
    %4 = vector.load %arg4[%c0_2, %c0_3, %c0_4] : memref<1x32x256xbf16, #tpu.memory_space<vmem>>, vector<1x32x256xbf16>
    %5 = vector.shape_cast %4 : vector<1x32x256xbf16> to vector<32x256xbf16>
    %c0_5 = arith.constant 0 : index
    %c0_6 = arith.constant 0 : index
    %c0_7 = arith.constant 0 : index
    %6 = vector.load %arg5[%c0_5, %c0_6, %c0_7] : memref<1x256x128xbf16, #tpu.memory_space<vmem>>, vector<1x256x128xbf16>
    %7 = vector.shape_cast %6 : vector<1x256x128xbf16> to vector<256x128xbf16>
    %cst = arith.constant dense<0.000000e+00> : vector<32x128xf32>
    %8 = tpu.matmul %5, %7, %cst {dimension_numbers = #tpu.dot_dimension_numbers<[1], [0], [0], [1], [0, 0, 1, 1], [], []>} : vector<32x256xbf16>, vector<256x128xbf16>, vector<32x128xf32> -> vector<32x128xf32>
    %9 = arith.addf %3, %8 : vector<32x128xf32>
    %c0_8 = arith.constant 0 : index
    %c0_9 = arith.constant 0 : index
    %10 = vector.load %arg10[%c0_8, %c0_9] : memref<32x128xf32, #tpu.memory_space<vmem>>, vector<32x128xf32>
    tpu.vector_store %arg10[%c0_8, %c0_9], %9 {strides = array<i32>} : memref<32x128xf32, #tpu.memory_space<vmem>>, vector<32x128xf32>,
    %c0_i32_10 = arith.constant 0 : i32
    %11 = arith.cmpi eq, %arg3, %c0_i32_10 : i32
    %12 = arith.extui %11 : i1 to i32
    %c0_i32_11 = arith.constant 0 : i32
    %13 = arith.cmpi ne, %12, %c0_i32_11 : i32
    scf.if %13 {
      %c0_12 = arith.constant 0 : index
      %c0_13 = arith.constant 0 : index
      %14 = vector.load %arg10[%c0_12, %c0_13] : memref<32x128xf32, #tpu.memory_space<vmem>>, vector<32x128xf32>
      %c0_14 = arith.constant 0 : index
      %c0_15 = arith.constant 0 : index
      %15 = vector.load %arg6[%c0_14, %c0_15] : memref<1x128xf32, #tpu.memory_space<vmem>>, vector<1x128xf32>
      %16 = vector.broadcast %15 : vector<1x128xf32> to vector<32x128xf32>
      %17 = arith.addf %14, %16 : vector<32x128xf32>
      %18 = arith.truncf %17 : vector<32x128xf32> to vector<32x128xbf16>
      %c0_16 = arith.constant 0 : index
      %c0_17 = arith.constant 0 : index
      %c0_18 = arith.constant 0 : index
      %19 = vector.load %arg7[%c0_16, %c0_17, %c0_18] : memref<1x32x128xbf16, #tpu.memory_space<vmem>>, vector<1x32x128xbf16>
      %20 = vector.shape_cast %19 : vector<1x32x128xbf16> to vector<32x128xbf16>
      %21 = vector.shape_cast %18 : vector<32x128xbf16> to vector<1x32x128xbf16>
      tpu.vector_store %arg7[%c0_16, %c0_17, %c0_18], %21 {strides = array<i32>} : memref<1x32x128xbf16, #tpu.memory_space<vmem>>, vector<1x32x128xbf16>,
      %cst_19 = arith.constant dense<0.000000e+00> : vector<128xf32>
      %22 = vector.multi_reduction <add>, %17, %cst_19 [0] : vector<32x128xf32> to vector<128xf32>
      %23 = vector.shape_cast %22 : vector<128xf32> to vector<1x128xf32>
      %24 = arith.mulf %17, %17 : vector<32x128xf32>
      %cst_20 = arith.constant dense<0.000000e+00> : vector<128xf32>
      %25 = vector.multi_reduction <add>, %24, %cst_20 [0] : vector<32x128xf32> to vector<128xf32>
      %26 = vector.shape_cast %25 : vector<128xf32> to vector<1x128xf32>
      %27 = vector.shape_cast %23 : vector<1x128xf32> to vector<1x128xf32>
      %28 = vector.broadcast %27 : vector<1x128xf32> to vector<8x128xf32>
      %c0_21 = arith.constant 0 : index
      %c0_22 = arith.constant 0 : index
      %c0_23 = arith.constant 0 : index
      %29 = vector.load %arg8[%c0_21, %c0_22, %c0_23] : memref<1x8x128xf32, #tpu.memory_space<vmem>>, vector<1x8x128xf32>
      %30 = vector.shape_cast %29 : vector<1x8x128xf32> to vector<8x128xf32>
      %31 = vector.shape_cast %28 : vector<8x128xf32> to vector<1x8x128xf32>
      tpu.vector_store %arg8[%c0_21, %c0_22, %c0_23], %31 {strides = array<i32>} : memref<1x8x128xf32, #tpu.memory_space<vmem>>, vector<1x8x128xf32>,
      %32 = vector.shape_cast %26 : vector<1x128xf32> to vector<1x128xf32>
      %33 = vector.broadcast %32 : vector<1x128xf32> to vector<8x128xf32>
      %c0_24 = arith.constant 0 : index
      %c0_25 = arith.constant 0 : index
      %c0_26 = arith.constant 0 : index
      %34 = vector.load %arg9[%c0_24, %c0_25, %c0_26] : memref<1x8x128xf32, #tpu.memory_space<vmem>>, vector<1x8x128xf32>
      %35 = vector.shape_cast %34 : vector<1x8x128xf32> to vector<8x128xf32>
      %36 = vector.shape_cast %33 : vector<8x128xf32> to vector<1x8x128xf32>
      tpu.vector_store %arg9[%c0_24, %c0_25, %c0_26], %36 {strides = array<i32>} : memref<1x8x128xf32, #tpu.memory_space<vmem>>, vector<1x8x128xf32>,
    } else {
    }
    return
  }
  func.func @transform_0(%arg0: i32, %arg1: i32, %arg2: i32, %arg3: i32) -> (i32, i32, i32) {
    %c0_i32 = arith.constant 0 : i32
    return %arg0, %arg1, %arg3 : i32, i32, i32
  }
  func.func @transform_1(%arg0: i32, %arg1: i32, %arg2: i32, %arg3: i32) -> (i32, i32, i32) {
    %c0_i32 = arith.constant 0 : i32
    return %arg0, %arg3, %arg2 : i32, i32, i32
  }
  func.func @transform_2(%arg0: i32, %arg1: i32, %arg2: i32, %arg3: i32) -> (i32, i32) {
    %c0_i32 = arith.constant 0 : i32
    %c0_i32_0 = arith.constant 0 : i32
    return %c0_i32, %arg2 : i32, i32
  }
  func.func @transform_3(%arg0: i32, %arg1: i32, %arg2: i32, %arg3: i32) -> (i32, i32, i32) {
    %c0_i32 = arith.constant 0 : i32
    return %arg0, %arg1, %arg2 : i32, i32, i32
  }
  func.func @transform_4(%arg0: i32, %arg1: i32, %arg2: i32, %arg3: i32) -> (i32, i32, i32) {
    %c0_i32 = arith.constant 0 : i32
    return %arg0, %arg1, %arg2 : i32, i32, i32
  }
  func.func @transform_5(%arg0: i32, %arg1: i32, %arg2: i32, %arg3: i32) -> (i32, i32, i32) {
    %c0_i32 = arith.constant 0 : i32
    return %arg0, %arg1, %arg2 : i32, i32, i32
  }
}

module attributes {stable_mosaic.version = 11 : i64} {
  func.func @_affine_act_kernel(%arg0: i32, %arg1: memref<128x128xbf16, #tpu.memory_space<vmem>>, %arg2: memref<1x128xf32, #tpu.memory_space<vmem>>, %arg3: memref<1x128xf32, #tpu.memory_space<vmem>>, %arg4: memref<128x128xbf16, #tpu.memory_space<vmem>>) attributes {dimension_semantics = [#tpu.dimension_semantics<parallel>], iteration_bounds = array<i64: 1>, scalar_prefetch = 0 : i64, scratch_operands = 0 : i64, tpu.core_type = #tpu.core_type<tc>, window_params = [{transform_indices = @transform_0, window_bounds = array<i64: 128, 128>}, {pipeline_mode = #tpu.pipeline_mode<synchronous>, transform_indices = @transform_1, window_bounds = array<i64: 1, 128>}, {pipeline_mode = #tpu.pipeline_mode<synchronous>, transform_indices = @transform_2, window_bounds = array<i64: 1, 128>}, {transform_indices = @transform_3, window_bounds = array<i64: 128, 128>}]} {
    %c0 = arith.constant 0 : index
    %c0_0 = arith.constant 0 : index
    %0 = vector.load %arg1[%c0, %c0_0] : memref<128x128xbf16, #tpu.memory_space<vmem>>, vector<128x128xbf16>
    %1 = arith.extf %0 : vector<128x128xbf16> to vector<128x128xf32>
    %c0_1 = arith.constant 0 : index
    %c0_2 = arith.constant 0 : index
    %2 = vector.load %arg2[%c0_1, %c0_2] : memref<1x128xf32, #tpu.memory_space<vmem>>, vector<1x128xf32>
    %3 = vector.broadcast %2 : vector<1x128xf32> to vector<128x128xf32>
    %4 = arith.mulf %1, %3 : vector<128x128xf32>
    %c0_3 = arith.constant 0 : index
    %c0_4 = arith.constant 0 : index
    %5 = vector.load %arg3[%c0_3, %c0_4] : memref<1x128xf32, #tpu.memory_space<vmem>>, vector<1x128xf32>
    %6 = vector.broadcast %5 : vector<1x128xf32> to vector<128x128xf32>
    %7 = arith.addf %4, %6 : vector<128x128xf32>
    %cst = arith.constant 0.000000e+00 : f32
    %8 = vector.broadcast %cst : f32 to vector<128x128xf32>
    %9 = arith.maximumf %7, %8 : vector<128x128xf32>
    %10 = arith.truncf %9 : vector<128x128xf32> to vector<128x128xbf16>
    %c0_5 = arith.constant 0 : index
    %c0_6 = arith.constant 0 : index
    %11 = vector.load %arg4[%c0_5, %c0_6] : memref<128x128xbf16, #tpu.memory_space<vmem>>, vector<128x128xbf16>
    tpu.vector_store %arg4[%c0_5, %c0_6], %10 {strides = array<i32>} : memref<128x128xbf16, #tpu.memory_space<vmem>>, vector<128x128xbf16>,
    return
  }
  func.func @transform_0(%arg0: i32) -> (i32, i32) {
    %c0_i32 = arith.constant 0 : i32
    %c0_i32_0 = arith.constant 0 : i32
    return %arg0, %c0_i32 : i32, i32
  }
  func.func @transform_1(%arg0: i32) -> (i32, i32) {
    %c0_i32 = arith.constant 0 : i32
    %c0_i32_0 = arith.constant 0 : i32
    %c0_i32_1 = arith.constant 0 : i32
    return %c0_i32, %c0_i32_0 : i32, i32
  }
  func.func @transform_2(%arg0: i32) -> (i32, i32) {
    %c0_i32 = arith.constant 0 : i32
    %c0_i32_0 = arith.constant 0 : i32
    %c0_i32_1 = arith.constant 0 : i32
    return %c0_i32, %c0_i32_0 : i32, i32
  }
  func.func @transform_3(%arg0: i32) -> (i32, i32) {
    %c0_i32 = arith.constant 0 : i32
    %c0_i32_0 = arith.constant 0 : i32
    return %arg0, %c0_i32 : i32, i32
  }
}

module attributes {stable_mosaic.version = 11 : i64} {
  func.func @_conv_mm_kernel(%arg0: i32, %arg1: i32, %arg2: i32, %arg3: i32, %arg4: memref<1x128x128xbf16, #tpu.memory_space<vmem>>, %arg5: memref<1x128x128xbf16, #tpu.memory_space<vmem>>, %arg6: memref<1x128xf32, #tpu.memory_space<vmem>>, %arg7: memref<1x128x128xbf16, #tpu.memory_space<vmem>>, %arg8: memref<1x8x128xf32, #tpu.memory_space<vmem>>, %arg9: memref<1x8x128xf32, #tpu.memory_space<vmem>>, %arg10: memref<128x128xf32, #tpu.memory_space<vmem>>) attributes {dimension_semantics = [#tpu.dimension_semantics<parallel>, #tpu.dimension_semantics<parallel>, #tpu.dimension_semantics<parallel>, #tpu.dimension_semantics<arbitrary>], iteration_bounds = array<i64: 4, 1, 1, 1>, scalar_prefetch = 0 : i64, scratch_operands = 1 : i64, tpu.core_type = #tpu.core_type<tc>, window_params = [{transform_indices = @transform_0, window_bounds = array<i64: 1, 128, 128>}, {transform_indices = @transform_1, window_bounds = array<i64: 1, 128, 128>}, {transform_indices = @transform_2, window_bounds = array<i64: 1, 128>}, {transform_indices = @transform_3, window_bounds = array<i64: 1, 128, 128>}, {transform_indices = @transform_4, window_bounds = array<i64: 1, 8, 128>}, {transform_indices = @transform_5, window_bounds = array<i64: 1, 8, 128>}]} {
    %c0_i32 = arith.constant 0 : i32
    %0 = arith.cmpi eq, %arg3, %c0_i32 : i32
    %1 = arith.extui %0 : i1 to i32
    %c0_i32_0 = arith.constant 0 : i32
    %2 = arith.cmpi ne, %1, %c0_i32_0 : i32
    scf.if %2 {
      %cst_12 = arith.constant 0.000000e+00 : f32
      %14 = vector.broadcast %cst_12 : f32 to vector<128x128xf32>
      %c0_13 = arith.constant 0 : index
      %c0_14 = arith.constant 0 : index
      %15 = vector.load %arg10[%c0_13, %c0_14] : memref<128x128xf32, #tpu.memory_space<vmem>>, vector<128x128xf32>
      tpu.vector_store %arg10[%c0_13, %c0_14], %14 {strides = array<i32>} : memref<128x128xf32, #tpu.memory_space<vmem>>, vector<128x128xf32>,
    } else {
    }
    %c0 = arith.constant 0 : index
    %c0_1 = arith.constant 0 : index
    %3 = vector.load %arg10[%c0, %c0_1] : memref<128x128xf32, #tpu.memory_space<vmem>>, vector<128x128xf32>
    %c0_2 = arith.constant 0 : index
    %c0_3 = arith.constant 0 : index
    %c0_4 = arith.constant 0 : index
    %4 = vector.load %arg4[%c0_2, %c0_3, %c0_4] : memref<1x128x128xbf16, #tpu.memory_space<vmem>>, vector<1x128x128xbf16>
    %5 = vector.shape_cast %4 : vector<1x128x128xbf16> to vector<128x128xbf16>
    %c0_5 = arith.constant 0 : index
    %c0_6 = arith.constant 0 : index
    %c0_7 = arith.constant 0 : index
    %6 = vector.load %arg5[%c0_5, %c0_6, %c0_7] : memref<1x128x128xbf16, #tpu.memory_space<vmem>>, vector<1x128x128xbf16>
    %7 = vector.shape_cast %6 : vector<1x128x128xbf16> to vector<128x128xbf16>
    %cst = arith.constant dense<0.000000e+00> : vector<128x128xf32>
    %8 = tpu.matmul %5, %7, %cst {dimension_numbers = #tpu.dot_dimension_numbers<[1], [0], [0], [1], [0, 0, 1, 1], [], []>} : vector<128x128xbf16>, vector<128x128xbf16>, vector<128x128xf32> -> vector<128x128xf32>
    %9 = arith.addf %3, %8 : vector<128x128xf32>
    %c0_8 = arith.constant 0 : index
    %c0_9 = arith.constant 0 : index
    %10 = vector.load %arg10[%c0_8, %c0_9] : memref<128x128xf32, #tpu.memory_space<vmem>>, vector<128x128xf32>
    tpu.vector_store %arg10[%c0_8, %c0_9], %9 {strides = array<i32>} : memref<128x128xf32, #tpu.memory_space<vmem>>, vector<128x128xf32>,
    %c0_i32_10 = arith.constant 0 : i32
    %11 = arith.cmpi eq, %arg3, %c0_i32_10 : i32
    %12 = arith.extui %11 : i1 to i32
    %c0_i32_11 = arith.constant 0 : i32
    %13 = arith.cmpi ne, %12, %c0_i32_11 : i32
    scf.if %13 {
      %c0_12 = arith.constant 0 : index
      %c0_13 = arith.constant 0 : index
      %14 = vector.load %arg10[%c0_12, %c0_13] : memref<128x128xf32, #tpu.memory_space<vmem>>, vector<128x128xf32>
      %c0_14 = arith.constant 0 : index
      %c0_15 = arith.constant 0 : index
      %15 = vector.load %arg6[%c0_14, %c0_15] : memref<1x128xf32, #tpu.memory_space<vmem>>, vector<1x128xf32>
      %16 = vector.broadcast %15 : vector<1x128xf32> to vector<128x128xf32>
      %17 = arith.addf %14, %16 : vector<128x128xf32>
      %18 = arith.truncf %17 : vector<128x128xf32> to vector<128x128xbf16>
      %c0_16 = arith.constant 0 : index
      %c0_17 = arith.constant 0 : index
      %c0_18 = arith.constant 0 : index
      %19 = vector.load %arg7[%c0_16, %c0_17, %c0_18] : memref<1x128x128xbf16, #tpu.memory_space<vmem>>, vector<1x128x128xbf16>
      %20 = vector.shape_cast %19 : vector<1x128x128xbf16> to vector<128x128xbf16>
      %21 = vector.shape_cast %18 : vector<128x128xbf16> to vector<1x128x128xbf16>
      tpu.vector_store %arg7[%c0_16, %c0_17, %c0_18], %21 {strides = array<i32>} : memref<1x128x128xbf16, #tpu.memory_space<vmem>>, vector<1x128x128xbf16>,
      %cst_19 = arith.constant dense<0.000000e+00> : vector<128xf32>
      %22 = vector.multi_reduction <add>, %17, %cst_19 [0] : vector<128x128xf32> to vector<128xf32>
      %23 = vector.shape_cast %22 : vector<128xf32> to vector<1x128xf32>
      %24 = arith.mulf %17, %17 : vector<128x128xf32>
      %cst_20 = arith.constant dense<0.000000e+00> : vector<128xf32>
      %25 = vector.multi_reduction <add>, %24, %cst_20 [0] : vector<128x128xf32> to vector<128xf32>
      %26 = vector.shape_cast %25 : vector<128xf32> to vector<1x128xf32>
      %27 = vector.shape_cast %23 : vector<1x128xf32> to vector<1x128xf32>
      %28 = vector.broadcast %27 : vector<1x128xf32> to vector<8x128xf32>
      %c0_21 = arith.constant 0 : index
      %c0_22 = arith.constant 0 : index
      %c0_23 = arith.constant 0 : index
      %29 = vector.load %arg8[%c0_21, %c0_22, %c0_23] : memref<1x8x128xf32, #tpu.memory_space<vmem>>, vector<1x8x128xf32>
      %30 = vector.shape_cast %29 : vector<1x8x128xf32> to vector<8x128xf32>
      %31 = vector.shape_cast %28 : vector<8x128xf32> to vector<1x8x128xf32>
      tpu.vector_store %arg8[%c0_21, %c0_22, %c0_23], %31 {strides = array<i32>} : memref<1x8x128xf32, #tpu.memory_space<vmem>>, vector<1x8x128xf32>,
      %32 = vector.shape_cast %26 : vector<1x128xf32> to vector<1x128xf32>
      %33 = vector.broadcast %32 : vector<1x128xf32> to vector<8x128xf32>
      %c0_24 = arith.constant 0 : index
      %c0_25 = arith.constant 0 : index
      %c0_26 = arith.constant 0 : index
      %34 = vector.load %arg9[%c0_24, %c0_25, %c0_26] : memref<1x8x128xf32, #tpu.memory_space<vmem>>, vector<1x8x128xf32>
      %35 = vector.shape_cast %34 : vector<1x8x128xf32> to vector<8x128xf32>
      %36 = vector.shape_cast %33 : vector<8x128xf32> to vector<1x8x128xf32>
      tpu.vector_store %arg9[%c0_24, %c0_25, %c0_26], %36 {strides = array<i32>} : memref<1x8x128xf32, #tpu.memory_space<vmem>>, vector<1x8x128xf32>,
    } else {
    }
    return
  }
  func.func @transform_0(%arg0: i32, %arg1: i32, %arg2: i32, %arg3: i32) -> (i32, i32, i32) {
    %c0_i32 = arith.constant 0 : i32
    return %arg0, %arg1, %arg3 : i32, i32, i32
  }
  func.func @transform_1(%arg0: i32, %arg1: i32, %arg2: i32, %arg3: i32) -> (i32, i32, i32) {
    %c0_i32 = arith.constant 0 : i32
    return %arg0, %arg3, %arg2 : i32, i32, i32
  }
  func.func @transform_2(%arg0: i32, %arg1: i32, %arg2: i32, %arg3: i32) -> (i32, i32) {
    %c0_i32 = arith.constant 0 : i32
    %c0_i32_0 = arith.constant 0 : i32
    return %c0_i32, %arg2 : i32, i32
  }
  func.func @transform_3(%arg0: i32, %arg1: i32, %arg2: i32, %arg3: i32) -> (i32, i32, i32) {
    %c0_i32 = arith.constant 0 : i32
    return %arg0, %arg1, %arg2 : i32, i32, i32
  }
  func.func @transform_4(%arg0: i32, %arg1: i32, %arg2: i32, %arg3: i32) -> (i32, i32, i32) {
    %c0_i32 = arith.constant 0 : i32
    return %arg0, %arg1, %arg2 : i32, i32, i32
  }
  func.func @transform_5(%arg0: i32, %arg1: i32, %arg2: i32, %arg3: i32) -> (i32, i32, i32) {
    %c0_i32 = arith.constant 0 : i32
    return %arg0, %arg1, %arg2 : i32, i32, i32
  }
}

module attributes {stable_mosaic.version = 11 : i64} {
  func.func @_affine_act_kernel(%arg0: i32, %arg1: memref<512x128xbf16, #tpu.memory_space<vmem>>, %arg2: memref<1x128xf32, #tpu.memory_space<vmem>>, %arg3: memref<1x128xf32, #tpu.memory_space<vmem>>, %arg4: memref<512x128xbf16, #tpu.memory_space<vmem>>) attributes {dimension_semantics = [#tpu.dimension_semantics<parallel>], iteration_bounds = array<i64: 1>, scalar_prefetch = 0 : i64, scratch_operands = 0 : i64, tpu.core_type = #tpu.core_type<tc>, window_params = [{transform_indices = @transform_0, window_bounds = array<i64: 512, 128>}, {pipeline_mode = #tpu.pipeline_mode<synchronous>, transform_indices = @transform_1, window_bounds = array<i64: 1, 128>}, {pipeline_mode = #tpu.pipeline_mode<synchronous>, transform_indices = @transform_2, window_bounds = array<i64: 1, 128>}, {transform_indices = @transform_3, window_bounds = array<i64: 512, 128>}]} {
    %c0 = arith.constant 0 : index
    %c0_0 = arith.constant 0 : index
    %0 = vector.load %arg1[%c0, %c0_0] : memref<512x128xbf16, #tpu.memory_space<vmem>>, vector<512x128xbf16>
    %1 = arith.extf %0 : vector<512x128xbf16> to vector<512x128xf32>
    %c0_1 = arith.constant 0 : index
    %c0_2 = arith.constant 0 : index
    %2 = vector.load %arg2[%c0_1, %c0_2] : memref<1x128xf32, #tpu.memory_space<vmem>>, vector<1x128xf32>
    %3 = vector.broadcast %2 : vector<1x128xf32> to vector<512x128xf32>
    %4 = arith.mulf %1, %3 : vector<512x128xf32>
    %c0_3 = arith.constant 0 : index
    %c0_4 = arith.constant 0 : index
    %5 = vector.load %arg3[%c0_3, %c0_4] : memref<1x128xf32, #tpu.memory_space<vmem>>, vector<1x128xf32>
    %6 = vector.broadcast %5 : vector<1x128xf32> to vector<512x128xf32>
    %7 = arith.addf %4, %6 : vector<512x128xf32>
    %cst = arith.constant 0.000000e+00 : f32
    %8 = vector.broadcast %cst : f32 to vector<512x128xf32>
    %9 = arith.maximumf %7, %8 : vector<512x128xf32>
    %10 = arith.truncf %9 : vector<512x128xf32> to vector<512x128xbf16>
    %c0_5 = arith.constant 0 : index
    %c0_6 = arith.constant 0 : index
    %11 = vector.load %arg4[%c0_5, %c0_6] : memref<512x128xbf16, #tpu.memory_space<vmem>>, vector<512x128xbf16>
    tpu.vector_store %arg4[%c0_5, %c0_6], %10 {strides = array<i32>} : memref<512x128xbf16, #tpu.memory_space<vmem>>, vector<512x128xbf16>,
    return
  }
  func.func @transform_0(%arg0: i32) -> (i32, i32) {
    %c0_i32 = arith.constant 0 : i32
    %c0_i32_0 = arith.constant 0 : i32
    return %arg0, %c0_i32 : i32, i32
  }
  func.func @transform_1(%arg0: i32) -> (i32, i32) {
    %c0_i32 = arith.constant 0 : i32
    %c0_i32_0 = arith.constant 0 : i32
    %c0_i32_1 = arith.constant 0 : i32
    return %c0_i32, %c0_i32_0 : i32, i32
  }
  func.func @transform_2(%arg0: i32) -> (i32, i32) {
    %c0_i32 = arith.constant 0 : i32
    %c0_i32_0 = arith.constant 0 : i32
    %c0_i32_1 = arith.constant 0 : i32
    return %c0_i32, %c0_i32_0 : i32, i32
  }
  func.func @transform_3(%arg0: i32) -> (i32, i32) {
    %c0_i32 = arith.constant 0 : i32
    %c0_i32_0 = arith.constant 0 : i32
    return %arg0, %c0_i32 : i32, i32
  }
}

module attributes {stable_mosaic.version = 11 : i64} {
  func.func @_conv_mm_kernel(%arg0: i32, %arg1: i32, %arg2: i32, %arg3: i32, %arg4: memref<1x512x128xbf16, #tpu.memory_space<vmem>>, %arg5: memref<1x128x128xbf16, #tpu.memory_space<vmem>>, %arg6: memref<1x128xf32, #tpu.memory_space<vmem>>, %arg7: memref<1x512x128xf32, #tpu.memory_space<vmem>>, %arg8: memref<512x128xf32, #tpu.memory_space<vmem>>) attributes {dimension_semantics = [#tpu.dimension_semantics<parallel>, #tpu.dimension_semantics<parallel>, #tpu.dimension_semantics<parallel>, #tpu.dimension_semantics<arbitrary>], iteration_bounds = array<i64: 4, 1, 1, 1>, scalar_prefetch = 0 : i64, scratch_operands = 1 : i64, tpu.core_type = #tpu.core_type<tc>, window_params = [{transform_indices = @transform_0, window_bounds = array<i64: 1, 512, 128>}, {transform_indices = @transform_1, window_bounds = array<i64: 1, 128, 128>}, {transform_indices = @transform_2, window_bounds = array<i64: 1, 128>}, {transform_indices = @transform_3, window_bounds = array<i64: 1, 512, 128>}]} {
    %c0_i32 = arith.constant 0 : i32
    %0 = arith.cmpi eq, %arg3, %c0_i32 : i32
    %1 = arith.extui %0 : i1 to i32
    %c0_i32_0 = arith.constant 0 : i32
    %2 = arith.cmpi ne, %1, %c0_i32_0 : i32
    scf.if %2 {
      %cst_12 = arith.constant 0.000000e+00 : f32
      %14 = vector.broadcast %cst_12 : f32 to vector<512x128xf32>
      %c0_13 = arith.constant 0 : index
      %c0_14 = arith.constant 0 : index
      %15 = vector.load %arg8[%c0_13, %c0_14] : memref<512x128xf32, #tpu.memory_space<vmem>>, vector<512x128xf32>
      tpu.vector_store %arg8[%c0_13, %c0_14], %14 {strides = array<i32>} : memref<512x128xf32, #tpu.memory_space<vmem>>, vector<512x128xf32>,
    } else {
    }
    %c0 = arith.constant 0 : index
    %c0_1 = arith.constant 0 : index
    %3 = vector.load %arg8[%c0, %c0_1] : memref<512x128xf32, #tpu.memory_space<vmem>>, vector<512x128xf32>
    %c0_2 = arith.constant 0 : index
    %c0_3 = arith.constant 0 : index
    %c0_4 = arith.constant 0 : index
    %4 = vector.load %arg4[%c0_2, %c0_3, %c0_4] : memref<1x512x128xbf16, #tpu.memory_space<vmem>>, vector<1x512x128xbf16>
    %5 = vector.shape_cast %4 : vector<1x512x128xbf16> to vector<512x128xbf16>
    %c0_5 = arith.constant 0 : index
    %c0_6 = arith.constant 0 : index
    %c0_7 = arith.constant 0 : index
    %6 = vector.load %arg5[%c0_5, %c0_6, %c0_7] : memref<1x128x128xbf16, #tpu.memory_space<vmem>>, vector<1x128x128xbf16>
    %7 = vector.shape_cast %6 : vector<1x128x128xbf16> to vector<128x128xbf16>
    %cst = arith.constant dense<0.000000e+00> : vector<512x128xf32>
    %8 = tpu.matmul %5, %7, %cst {dimension_numbers = #tpu.dot_dimension_numbers<[1], [0], [0], [1], [0, 0, 1, 1], [], []>} : vector<512x128xbf16>, vector<128x128xbf16>, vector<512x128xf32> -> vector<512x128xf32>
    %9 = arith.addf %3, %8 : vector<512x128xf32>
    %c0_8 = arith.constant 0 : index
    %c0_9 = arith.constant 0 : index
    %10 = vector.load %arg8[%c0_8, %c0_9] : memref<512x128xf32, #tpu.memory_space<vmem>>, vector<512x128xf32>
    tpu.vector_store %arg8[%c0_8, %c0_9], %9 {strides = array<i32>} : memref<512x128xf32, #tpu.memory_space<vmem>>, vector<512x128xf32>,
    %c0_i32_10 = arith.constant 0 : i32
    %11 = arith.cmpi eq, %arg3, %c0_i32_10 : i32
    %12 = arith.extui %11 : i1 to i32
    %c0_i32_11 = arith.constant 0 : i32
    %13 = arith.cmpi ne, %12, %c0_i32_11 : i32
    scf.if %13 {
      %c0_12 = arith.constant 0 : index
      %c0_13 = arith.constant 0 : index
      %14 = vector.load %arg8[%c0_12, %c0_13] : memref<512x128xf32, #tpu.memory_space<vmem>>, vector<512x128xf32>
      %c0_14 = arith.constant 0 : index
      %c0_15 = arith.constant 0 : index
      %15 = vector.load %arg6[%c0_14, %c0_15] : memref<1x128xf32, #tpu.memory_space<vmem>>, vector<1x128xf32>
      %16 = vector.broadcast %15 : vector<1x128xf32> to vector<512x128xf32>
      %17 = arith.addf %14, %16 : vector<512x128xf32>
      %18 = math.tanh %17 : vector<512x128xf32>
      %c0_16 = arith.constant 0 : index
      %c0_17 = arith.constant 0 : index
      %c0_18 = arith.constant 0 : index
      %19 = vector.load %arg7[%c0_16, %c0_17, %c0_18] : memref<1x512x128xf32, #tpu.memory_space<vmem>>, vector<1x512x128xf32>
      %20 = vector.shape_cast %19 : vector<1x512x128xf32> to vector<512x128xf32>
      %21 = vector.shape_cast %18 : vector<512x128xf32> to vector<1x512x128xf32>
      tpu.vector_store %arg7[%c0_16, %c0_17, %c0_18], %21 {strides = array<i32>} : memref<1x512x128xf32, #tpu.memory_space<vmem>>, vector<1x512x128xf32>,
    } else {
    }
    return
  }
  func.func @transform_0(%arg0: i32, %arg1: i32, %arg2: i32, %arg3: i32) -> (i32, i32, i32) {
    %c0_i32 = arith.constant 0 : i32
    return %arg0, %arg1, %arg3 : i32, i32, i32
  }
  func.func @transform_1(%arg0: i32, %arg1: i32, %arg2: i32, %arg3: i32) -> (i32, i32, i32) {
    %c0_i32 = arith.constant 0 : i32
    return %arg0, %arg3, %arg2 : i32, i32, i32
  }
  func.func @transform_2(%arg0: i32, %arg1: i32, %arg2: i32, %arg3: i32) -> (i32, i32) {
    %c0_i32 = arith.constant 0 : i32
    %c0_i32_0 = arith.constant 0 : i32
    return %c0_i32, %arg2 : i32, i32
  }
  func.func @transform_3(%arg0: i32, %arg1: i32, %arg2: i32, %arg3: i32) -> (i32, i32, i32) {
    %c0_i32 = arith.constant 0 : i32
    return %arg0, %arg1, %arg2 : i32, i32, i32
  }
}

</mosaic_0001>

<bundles_post_ra>
// kernel: _lambda_.17
= control target key start
LH: loop header
LB: loop body
LE: loop exit
PB: predicated region body
PF: predicated region fallthrough
CT: control target
= control target key end

     0   :  { %s2388_s1 = inlined_call_operand.vmem [shape: bf16[1,128,128], index: 1, kind: input, shape index: {}]   ;;  %s2389_s0 = inlined_call_operand.vmem [shape: bf16[1,512,128], index: 0, kind: input, shape index: {}]   ;;  %s2390_s2 = inlined_call_operand.vmem [shape: f32[1,128], index: 2, kind: input, shape index: {}]   ;;  %s2391_s3 = inlined_call_operand.vmem [shape: bf16[1,512,128], index: 3, kind: output, shape index: {}]  }
   0x1   :  { %v2034_v0 = vld [vmem:[%s2388_s1] sm:$0xff]   ;;  %v2035_v1 = vld [vmem:[%s2388_s1 + $0x8] sm:$0xff]   ;;  %v2036_v2 = vld [vmem:[%s2388_s1 + $0x10] sm:$0xff]  }
   0x2   :  { %1938 = vmatprep.subr.bf16.mxu0 %v2034_v0  ;;  %2018 = vmatprep.subr.bf16.mxu1 %v2034_v0  ;;  %v2037_v3 = vld [vmem:[%s2388_s1 + $0x18] sm:$0xff]   ;;  %v2042_v4 = vld [vmem:[%s2389_s0] sm:$0xff]   ;;  %v2039_v7 = vld [vmem:[%s2388_s1 + $0x28] sm:$0xff]  }
   0x3   :  { %1939 = vmatpush3.bf16.msra.mxu0 %v2034_v0  ;;  %2026 = vmatpush3.bf16.msra.mxu1 %v2034_v0  ;;  %v2043_v5 = vld [vmem:[%s2389_s0 + $0x80] sm:$0xff]   ;;  %v2040_v8 = vld [vmem:[%s2388_s1 + $0x30] sm:$0xff]   ;;  %v2041_v9 = vld [vmem:[%s2388_s1 + $0x38] sm:$0xff]  }
   0x4   :  { %1940 = vmatprep.subr.bf16.mxu0 %v2035_v1  ;;  %2019 = vmatprep.subr.bf16.mxu1 %v2035_v1  ;;  %v2038_v6 = vld [vmem:[%s2388_s1 + $0x20] sm:$0xff]   ;;  %v2044_v10 = vld [vmem:[%s2389_s0 + $0x8] sm:$0xff]   ;;  %v2046_v12 = vld [vmem:[%s2389_s0 + $0x10] sm:$0xff]  }
   0x5   :  { %1954 = vmatprep.mubr.bf16.mxu0 %v2042_v4  ;;  %1986 = vmatprep.mubr.bf16.mxu1 %v2043_v5  ;;  %v2045_v11 = vld [vmem:[%s2389_s0 + $0x88] sm:$0xff]   ;;  %v2047_v13 = vld [vmem:[%s2389_s0 + $0x90] sm:$0xff]   ;;  %v2048_v14 = vld [vmem:[%s2389_s0 + $0x18] sm:$0xff]  }
   0x6   :  { %v2049_v15 = vld [vmem:[%s2389_s0 + $0x98] sm:$0xff]   ;;  %v2050_v16 = vld [vmem:[%s2389_s0 + $0x20] sm:$0xff]   ;;  %v2052_v18 = vld [vmem:[%s2389_s0 + $0x28] sm:$0xff]  }
   0x7   :  { %1941 = vmatpush3.bf16.msra.mxu0 %v2035_v1  ;;  %2027 = vmatpush3.bf16.msra.mxu1 %v2035_v1  ;;  %v2051_v17 = vld [vmem:[%s2389_s0 + $0xa0] sm:$0xff]   ;;  %v2053_v19 = vld [vmem:[%s2389_s0 + $0xa8] sm:$0xff]   ;;  %v2054_v20 = vld [vmem:[%s2389_s0 + $0x30] sm:$0xff]  }
   0x8   :  { %1942 = vmatprep.subr.bf16.mxu0 %v2036_v2  ;;  %2020 = vmatprep.subr.bf16.mxu1 %v2036_v2  ;;  %v2055_v21 = vld [vmem:[%s2389_s0 + $0xb0] sm:$0xff]   ;;  %v2056_v22 = vld [vmem:[%s2389_s0 + $0x38] sm:$0xff]   ;;  %v2058_v24 = vld [vmem:[%s2389_s0 + $0x40] sm:$0xff]  }
   0x9   :  { %v2057_v23 = vld [vmem:[%s2389_s0 + $0xb8] sm:$0xff]   ;;  %v2059_v25 = vld [vmem:[%s2389_s0 + $0xc0] sm:$0xff]   ;;  %v2060_v26 = vld [vmem:[%s2389_s0 + $0x48] sm:$0xff]  }
   0xa   :  { %v2061_v27 = vld [vmem:[%s2389_s0 + $0xc8] sm:$0xff]   ;;  %v2062_v28 = vld [vmem:[%s2389_s0 + $0x50] sm:$0xff]   ;;  %v2064_v30 = vld [vmem:[%s2389_s0 + $0x58] sm:$0xff]  }
   0xb   :  { %1943 = vmatpush3.bf16.msra.mxu0 %v2036_v2  ;;  %2028 = vmatpush3.bf16.msra.mxu1 %v2036_v2  ;;  %v2063_v29 = vld [vmem:[%s2389_s0 + $0xd0] sm:$0xff]   ;;  %v2065_v31 = vld [vmem:[%s2389_s0 + $0xd8] sm:$0xff]   ;;  %v2066_v32 = vld [vmem:[%s2389_s0 + $0x60] sm:$0xff]  }
   0xc   :  { %1944 = vmatprep.subr.bf16.mxu0 %v2037_v3  ;;  %2021 = vmatprep.subr.bf16.mxu1 %v2037_v3  ;;  %v2067_v33 = vld [vmem:[%s2389_s0 + $0xe0] sm:$0xff]   ;;  %v2068_v34 = vld [vmem:[%s2389_s0 + $0x68] sm:$0xff]   ;;  %v2070_v36 = vld [vmem:[%s2389_s0 + $0x70] sm:$0xff]  }
   0xd   :  { %v2069_v35 = vld [vmem:[%s2389_s0 + $0xe8] sm:$0xff]   ;;  %v2071_v37 = vld [vmem:[%s2389_s0 + $0xf0] sm:$0xff]   ;;  %v2072_v38 = vld [vmem:[%s2389_s0 + $0x78] sm:$0xff]  }
   0xe   :  { %v2073_v39 = vld [vmem:[%s2389_s0 + $0xf8] sm:$0xff]   ;;  %v2217_v40 = vld [vmem:[%s2390_s2] ss:$0 sm:$0xff] }
   0xf   :  { %1945 = vmatpush3.bf16.msra.mxu0 %v2037_v3  ;;  %2029 = vmatpush3.bf16.msra.mxu1 %v2037_v3 }
  0x10   :  { %1946 = vmatprep.subr.bf16.mxu0 %v2038_v6  ;;  %2022 = vmatprep.subr.bf16.mxu1 %v2038_v6 }
  0x13   :  { %1947 = vmatpush3.bf16.msra.mxu0 %v2038_v6  ;;  %2030 = vmatpush3.bf16.msra.mxu1 %v2038_v6 }
  0x14   :  { %1948 = vmatprep.subr.bf16.mxu0 %v2039_v7  ;;  %2023 = vmatprep.subr.bf16.mxu1 %v2039_v7 }
  0x17   :  { %1949 = vmatpush3.bf16.msra.mxu0 %v2039_v7  ;;  %2031 = vmatpush3.bf16.msra.mxu1 %v2039_v7 }
  0x18   :  { %1950 = vmatprep.subr.bf16.mxu0 %v2040_v8  ;;  %2024 = vmatprep.subr.bf16.mxu1 %v2040_v8 }
  0x1b   :  { %1951 = vmatpush3.bf16.msra.mxu0 %v2040_v8  ;;  %2032 = vmatpush3.bf16.msra.mxu1 %v2040_v8 }
  0x1c   :  { %1952 = vmatprep.subr.bf16.mxu0 %v2041_v9  ;;  %2025 = vmatprep.subr.bf16.mxu1 %v2041_v9 }
  0x1f   :  { %1953 = vmatpush3.bf16.msra.mxu0 %v2041_v9  ;;  %2033 = vmatpush3.bf16.msra.mxu1 %v2041_v9 }
  0x22   :  { %1955 = vmatmul.mubr.bf16.vlgmr.msra.gmra.mrb[0].mxu0 %v2044_v10  ;;  %1987 = vmatmul.mubr.bf16.vlgmr.msra.gmra.mrb[0].mxu1 %v2045_v11 }
  0x23   :  { %1958 = vmatprep.mubr.bf16.mxu0 %v2046_v12  ;;  %1990 = vmatprep.mubr.bf16.mxu1 %v2047_v13 }
  0x2a   :  { %1959 = vmatmul.mubr.bf16.gmra.mrb[4].mxu0 %v2048_v14  ;;  %1991 = vmatmul.mubr.bf16.gmra.mrb[4].mxu1 %v2049_v15 }
  0x2b   :  { %1962 = vmatprep.mubr.bf16.mxu0 %v2050_v16  ;;  %1994 = vmatprep.mubr.bf16.mxu1 %v2051_v17 }
  0x32   :  { %1963 = vmatmul.mubr.bf16.gmra.mrb[8].mxu0 %v2052_v18  ;;  %1995 = vmatmul.mubr.bf16.gmra.mrb[8].mxu1 %v2053_v19 }
  0x33   :  { %1966 = vmatprep.mubr.bf16.mxu0 %v2054_v20  ;;  %1998 = vmatprep.mubr.bf16.mxu1 %v2055_v21 }
  0x3a   :  { %1967 = vmatmul.mubr.bf16.gmra.mrb[12].mxu0 %v2056_v22  ;;  %1999 = vmatmul.mubr.bf16.gmra.mrb[12].mxu1 %v2057_v23 }
  0x3b   :  { %1970 = vmatprep.mubr.bf16.mxu0 %v2058_v24  ;;  %2002 = vmatprep.mubr.bf16.mxu1 %v2059_v25 }
  0x42   :  { %1971 = vmatmul.mubr.bf16.gmra.mrb[16].mxu0 %v2060_v26  ;;  %2003 = vmatmul.mubr.bf16.gmra.mrb[16].mxu1 %v2061_v27 }
  0x43   :  { %1974 = vmatprep.mubr.bf16.mxu0 %v2062_v28  ;;  %2006 = vmatprep.mubr.bf16.mxu1 %v2063_v29 }
  0x4a   :  { %1975 = vmatmul.mubr.bf16.gmra.mrb[20].mxu0 %v2064_v30  ;;  %2007 = vmatmul.mubr.bf16.gmra.mrb[20].mxu1 %v2065_v31 }
  0x4b   :  { %1978 = vmatprep.mubr.bf16.mxu0 %v2066_v32  ;;  %2010 = vmatprep.mubr.bf16.mxu1 %v2067_v33 }
  0x52   :  { %1979 = vmatmul.mubr.bf16.gmra.mrb[24].mxu0 %v2068_v34  ;;  %2011 = vmatmul.mubr.bf16.gmra.mrb[24].mxu1 %v2069_v35 }
  0x53   :  { %1982 = vmatprep.mubr.bf16.mxu0 %v2070_v36  ;;  %2014 = vmatprep.mubr.bf16.mxu1 %v2071_v37 }
  0x5a   :  { %1983 = vmatmul.mubr.bf16.gmra.mrb[28].mxu0 %v2072_v38  ;;  %2015 = vmatmul.mubr.bf16.gmra.mrb[28].mxu1 %v2073_v39 }
  0xf5   :  { %v1956_v41 = vpop.f32.mrb[0].mxu0  ;;  %v1988_v42 = vpop.f32.mrb[0].mxu1 }
  0xf6   :  { %v960_v43 = vadd.f32 %v1956_v41, %v2217_v40  ;;  %v992_v44 = vadd.f32 %v1988_v42, %v2217_v40  ;;  %v501_v45 = vpop.f32.mrb[1].mxu0  ;;  %v629_v46 = vpop.f32.mrb[1].mxu1 }
  0xf7   :  { %v958_v47 = vadd.f32 %v2217_v40, %v501_v45  ;;  %v990_v48 = vadd.f32 %v2217_v40, %v629_v46  ;;  %v1957_v49 = vpop.f32.mrb[2].mxu0  ;;  %v1989_v50 = vpop.f32.mrb[2].mxu1 }
  0xf8   :  { %vm1024_vm0 = vcmp.ge.f32.partialorder %v960_v43, 0.0  ;;  %v1088_v51 = vmul.f32 0.2, %v960_v43  ;;  %vm1056_vm1 = vcmp.ge.f32.partialorder %v992_v44, 0.0  ;;  %v1120_v52 = vmul.f32 0.2, %v992_v44 }
  0xf9   :  { %vm1022_vm2 = vcmp.ge.f32.partialorder %v958_v47, 0.0  ;;  %v1086_v53 = vmul.f32 0.2, %v958_v47  ;;  %vm1054_vm3 = vcmp.ge.f32.partialorder %v990_v48, 0.0  ;;  %v1118_v54 = vmul.f32 0.2, %v990_v48 }
  0xfa   :  { %v961_v55 = vadd.f32 %v1957_v49, %v2217_v40  ;;  %v993_v56 = vadd.f32 %v1989_v50, %v2217_v40  ;;  %v504_v57 = vpop.f32.mrb[3].mxu0  ;;  %v632_v58 = vpop.f32.mrb[3].mxu1  ;;  %v1152_v59 = vsel %vm1024_vm0, %v960_v43, %v1088_v51  ;;  %v1184_v60 = vsel %vm1056_vm1, %v992_v44, %v1120_v52 }
  0xfb   :  { %v959_v61 = vadd.f32 %v2217_v40, %v504_v57  ;;  %v991_v62 = vadd.f32 %v2217_v40, %v632_v58  ;;  %v1150_v3 = vsel %vm1022_vm2, %v958_v47, %v1086_v53  ;;  %v1182_v4 = vsel %vm1054_vm3, %v990_v48, %v1118_v54 }
  0xfc   :  { %vm1025_vm4 = vcmp.ge.f32.partialorder %v961_v55, 0.0  ;;  %v1089_v63 = vmul.f32 0.2, %v961_v55  ;;  %vm1057_vm5 = vcmp.ge.f32.partialorder %v993_v56, 0.0  ;;  %v1121_v0 = vmul.f32 0.2, %v993_v56 }
  0xfd   :  { %vm1023_vm6 = vcmp.ge.f32.partialorder %v959_v61, 0.0  ;;  %v1087_v1 = vmul.f32 0.2, %v959_v61  ;;  %vm1055_vm7 = vcmp.ge.f32.partialorder %v991_v62, 0.0  ;;  %v1119_v2 = vmul.f32 0.2, %v991_v62 }
  0xfe   :  { %v1153_v5 = vsel %vm1025_vm4, %v961_v55, %v1089_v63  ;;  %v1185_v6 = vsel %vm1057_vm5, %v993_v56, %v1121_v0  ;;  %v1960_v7 = vpop.f32.mrb[4].mxu0  ;;  %v1992_v8 = vpop.f32.mrb[4].mxu1 }
  0xff   :  { %v1715_v9 = vpack.c.bf16 %v1153_v5, %v1152_v59  ;;  %v1795_v10 = vpack.c.bf16 %v1185_v6, %v1184_v60  ;;  %v1151_v11 = vsel %vm1023_vm6, %v959_v61, %v1087_v1  ;;  %v1183_v12 = vsel %vm1055_vm7, %v991_v62, %v1119_v2  ;;  %v517_v13 = vpop.f32.mrb[5].mxu0  ;;  %v645_v14 = vpop.f32.mrb[5].mxu1 }
 0x100   :  { %v1710_v15 = vpack.c.bf16 %v1151_v11, %v1150_v3  ;;  %v1790_v16 = vpack.c.bf16 %v1183_v12, %v1182_v4  ;;  %v964_v17 = vadd.f32 %v1960_v7, %v2217_v40  ;;  %v996_v18 = vadd.f32 %v1992_v8, %v2217_v40  ;;  %v1961_v19 = vpop.f32.mrb[6].mxu0  ;;  %v1993_v20 = vpop.f32.mrb[6].mxu1 }
 0x101   :  { %1867 = vst [vmem:[%s2391_s3 + $0x8] sm:$0xff] %v1715_v9   ;;  %1883 = vst [vmem:[%s2391_s3 + $0x88] sm:$0xff] %v1795_v10   ;;  %v962_v21 = vadd.f32 %v2217_v40, %v517_v13  ;;  %v994_v22 = vadd.f32 %v2217_v40, %v645_v14  ;;  %v965_v23 = vadd.f32 %v1961_v19, %v2217_v40  ;;  %v520_v25 = vpop.f32.mrb[7].mxu0  ;;  %v648_v26 = vpop.f32.mrb[7].mxu1 }
 0x102   :  { %v997_v24 = vadd.f32 %v1993_v20, %v2217_v40  ;;  %1711 = vst [vmem:[%s2391_s3] sm:$0xff] %v1710_v15   ;;  %1882 = vst [vmem:[%s2391_s3 + $0x80] sm:$0xff] %v1790_v16   ;;  %vm1028_vm8 = vcmp.ge.f32.partialorder %v964_v17, 0.0  ;;  %v1092_v27 = vmul.f32 0.2, %v964_v17  ;;  %vm1060_vm9 = vcmp.ge.f32.partialorder %v996_v18, 0.0 }
 0x103   :  { %v1124_v28 = vmul.f32 0.2, %v996_v18  ;;  %vm1026_vm10 = vcmp.ge.f32.partialorder %v962_v21, 0.0  ;;  %v1090_v29 = vmul.f32 0.2, %v962_v21  ;;  %vm1058_vm11 = vcmp.ge.f32.partialorder %v994_v22, 0.0 }
 0x104   :  { %v1122_v30 = vmul.f32 0.2, %v994_v22  ;;  %v1156_v31 = vsel %vm1028_vm8, %v964_v17, %v1092_v27  ;;  %vm1029_vm12 = vcmp.ge.f32.partialorder %v965_v23, 0.0  ;;  %v1093_v33 = vmul.f32 0.2, %v965_v23 }
 0x105   :  { %v1188_v32 = vsel %vm1060_vm9, %v996_v18, %v1124_v28  ;;  %v1154_v34 = vsel %vm1026_vm10, %v962_v21, %v1090_v29  ;;  %vm1061_vm13 = vcmp.ge.f32.partialorder %v997_v24, 0.0  ;;  %v1125_v36 = vmul.f32 0.2, %v997_v24  ;;  %v1964_v37 = vpop.f32.mrb[8].mxu0  ;;  %v1996_v38 = vpop.f32.mrb[8].mxu1 }
 0x106   :  { %v1186_v35 = vsel %vm1058_vm11, %v994_v22, %v1122_v30  ;;  %v1157_v39 = vsel %vm1029_vm12, %v965_v23, %v1093_v33  ;;  %v963_v41 = vadd.f32 %v2217_v40, %v520_v25  ;;  %v995_v42 = vadd.f32 %v2217_v40, %v648_v26  ;;  %v533_v44 = vpop.f32.mrb[9].mxu0  ;;  %v661_v45 = vpop.f32.mrb[9].mxu1 }
 0x107   :  { %v968_v43 = vadd.f32 %v1964_v37, %v2217_v40  ;;  %v1725_v46 = vpack.c.bf16 %v1157_v39, %v1156_v31  ;;  %v1189_v47 = vsel %vm1061_vm13, %v997_v24, %v1125_v36  ;;  %v1000_v48 = vadd.f32 %v1996_v38, %v2217_v40  ;;  %v1965_v50 = vpop.f32.mrb[10].mxu0  ;;  %v1997_v51 = vpop.f32.mrb[10].mxu1 }
 0x108   :  { %v966_v49 = vadd.f32 %v2217_v40, %v533_v44  ;;  %v1805_v52 = vpack.c.bf16 %v1189_v47, %v1188_v32  ;;  %vm1027_vm14 = vcmp.ge.f32.partialorder %v963_v41, 0.0  ;;  %v1091_v53 = vmul.f32 0.2, %v963_v41  ;;  %v536_v54 = vpop.f32.mrb[11].mxu0  ;;  %v664_v55 = vpop.f32.mrb[11].mxu1 }
 0x109   :  { %vm1059_vm15 = vcmp.ge.f32.partialorder %v995_v42, 0.0  ;;  %1869 = vst [vmem:[%s2391_s3 + $0x18] sm:$0xff] %v1725_v46   ;;  %v1123_v56 = vmul.f32 0.2, %v995_v42  ;;  %vm1032_vm0 = vcmp.ge.f32.partialorder %v968_v43, 0.0  ;;  %vm1064_vm1 = vcmp.ge.f32.partialorder %v1000_v48, 0.0 }
 0x10a   :  { %v1096_v57 = vmul.f32 0.2, %v968_v43  ;;  %1885 = vst [vmem:[%s2391_s3 + $0x98] sm:$0xff] %v1805_v52   ;;  %v1155_v58 = vsel %vm1027_vm14, %v963_v41, %v1091_v53  ;;  %v1128_v59 = vmul.f32 0.2, %v1000_v48  ;;  %vm1030_vm2 = vcmp.ge.f32.partialorder %v966_v49, 0.0 }
 0x10b   :  { %v1094_v60 = vmul.f32 0.2, %v966_v49  ;;  %v1720_v61 = vpack.c.bf16 %v1155_v58, %v1154_v34  ;;  %v1187_v62 = vsel %vm1059_vm15, %v995_v42, %v1123_v56  ;;  %v998_v0 = vadd.f32 %v2217_v40, %v661_v45 }
 0x10c   :  { %v1160_v63 = vsel %vm1032_vm0, %v968_v43, %v1096_v57  ;;  %v1800_v1 = vpack.c.bf16 %v1187_v62, %v1186_v35  ;;  %v1192_v2 = vsel %vm1064_vm1, %v1000_v48, %v1128_v59  ;;  %v969_v4 = vadd.f32 %v1965_v50, %v2217_v40 }
 0x10d   :  { %v1158_v3 = vsel %vm1030_vm2, %v966_v49, %v1094_v60  ;;  %1868 = vst [vmem:[%s2391_s3 + $0x10] sm:$0xff] %v1720_v61   ;;  %vm1062_vm3 = vcmp.ge.f32.partialorder %v998_v0, 0.0  ;;  %v1126_v5 = vmul.f32 0.2, %v998_v0  ;;  %v1001_v6 = vadd.f32 %v1997_v51, %v2217_v40  ;;  %v1968_v8 = vpop.f32.mrb[12].mxu0  ;;  %v2000_v9 = vpop.f32.mrb[12].mxu1 }
 0x10e   :  { %v967_v7 = vadd.f32 %v2217_v40, %v536_v54  ;;  %1884 = vst [vmem:[%s2391_s3 + $0x90] sm:$0xff] %v1800_v1   ;;  %vm1033_vm4 = vcmp.ge.f32.partialorder %v969_v4, 0.0  ;;  %v1097_v10 = vmul.f32 0.2, %v969_v4  ;;  %v999_v11 = vadd.f32 %v2217_v40, %v664_v55  ;;  %v549_v13 = vpop.f32.mrb[13].mxu0  ;;  %v677_v14 = vpop.f32.mrb[13].mxu1 }
 0x10f   :  { %v972_v12 = vadd.f32 %v1968_v8, %v2217_v40  ;;  %v1190_v15 = vsel %vm1062_vm3, %v998_v0, %v1126_v5  ;;  %vm1065_vm5 = vcmp.ge.f32.partialorder %v1001_v6, 0.0  ;;  %v1129_v16 = vmul.f32 0.2, %v1001_v6  ;;  %v1969_v17 = vpop.f32.mrb[14].mxu0  ;;  %v2001_v18 = vpop.f32.mrb[14].mxu1 }
 0x110   :  { %vm1031_vm6 = vcmp.ge.f32.partialorder %v967_v7, 0.0  ;;  %v1161_v19 = vsel %vm1033_vm4, %v969_v4, %v1097_v10  ;;  %v1095_v20 = vmul.f32 0.2, %v967_v7  ;;  %vm1063_vm7 = vcmp.ge.f32.partialorder %v999_v11, 0.0  ;;  %v552_v22 = vpop.f32.mrb[15].mxu0  ;;  %v680_v26 = vpop.f32.mrb[15].mxu1 }
 0x111   :  { %v1127_v21 = vmul.f32 0.2, %v999_v11  ;;  %v1735_v23 = vpack.c.bf16 %v1161_v19, %v1160_v63  ;;  %v1193_v24 = vsel %vm1065_vm5, %v1001_v6, %v1129_v16  ;;  %vm1036_vm8 = vcmp.ge.f32.partialorder %v972_v12, 0.0 }
 0x112   :  { %v1100_v25 = vmul.f32 0.2, %v972_v12  ;;  %v1815_v27 = vpack.c.bf16 %v1193_v24, %v1192_v2  ;;  %v1159_v28 = vsel %vm1031_vm6, %v967_v7, %v1095_v20  ;;  %v1004_v30 = vadd.f32 %v2000_v9, %v2217_v40 }
 0x113   :  { %v1191_v29 = vsel %vm1063_vm7, %v999_v11, %v1127_v21  ;;  %1871 = vst [vmem:[%s2391_s3 + $0x28] sm:$0xff] %v1735_v23   ;;  %v1730_v31 = vpack.c.bf16 %v1159_v28, %v1158_v3  ;;  %v970_v34 = vadd.f32 %v2217_v40, %v549_v13  ;;  %v1002_v36 = vadd.f32 %v2217_v40, %v677_v14 }
 0x114   :  { %v1810_v32 = vpack.c.bf16 %v1191_v29, %v1190_v15  ;;  %v1164_v33 = vsel %vm1036_vm8, %v972_v12, %v1100_v25  ;;  %1887 = vst [vmem:[%s2391_s3 + $0xa8] sm:$0xff] %v1815_v27   ;;  %vm1068_vm9 = vcmp.ge.f32.partialorder %v1004_v30, 0.0  ;;  %v1132_v35 = vmul.f32 0.2, %v1004_v30 }
 0x115   :  { %v973_v37 = vadd.f32 %v1969_v17, %v2217_v40  ;;  %1870 = vst [vmem:[%s2391_s3 + $0x20] sm:$0xff] %v1730_v31   ;;  %vm1034_vm10 = vcmp.ge.f32.partialorder %v970_v34, 0.0  ;;  %v1098_v38 = vmul.f32 0.2, %v970_v34  ;;  %v1005_v39 = vadd.f32 %v2001_v18, %v2217_v40  ;;  %v1972_v42 = vpop.f32.mrb[16].mxu0  ;;  %v2004_v43 = vpop.f32.mrb[16].mxu1 }
 0x116   :  { %1886 = vst [vmem:[%s2391_s3 + $0xa0] sm:$0xff] %v1810_v32   ;;  %v971_v41 = vadd.f32 %v2217_v40, %v552_v22  ;;  %v1196_v44 = vsel %vm1068_vm9, %v1004_v30, %v1132_v35  ;;  %vm1066_vm11 = vcmp.ge.f32.partialorder %v1002_v36, 0.0  ;;  %v1130_v45 = vmul.f32 0.2, %v1002_v36  ;;  %v565_v46 = vpop.f32.mrb[17].mxu0  ;;  %v693_v47 = vpop.f32.mrb[17].mxu1 }
 0x117   :  { %vm1037_vm12 = vcmp.ge.f32.partialorder %v973_v37, 0.0  ;;  %v1162_v48 = vsel %vm1034_vm10, %v970_v34, %v1098_v38  ;;  %v1101_v49 = vmul.f32 0.2, %v973_v37  ;;  %vm1069_vm13 = vcmp.ge.f32.partialorder %v1005_v39, 0.0  ;;  %v1973_v51 = vpop.f32.mrb[18].mxu0  ;;  %v2005_v55 = vpop.f32.mrb[18].mxu1 }
 0x118   :  { %v1133_v50 = vmul.f32 0.2, %v1005_v39  ;;  %v1194_v52 = vsel %vm1066_vm11, %v1002_v36, %v1130_v45  ;;  %vm1035_vm14 = vcmp.ge.f32.partialorder %v971_v41, 0.0  ;;  %v1099_v53 = vmul.f32 0.2, %v971_v41  ;;  %v568_v56 = vpop.f32.mrb[19].mxu0 }
 0x119   :  { %v1003_v54 = vadd.f32 %v2217_v40, %v680_v26  ;;  %v1165_v57 = vsel %vm1037_vm12, %v973_v37, %v1101_v49  ;;  %v976_v59 = vadd.f32 %v1972_v42, %v2217_v40  ;;  %v1008_v60 = vadd.f32 %v2004_v43, %v2217_v40  ;;  %v696_v61 = vpop.f32.mrb[19].mxu1 }
 0x11a   :  { %v1197_v58 = vsel %vm1069_vm13, %v1005_v39, %v1133_v50  ;;  %v1745_v62 = vpack.c.bf16 %v1165_v57, %v1164_v33  ;;  %v1163_v0 = vsel %vm1035_vm14, %v971_v41, %v1099_v53  ;;  %v974_v5 = vadd.f32 %v2217_v40, %v565_v46 }
 0x11b   :  { %v1825_v63 = vpack.c.bf16 %v1197_v58, %v1196_v44  ;;  %vm1067_vm15 = vcmp.ge.f32.partialorder %v1003_v54, 0.0  ;;  %v1740_v1 = vpack.c.bf16 %v1163_v0, %v1162_v48  ;;  %v1131_v2 = vmul.f32 0.2, %v1003_v54 }
 0x11c   :  { %vm1040_vm0 = vcmp.ge.f32.partialorder %v976_v59, 0.0  ;;  %v1104_v3 = vmul.f32 0.2, %v976_v59  ;;  %1873 = vst [vmem:[%s2391_s3 + $0x38] sm:$0xff] %v1745_v62   ;;  %vm1072_vm1 = vcmp.ge.f32.partialorder %v1008_v60, 0.0  ;;  %v1006_v6 = vadd.f32 %v2217_v40, %v693_v47 }
 0x11d   :  { %1889 = vst [vmem:[%s2391_s3 + $0xb8] sm:$0xff] %v1825_v63   ;;  %v1136_v4 = vmul.f32 0.2, %v1008_v60  ;;  %1872 = vst [vmem:[%s2391_s3 + $0x30] sm:$0xff] %v1740_v1   ;;  %v1195_v7 = vsel %vm1067_vm15, %v1003_v54, %v1131_v2  ;;  %v977_v9 = vadd.f32 %v1973_v51, %v2217_v40  ;;  %v1009_v10 = vadd.f32 %v2005_v55, %v2217_v40  ;;  %v1976_v11 = vpop.f32.mrb[20].mxu0  ;;  %v2008_v12 = vpop.f32.mrb[20].mxu1 }
 0x11e   :  { %v1168_v8 = vsel %vm1040_vm0, %v976_v59, %v1104_v3  ;;  %v1820_v13 = vpack.c.bf16 %v1195_v7, %v1194_v52  ;;  %vm1038_vm2 = vcmp.ge.f32.partialorder %v974_v5, 0.0  ;;  %v1102_v15 = vmul.f32 0.2, %v974_v5  ;;  %v581_v16 = vpop.f32.mrb[21].mxu0  ;;  %v709_v17 = vpop.f32.mrb[21].mxu1 }
 0x11f   :  { %v1200_v14 = vsel %vm1072_vm1, %v1008_v60, %v1136_v4  ;;  %vm1070_vm3 = vcmp.ge.f32.partialorder %v1006_v6, 0.0  ;;  %v1134_v18 = vmul.f32 0.2, %v1006_v6  ;;  %vm1041_vm4 = vcmp.ge.f32.partialorder %v977_v9, 0.0  ;;  %v1977_v23 = vpop.f32.mrb[22].mxu0  ;;  %v2009_v24 = vpop.f32.mrb[22].mxu1 }
 0x120   :  { %v1105_v19 = vmul.f32 0.2, %v977_v9  ;;  %1888 = vst [vmem:[%s2391_s3 + $0xb0] sm:$0xff] %v1820_v13   ;;  %v1166_v20 = vsel %vm1038_vm2, %v974_v5, %v1102_v15  ;;  %vm1073_vm5 = vcmp.ge.f32.partialorder %v1009_v10, 0.0  ;;  %v1137_v21 = vmul.f32 0.2, %v1009_v10 }
 0x121   :  { %v975_v22 = vadd.f32 %v2217_v40, %v568_v56  ;;  %v1198_v25 = vsel %vm1070_vm3, %v1006_v6, %v1134_v18  ;;  %v1007_v27 = vadd.f32 %v2217_v40, %v696_v61  ;;  %v980_v28 = vadd.f32 %v1976_v11, %v2217_v40  ;;  %v584_v29 = vpop.f32.mrb[23].mxu0  ;;  %v712_v30 = vpop.f32.mrb[23].mxu1 }
 0x122   :  { %v1169_v26 = vsel %vm1041_vm4, %v977_v9, %v1105_v19  ;;  %v1201_v32 = vsel %vm1073_vm5, %v1009_v10, %v1137_v21  ;;  %v1012_v38 = vadd.f32 %v2008_v12, %v2217_v40  ;;  %v978_v39 = vadd.f32 %v2217_v40, %v581_v16 }
 0x123   :  { %v1755_v31 = vpack.c.bf16 %v1169_v26, %v1168_v8  ;;  %vm1039_vm6 = vcmp.ge.f32.partialorder %v975_v22, 0.0  ;;  %v1103_v33 = vmul.f32 0.2, %v975_v22  ;;  %v1835_v34 = vpack.c.bf16 %v1201_v32, %v1200_v14 }
 0x124   :  { %vm1071_vm7 = vcmp.ge.f32.partialorder %v1007_v27, 0.0  ;;  %v1135_v35 = vmul.f32 0.2, %v1007_v27  ;;  %vm1044_vm8 = vcmp.ge.f32.partialorder %v980_v28, 0.0  ;;  %v1108_v37 = vmul.f32 0.2, %v980_v28 }
 0x125   :  { %1875 = vst [vmem:[%s2391_s3 + $0x48] sm:$0xff] %v1755_v31   ;;  %v1167_v36 = vsel %vm1039_vm6, %v975_v22, %v1103_v33  ;;  %1891 = vst [vmem:[%s2391_s3 + $0xc8] sm:$0xff] %v1835_v34   ;;  %v1010_v43 = vadd.f32 %v2217_v40, %v709_v17  ;;  %v981_v44 = vadd.f32 %v1977_v23, %v2217_v40  ;;  %v1980_v45 = vpop.f32.mrb[24].mxu0  ;;  %v2012_v46 = vpop.f32.mrb[24].mxu1  ;;  %vm1076_vm9 = vcmp.ge.f32.partialorder %v1012_v38, 0.0 }
 0x126   :  { %v1750_v41 = vpack.c.bf16 %v1167_v36, %v1166_v20  ;;  %v1199_v42 = vsel %vm1071_vm7, %v1007_v27, %v1135_v35  ;;  %v1140_v48 = vmul.f32 0.2, %v1012_v38  ;;  %v597_v49 = vpop.f32.mrb[25].mxu0  ;;  %v725_v50 = vpop.f32.mrb[25].mxu1  ;;  %v1172_v51 = vsel %vm1044_vm8, %v980_v28, %v1108_v37 }
 0x127   :  { %v1830_v47 = vpack.c.bf16 %v1199_v42, %v1198_v25  ;;  %vm1042_vm10 = vcmp.ge.f32.partialorder %v978_v39, 0.0  ;;  %v1106_v52 = vmul.f32 0.2, %v978_v39  ;;  %v1138_v53 = vmul.f32 0.2, %v1010_v43  ;;  %v1981_v56 = vpop.f32.mrb[26].mxu0 }
 0x128   :  { %1874 = vst [vmem:[%s2391_s3 + $0x40] sm:$0xff] %v1750_v41   ;;  %vm1074_vm11 = vcmp.ge.f32.partialorder %v1010_v43, 0.0  ;;  %vm1045_vm12 = vcmp.ge.f32.partialorder %v981_v44, 0.0  ;;  %v1109_v54 = vmul.f32 0.2, %v981_v44  ;;  %v1013_v55 = vadd.f32 %v2009_v24, %v2217_v40  ;;  %v2013_v57 = vpop.f32.mrb[26].mxu1 }
 0x129   :  { %1890 = vst [vmem:[%s2391_s3 + $0xc0] sm:$0xff] %v1830_v47   ;;  %v1204_v58 = vsel %vm1076_vm9, %v1012_v38, %v1140_v48  ;;  %v1170_v59 = vsel %vm1042_vm10, %v978_v39, %v1106_v52  ;;  %v979_v60 = vadd.f32 %v2217_v40, %v584_v29  ;;  %v1011_v61 = vadd.f32 %v2217_v40, %v712_v30  ;;  %v600_v62 = vpop.f32.mrb[27].mxu0  ;;  %v728_v63 = vpop.f32.mrb[27].mxu1 }
 0x12a   :  { %v1173_v0 = vsel %vm1045_vm12, %v981_v44, %v1109_v54  ;;  %vm1077_vm13 = vcmp.ge.f32.partialorder %v1013_v55, 0.0  ;;  %v1141_v1 = vmul.f32 0.2, %v1013_v55  ;;  %v984_v2 = vadd.f32 %v1980_v45, %v2217_v40 }
 0x12b   :  { %v1765_v3 = vpack.c.bf16 %v1173_v0, %v1172_v51  ;;  %vm1043_vm14 = vcmp.ge.f32.partialorder %v979_v60, 0.0  ;;  %v1107_v4 = vmul.f32 0.2, %v979_v60  ;;  %vm1075_vm15 = vcmp.ge.f32.partialorder %v1011_v61, 0.0 }
 0x12c   :  { %v1205_v5 = vsel %vm1077_vm13, %v1013_v55, %v1141_v1  ;;  %v1139_v6 = vmul.f32 0.2, %v1011_v61  ;;  %vm1048_vm0 = vcmp.ge.f32.partialorder %v984_v2, 0.0  ;;  %v1112_v7 = vmul.f32 0.2, %v984_v2 }
 0x12d   :  { %1877 = vst [vmem:[%s2391_s3 + $0x58] sm:$0xff] %v1765_v3   ;;  %v1845_v8 = vpack.c.bf16 %v1205_v5, %v1204_v58  ;;  %v1171_v9 = vsel %vm1043_vm14, %v979_v60, %v1107_v4  ;;  %v1016_v10 = vadd.f32 %v2012_v46, %v2217_v40  ;;  %v982_v11 = vadd.f32 %v2217_v40, %v597_v49  ;;  %v1984_v12 = vpop.f32.mrb[28].mxu0  ;;  %v2016_v13 = vpop.f32.mrb[28].mxu1 }
 0x12e   :  { %v1202_v14 = vsel %vm1074_vm11, %v1010_v43, %v1138_v53  ;;  %v1760_v15 = vpack.c.bf16 %v1171_v9, %v1170_v59  ;;  %v1203_v16 = vsel %vm1075_vm15, %v1011_v61, %v1139_v6  ;;  %v1014_v17 = vadd.f32 %v2217_v40, %v725_v50  ;;  %v613_v18 = vpop.f32.mrb[29].mxu0  ;;  %v741_v19 = vpop.f32.mrb[29].mxu1 }
 0x12f   :  { %1893 = vst [vmem:[%s2391_s3 + $0xd8] sm:$0xff] %v1845_v8   ;;  %v1840_v20 = vpack.c.bf16 %v1203_v16, %v1202_v14  ;;  %vm1080_vm1 = vcmp.ge.f32.partialorder %v1016_v10, 0.0  ;;  %v1144_v21 = vmul.f32 0.2, %v1016_v10  ;;  %vm1046_vm2 = vcmp.ge.f32.partialorder %v982_v11, 0.0  ;;  %v1985_v22 = vpop.f32.mrb[30].mxu0 }
 0x130   :  { %v2017_v23 = vpop.f32.mrb[30].mxu1  ;;  %1876 = vst [vmem:[%s2391_s3 + $0x50] sm:$0xff] %v1760_v15   ;;  %v1176_v24 = vsel %vm1048_vm0, %v984_v2, %v1112_v7  ;;  %v1110_v25 = vmul.f32 0.2, %v982_v11  ;;  %vm1078_vm3 = vcmp.ge.f32.partialorder %v1014_v17, 0.0  ;;  %v985_v26 = vadd.f32 %v1981_v56, %v2217_v40  ;;  %v616_v27 = vpop.f32.mrb[31].mxu0 }
 0x131   :  { %1892 = vst [vmem:[%s2391_s3 + $0xd0] sm:$0xff] %v1840_v20   ;;  %v1142_v28 = vmul.f32 0.2, %v1014_v17  ;;  %v1017_v29 = vadd.f32 %v2013_v57, %v2217_v40  ;;  %v983_v30 = vadd.f32 %v2217_v40, %v600_v62  ;;  %v1015_v31 = vadd.f32 %v2217_v40, %v728_v63  ;;  %v744_v32 = vpop.f32.mrb[31].mxu1 }
 0x132   :  { %v1208_v33 = vsel %vm1080_vm1, %v1016_v10, %v1144_v21  ;;  %v1174_v34 = vsel %vm1046_vm2, %v982_v11, %v1110_v25  ;;  %vm1049_vm4 = vcmp.ge.f32.partialorder %v985_v26, 0.0  ;;  %v1113_v35 = vmul.f32 0.2, %v985_v26 }
 0x133   :  { %vm1081_vm5 = vcmp.ge.f32.partialorder %v1017_v29, 0.0  ;;  %v1145_v36 = vmul.f32 0.2, %v1017_v29  ;;  %vm1047_vm6 = vcmp.ge.f32.partialorder %v983_v30, 0.0  ;;  %v1111_v37 = vmul.f32 0.2, %v983_v30 }
 0x134   :  { %v1177_v38 = vsel %vm1049_vm4, %v985_v26, %v1113_v35  ;;  %vm1079_vm7 = vcmp.ge.f32.partialorder %v1015_v31, 0.0  ;;  %v1143_v39 = vmul.f32 0.2, %v1015_v31  ;;  %v988_v41 = vadd.f32 %v1984_v12, %v2217_v40 }
 0x135   :  { %v1775_v42 = vpack.c.bf16 %v1177_v38, %v1176_v24  ;;  %v1209_v43 = vsel %vm1081_vm5, %v1017_v29, %v1145_v36  ;;  %v1175_v44 = vsel %vm1047_vm6, %v983_v30, %v1111_v37  ;;  %v1020_v45 = vadd.f32 %v2016_v13, %v2217_v40 }
 0x136   :  { %v1206_v46 = vsel %vm1078_vm3, %v1014_v17, %v1142_v28  ;;  %v1855_v47 = vpack.c.bf16 %v1209_v43, %v1208_v33  ;;  %v1770_v48 = vpack.c.bf16 %v1175_v44, %v1174_v34  ;;  %v1207_v49 = vsel %vm1079_vm7, %v1015_v31, %v1143_v39 }
 0x137   :  { %1879 = vst [vmem:[%s2391_s3 + $0x68] sm:$0xff] %v1775_v42   ;;  %v1850_v50 = vpack.c.bf16 %v1207_v49, %v1206_v46  ;;  %vm1052_vm8 = vcmp.ge.f32.partialorder %v988_v41, 0.0  ;;  %v1116_v51 = vmul.f32 0.2, %v988_v41  ;;  %v1148_v52 = vmul.f32 0.2, %v1020_v45 }
 0x138   :  { %1895 = vst [vmem:[%s2391_s3 + $0xe8] sm:$0xff] %v1855_v47   ;;  %1878 = vst [vmem:[%s2391_s3 + $0x60] sm:$0xff] %v1770_v48   ;;  %v986_v53 = vadd.f32 %v2217_v40, %v613_v18  ;;  %v1018_v54 = vadd.f32 %v2217_v40, %v741_v19  ;;  %v989_v55 = vadd.f32 %v1985_v22, %v2217_v40  ;;  %vm1084_vm9 = vcmp.ge.f32.partialorder %v1020_v45, 0.0 }
 0x139   :  { %v1021_v56 = vadd.f32 %v2017_v23, %v2217_v40  ;;  %1894 = vst [vmem:[%s2391_s3 + $0xe0] sm:$0xff] %v1850_v50   ;;  %v987_v57 = vadd.f32 %v2217_v40, %v616_v27  ;;  %v1019_v58 = vadd.f32 %v2217_v40, %v744_v32  ;;  %v1180_v59 = vsel %vm1052_vm8, %v988_v41, %v1116_v51 }
 0x13a   :  { %vm1050_vm10 = vcmp.ge.f32.partialorder %v986_v53, 0.0  ;;  %v1114_v60 = vmul.f32 0.2, %v986_v53  ;;  %v1146_v61 = vmul.f32 0.2, %v1018_v54  ;;  %vm1053_vm11 = vcmp.ge.f32.partialorder %v989_v55, 0.0 }
 0x13b   :  { %v1117_v62 = vmul.f32 0.2, %v989_v55  ;;  %vm1085_vm12 = vcmp.ge.f32.partialorder %v1021_v56, 0.0  ;;  %v1149_v63 = vmul.f32 0.2, %v1021_v56  ;;  %v1212_v0 = vsel %vm1084_vm9, %v1020_v45, %v1148_v52 }
 0x13c   :  { %vm1082_vm13 = vcmp.ge.f32.partialorder %v1018_v54, 0.0  ;;  %vm1051_vm14 = vcmp.ge.f32.partialorder %v987_v57, 0.0  ;;  %v1115_v1 = vmul.f32 0.2, %v987_v57  ;;  %vm1083_vm15 = vcmp.ge.f32.partialorder %v1019_v58, 0.0 }
 0x13d   :  { %v1181_v2 = vsel %vm1053_vm11, %v989_v55, %v1117_v62  ;;  %v1213_v3 = vsel %vm1085_vm12, %v1021_v56, %v1149_v63  ;;  %v1147_v4 = vmul.f32 0.2, %v1019_v58  ;;  %v1178_v5 = vsel %vm1050_vm10, %v986_v53, %v1114_v60 }
 0x13e   :  { %v1785_v6 = vpack.c.bf16 %v1181_v2, %v1180_v59  ;;  %v1865_v7 = vpack.c.bf16 %v1213_v3, %v1212_v0  ;;  %v1179_v40 = vsel %vm1051_vm14, %v987_v57, %v1115_v1  ;;  %v1210_v8 = vsel %vm1082_vm13, %v1018_v54, %v1146_v61 }
 0x13f   :  { %v1780_v9 = vpack.c.bf16 %v1179_v40, %v1178_v5  ;;  %v1211_v10 = vsel %vm1083_vm15, %v1019_v58, %v1147_v4 }
 0x140   :  { %1881 = vst [vmem:[%s2391_s3 + $0x78] sm:$0xff] %v1785_v6   ;;  %1897 = vst [vmem:[%s2391_s3 + $0xf8] sm:$0xff] %v1865_v7   ;;  %v1860_v11 = vpack.c.bf16 %v1211_v10, %v1210_v8 }
 0x141   :  { %1880 = vst [vmem:[%s2391_s3 + $0x70] sm:$0xff] %v1780_v9  }
 0x142   :  { %1896 = vst [vmem:[%s2391_s3 + $0xf0] sm:$0xff] %v1860_v11  }

// kernel: _lambda_.18
= control target key start
LH: loop header
LB: loop body
LE: loop exit
PB: predicated region body
PF: predicated region fallthrough
CT: control target
= control target key end

     0   :  { %s810_s1 = inlined_call_operand.vmem [shape: bf16[1,128,128], index: 1, kind: input, shape index: {}]   ;;  %s811_s0 = inlined_call_operand.vmem [shape: bf16[1,128,128], index: 0, kind: input, shape index: {}]   ;;  %s812_s2 = inlined_call_operand.vmem [shape: f32[1,128], index: 2, kind: input, shape index: {}]   ;;  %s813_s3 = inlined_call_operand.vmem [shape: bf16[1,128,128], index: 3, kind: output, shape index: {0}]   ;;  %s814_s4 = inlined_call_operand.vmem [shape: f32[1,8,128], index: 4, kind: output, shape index: {1}]   ;;  %s815_s5 = inlined_call_operand.vmem [shape: f32[1,8,128], index: 5, kind: output, shape index: {2}]  }
   0x1   :  { %v665_v0 = vld [vmem:[%s810_s1] sm:$0xff]   ;;  %v666_v1 = vld [vmem:[%s810_s1 + $0x8] sm:$0xff]   ;;  %v667_v2 = vld [vmem:[%s810_s1 + $0x10] sm:$0xff]  }
   0x2   :  { %617 = vmatprep.subr.bf16.mxu0 %v665_v0  ;;  %649 = vmatprep.subr.bf16.mxu1 %v665_v0  ;;  %v668_v3 = vld [vmem:[%s810_s1 + $0x18] sm:$0xff]   ;;  %v673_v4 = vld [vmem:[%s811_s0] sm:$0xff]   ;;  %v670_v7 = vld [vmem:[%s810_s1 + $0x28] sm:$0xff]  }
   0x3   :  { %618 = vmatpush3.bf16.msra.mxu0 %v665_v0  ;;  %657 = vmatpush3.bf16.msra.mxu1 %v665_v0  ;;  %v669_v5 = vld [vmem:[%s810_s1 + $0x20] sm:$0xff]   ;;  %v671_v8 = vld [vmem:[%s810_s1 + $0x30] sm:$0xff]   ;;  %v672_v9 = vld [vmem:[%s810_s1 + $0x38] sm:$0xff]  }
   0x4   :  { %619 = vmatprep.subr.bf16.mxu0 %v666_v1  ;;  %650 = vmatprep.subr.bf16.mxu1 %v666_v1  ;;  %v677_v6 = vld [vmem:[%s811_s0 + $0x20] sm:$0xff]   ;;  %v674_v10 = vld [vmem:[%s811_s0 + $0x8] sm:$0xff]   ;;  %v675_v12 = vld [vmem:[%s811_s0 + $0x10] sm:$0xff]  }
   0x5   :  { %633 = vmatprep.mubr.bf16.mxu0 %v673_v4  ;;  %641 = vmatprep.mubr.bf16.mxu1 %v677_v6  ;;  %v678_v11 = vld [vmem:[%s811_s0 + $0x28] sm:$0xff]   ;;  %v679_v13 = vld [vmem:[%s811_s0 + $0x30] sm:$0xff]   ;;  %v676_v14 = vld [vmem:[%s811_s0 + $0x18] sm:$0xff]  }
   0x6   :  { %v680_v15 = vld [vmem:[%s811_s0 + $0x38] sm:$0xff]   ;;  %v521_v16 = vld [vmem:[%s812_s2] ss:$0 sm:$0xff] }
   0x7   :  { %620 = vmatpush3.bf16.msra.mxu0 %v666_v1  ;;  %658 = vmatpush3.bf16.msra.mxu1 %v666_v1 }
   0x8   :  { %621 = vmatprep.subr.bf16.mxu0 %v667_v2  ;;  %651 = vmatprep.subr.bf16.mxu1 %v667_v2 }
   0xb   :  { %622 = vmatpush3.bf16.msra.mxu0 %v667_v2  ;;  %659 = vmatpush3.bf16.msra.mxu1 %v667_v2 }
   0xc   :  { %623 = vmatprep.subr.bf16.mxu0 %v668_v3  ;;  %652 = vmatprep.subr.bf16.mxu1 %v668_v3 }
   0xf   :  { %624 = vmatpush3.bf16.msra.mxu0 %v668_v3  ;;  %660 = vmatpush3.bf16.msra.mxu1 %v668_v3 }
  0x10   :  { %625 = vmatprep.subr.bf16.mxu0 %v669_v5  ;;  %653 = vmatprep.subr.bf16.mxu1 %v669_v5 }
  0x13   :  { %626 = vmatpush3.bf16.msra.mxu0 %v669_v5  ;;  %661 = vmatpush3.bf16.msra.mxu1 %v669_v5 }
  0x14   :  { %627 = vmatprep.subr.bf16.mxu0 %v670_v7  ;;  %654 = vmatprep.subr.bf16.mxu1 %v670_v7 }
  0x17   :  { %628 = vmatpush3.bf16.msra.mxu0 %v670_v7  ;;  %662 = vmatpush3.bf16.msra.mxu1 %v670_v7 }
  0x18   :  { %629 = vmatprep.subr.bf16.mxu0 %v671_v8  ;;  %655 = vmatprep.subr.bf16.mxu1 %v671_v8 }
  0x1b   :  { %630 = vmatpush3.bf16.msra.mxu0 %v671_v8  ;;  %663 = vmatpush3.bf16.msra.mxu1 %v671_v8 }
  0x1c   :  { %631 = vmatprep.subr.bf16.mxu0 %v672_v9  ;;  %656 = vmatprep.subr.bf16.mxu1 %v672_v9 }
  0x1f   :  { %632 = vmatpush3.bf16.msra.mxu0 %v672_v9  ;;  %664 = vmatpush3.bf16.msra.mxu1 %v672_v9 }
  0x22   :  { %634 = vmatmul.mubr.bf16.vlgmr.msra.gmra.mrb[0].mxu0 %v674_v10  ;;  %642 = vmatmul.mubr.bf16.vlgmr.msra.gmra.mrb[0].mxu1 %v678_v11 }
  0x23   :  { %637 = vmatprep.mubr.bf16.mxu0 %v675_v12  ;;  %645 = vmatprep.mubr.bf16.mxu1 %v679_v13 }
  0x2a   :  { %638 = vmatmul.mubr.bf16.gmra.mrb[4].mxu0 %v676_v14  ;;  %646 = vmatmul.mubr.bf16.gmra.mrb[4].mxu1 %v680_v15 }
  0xf5   :  { %v635_v17 = vpop.f32.mrb[0].mxu0  ;;  %v643_v18 = vpop.f32.mrb[0].mxu1 }
  0xf6   :  { %v216_v19 = vpop.f32.mrb[1].mxu0  ;;  %v762_v20 = vadd.f32 %v643_v18, %v521_v16  ;;  %v248_v21 = vpop.f32.mrb[1].mxu1  ;;  %v339_v26 = vadd.f32 %v635_v17, %v521_v16 }
  0xf7   :  { %v337_v22 = vadd.f32 %v521_v16, %v216_v19  ;;  %v636_v23 = vpop.f32.mrb[2].mxu0  ;;  %v764_v24 = vadd.f32 %v521_v16, %v248_v21  ;;  %v644_v25 = vpop.f32.mrb[2].mxu1 }
  0xf8   :  { %v340_v27 = vadd.f32 %v636_v23, %v521_v16  ;;  %v219_v28 = vpop.f32.mrb[3].mxu0  ;;  %v766_v29 = vadd.f32 %v644_v25, %v521_v16  ;;  %v251_v30 = vpop.f32.mrb[3].mxu1  ;;  %v456_v40 = vmul.f32 %v339_v26, %v339_v26  ;;  %v464_v21 = vmul.f32 %v762_v20, %v762_v20 }
  0xf9   :  { %v338_v31 = vadd.f32 %v521_v16, %v219_v28  ;;  %v346_v32 = vadd.f32 %v521_v16, %v251_v30  ;;  %v454_v33 = vmul.f32 %v337_v22, %v337_v22  ;;  %v462_v14 = vmul.f32 %v764_v24, %v764_v24 }
  0xfa   :  { %v562_v34 = vpack.c.bf16 %v340_v27, %v339_v26  ;;  %v582_v35 = vpack.c.bf16 %v766_v29, %v762_v20  ;;  %v457_v48 = vmul.f32 %v340_v27, %v340_v27  ;;  %v465_v25 = vmul.f32 %v766_v29, %v766_v29 }
  0xfb   :  { %v557_v36 = vpack.c.bf16 %v338_v31, %v337_v22  ;;  %v433_v37 = vadd.f32 %v338_v31, %v337_v22  ;;  %v455_v38 = vmul.f32 %v338_v31, %v338_v31  ;;  %v577_v39 = vpack.c.bf16 %v346_v32, %v764_v24 }
  0xfc   :  { %594 = vst [vmem:[%s813_s3 + $0x8] sm:$0xff] %v562_v34   ;;  %598 = vst [vmem:[%s813_s3 + $0x28] sm:$0xff] %v582_v35   ;;  %v463_v19 = vmul.f32 %v346_v32, %v346_v32 }
  0xfd   :  { %558 = vst [vmem:[%s813_s3] sm:$0xff] %v557_v36   ;;  %v434_v41 = vadd.f32 %v433_v37, %v339_v26  ;;  %v470_v42 = vadd.f32 %v455_v38, %v454_v33  ;;  %v639_v43 = vpop.f32.mrb[4].mxu0  ;;  %597 = vst [vmem:[%s813_s3 + $0x20] sm:$0xff] %v577_v39   ;;  %v647_v44 = vpop.f32.mrb[4].mxu1 }
  0xfe   :  { %v232_v45 = vpop.f32.mrb[5].mxu0  ;;  %v351_v46 = vadd.f32 %v647_v44, %v521_v16  ;;  %v264_v47 = vpop.f32.mrb[5].mxu1  ;;  %v343_v54 = vadd.f32 %v639_v43, %v521_v16 }
  0xff   :  { %v471_v49 = vadd.f32 %v470_v42, %v456_v40  ;;  %v341_v50 = vadd.f32 %v521_v16, %v232_v45  ;;  %v435_v51 = vadd.f32 %v434_v41, %v340_v27  ;;  %v640_v52 = vpop.f32.mrb[6].mxu0  ;;  %v648_v53 = vpop.f32.mrb[6].mxu1  ;;  %v349_v0 = vadd.f32 %v521_v16, %v264_v47 }
 0x100   :  { %v344_v55 = vadd.f32 %v640_v52, %v521_v16  ;;  %v235_v56 = vpop.f32.mrb[7].mxu0  ;;  %v352_v57 = vadd.f32 %v648_v53, %v521_v16  ;;  %v267_v58 = vpop.f32.mrb[7].mxu1  ;;  %v460_v7 = vmul.f32 %v343_v54, %v343_v54  ;;  %v468_v35 = vmul.f32 %v351_v46, %v351_v46 }
 0x101   :  { %v436_v59 = vadd.f32 %v435_v51, %v341_v50  ;;  %v458_v60 = vmul.f32 %v341_v50, %v341_v50  ;;  %v472_v61 = vadd.f32 %v471_v49, %v457_v48  ;;  %v342_v62 = vadd.f32 %v521_v16, %v235_v56 }
 0x102   :  { %v572_v63 = vpack.c.bf16 %v344_v55, %v343_v54  ;;  %v592_v1 = vpack.c.bf16 %v352_v57, %v351_v46  ;;  %v350_v6 = vadd.f32 %v521_v16, %v267_v58  ;;  %v461_v11 = vmul.f32 %v344_v55, %v344_v55 }
 0x103   :  { %v473_v2 = vadd.f32 %v472_v61, %v458_v60  ;;  %v567_v3 = vpack.c.bf16 %v342_v62, %v341_v50  ;;  %v437_v4 = vadd.f32 %v436_v59, %v342_v62  ;;  %v459_v5 = vmul.f32 %v342_v62, %v342_v62 }
 0x104   :  { %596 = vst [vmem:[%s813_s3 + $0x18] sm:$0xff] %v572_v63   ;;  %600 = vst [vmem:[%s813_s3 + $0x38] sm:$0xff] %v592_v1   ;;  %v587_v10 = vpack.c.bf16 %v350_v6, %v349_v0  ;;  %v466_v28 = vmul.f32 %v349_v0, %v349_v0  ;;  %v467_v34 = vmul.f32 %v350_v6, %v350_v6 }
 0x105   :  { %595 = vst [vmem:[%s813_s3 + $0x10] sm:$0xff] %v567_v3   ;;  %v438_v8 = vadd.f32 %v437_v4, %v343_v54  ;;  %v474_v9 = vadd.f32 %v473_v2, %v459_v5  ;;  %v469_v37 = vmul.f32 %v352_v57, %v352_v57 }
 0x106   :  { %599 = vst [vmem:[%s813_s3 + $0x30] sm:$0xff] %v587_v10  }
 0x107   :  { %v475_v12 = vadd.f32 %v474_v9, %v460_v7  ;;  %v439_v13 = vadd.f32 %v438_v8, %v344_v55 }
 0x109   :  { %v440_v15 = vadd.f32 %v439_v13, %v764_v24  ;;  %v476_v16 = vadd.f32 %v475_v12, %v461_v11 }
 0x10b   :  { %v477_v17 = vadd.f32 %v476_v16, %v462_v14  ;;  %v441_v18 = vadd.f32 %v440_v15, %v346_v32 }
 0x10d   :  { %v442_v22 = vadd.f32 %v441_v18, %v762_v20  ;;  %v478_v23 = vadd.f32 %v477_v17, %v463_v19 }
 0x10f   :  { %v479_v26 = vadd.f32 %v478_v23, %v464_v21  ;;  %v443_v27 = vadd.f32 %v442_v22, %v766_v29 }
 0x111   :  { %v444_v30 = vadd.f32 %v443_v27, %v349_v0  ;;  %v480_v31 = vadd.f32 %v479_v26, %v465_v25 }
 0x113   :  { %v481_v24 = vadd.f32 %v480_v31, %v466_v28  ;;  %v445_v33 = vadd.f32 %v444_v30, %v350_v6 }
 0x115   :  { %v446_v32 = vadd.f32 %v445_v33, %v351_v46  ;;  %v482_v36 = vadd.f32 %v481_v24, %v467_v34 }
 0x117   :  { %v447_v38 = vadd.f32 %v446_v32, %v352_v57  ;;  %v483_v39 = vadd.f32 %v482_v36, %v468_v35 }
 0x119   :  { %v448_v20 = vrot.slane %v447_v38, 4  ;;  %v484_v40 = vadd.f32 %v483_v39, %v469_v37 }
 0x11b   :  { %v449_v41 = vadd.f32 %v448_v20, %v447_v38  ;;  %v485_v42 = vrot.slane %v484_v40, 4 }
 0x11d   :  { %v450_v43 = vrot.slane %v449_v41, 2  ;;  %v486_v44 = vadd.f32 %v485_v42, %v484_v40 }
 0x11f   :  { %v451_v45 = vadd.f32 %v450_v43, %v449_v41  ;;  %v487_v29 = vrot.slane %v486_v44, 2 }
 0x121   :  { %v452_v47 = vrot.slane %v451_v45, 1  ;;  %v488_v48 = vadd.f32 %v487_v29, %v486_v44 }
 0x123   :  { %v453_v49 = vadd.f32 %v452_v47, %v451_v45  ;;  %v489_v50 = vrot.slane %v488_v48, 1 }
 0x125   :  { %v490_v51 = vadd.f32 %v489_v50, %v488_v48  ;;  %491 = vst [vmem:[%s814_s4] sm:$0xff] %v453_v49 }
 0x127   :  { %492 = vst [vmem:[%s815_s5] sm:$0xff] %v490_v51 }

// kernel: _lambda_.19
= control target key start
LH: loop header
LB: loop body
LE: loop exit
PB: predicated region body
PF: predicated region fallthrough
CT: control target
= control target key end

     0   :  { %s455_s0 = inlined_call_operand.vmem [shape: bf16[128,128], index: 0, kind: input, shape index: {}]   ;;  %s456_s1 = inlined_call_operand.vmem [shape: f32[1,128], index: 1, kind: input, shape index: {}]   ;;  %s457_s2 = inlined_call_operand.vmem [shape: f32[1,128], index: 2, kind: input, shape index: {}]   ;;  %s458_s3 = inlined_call_operand.vmem [shape: bf16[128,128], index: 3, kind: output, shape index: {}]  }
   0x1   :  { %v259_v0 = vld [vmem:[%s455_s0] sm:$0xff]   ;;  %v330_v4 = vld [vmem:[%s455_s0 + $0x8] sm:$0xff]   ;;  %v331_v5 = vld [vmem:[%s455_s0 + $0x10] sm:$0xff]  }
   0x2   :  { %v370_v1 = vld [vmem:[%s456_s1] ss:$0 sm:$0xff]  ;;  %v260_v2 = vunpack.c.l.bf16 %v259_v0  ;;  %v261_v3 = vunpack.c.h.bf16 %v259_v0  ;;  %v332_v6 = vld [vmem:[%s455_s0 + $0x18] sm:$0xff]   ;;  %v264_v8 = vunpack.c.l.bf16 %v330_v4  ;;  %v265_v9 = vunpack.c.h.bf16 %v330_v4  ;;  %v334_v35 = vld [vmem:[%s455_s0 + $0x28] sm:$0xff]  }
   0x3   :  { %v384_v7 = vld [vmem:[%s457_s2] ss:$0 sm:$0xff]  ;;  %v268_v10 = vunpack.c.l.bf16 %v331_v5  ;;  %v269_v11 = vunpack.c.h.bf16 %v331_v5  ;;  %v272_v14 = vunpack.c.l.bf16 %v332_v6  ;;  %v273_v15 = vunpack.c.h.bf16 %v332_v6  ;;  %v335_v48 = vld [vmem:[%s455_s0 + $0x30] sm:$0xff]   ;;  %v336_v4 = vld [vmem:[%s455_s0 + $0x38] sm:$0xff]  }
   0x4   :  { %v53_v12 = vmul.f32 %v260_v2, %v370_v1  ;;  %v54_v13 = vmul.f32 %v261_v3, %v370_v1  ;;  %v55_v16 = vmul.f32 %v264_v8, %v370_v1  ;;  %v56_v17 = vmul.f32 %v265_v9, %v370_v1  ;;  %v333_v34 = vld [vmem:[%s455_s0 + $0x20] sm:$0xff]  }
   0x5   :  { %v57_v18 = vmul.f32 %v268_v10, %v370_v1  ;;  %v58_v19 = vmul.f32 %v269_v11, %v370_v1  ;;  %v59_v22 = vmul.f32 %v272_v14, %v370_v1  ;;  %v60_v23 = vmul.f32 %v273_v15, %v370_v1 }
   0x6   :  { %v76_v20 = vadd.f32 %v384_v7, %v53_v12  ;;  %v77_v21 = vadd.f32 %v384_v7, %v54_v13  ;;  %v78_v24 = vadd.f32 %v384_v7, %v55_v16  ;;  %v79_v25 = vadd.f32 %v384_v7, %v56_v17 }
   0x7   :  { %v80_v26 = vadd.f32 %v384_v7, %v57_v18  ;;  %v81_v27 = vadd.f32 %v384_v7, %v58_v19  ;;  %v82_v42 = vadd.f32 %v384_v7, %v59_v22  ;;  %v83_v43 = vadd.f32 %v384_v7, %v60_v23 }
   0x8   :  { %vm92_vm0 = vcmp.ge.f32.partialorder %v76_v20, 0.0  ;;  %vm93_vm1 = vcmp.ge.f32.partialorder %v77_v21, 0.0  ;;  %v108_v28 = vmul.f32 0.2, %v76_v20  ;;  %v109_v29 = vmul.f32 0.2, %v77_v21 }
   0x9   :  { %vm94_vm2 = vcmp.ge.f32.partialorder %v78_v24, 0.0  ;;  %vm95_vm3 = vcmp.ge.f32.partialorder %v79_v25, 0.0  ;;  %v110_v30 = vmul.f32 0.2, %v78_v24  ;;  %v111_v31 = vmul.f32 0.2, %v79_v25 }
   0xa   :  { %v124_v32 = vsel %vm92_vm0, %v76_v20, %v108_v28  ;;  %v125_v33 = vsel %vm93_vm1, %v77_v21, %v109_v29  ;;  %vm96_vm4 = vcmp.ge.f32.partialorder %v80_v26, 0.0  ;;  %vm97_vm5 = vcmp.ge.f32.partialorder %v81_v27, 0.0 }
   0xb   :  { %v293_v36 = vpack.c.bf16 %v125_v33, %v124_v32  ;;  %v126_v37 = vsel %vm94_vm2, %v78_v24, %v110_v30  ;;  %v127_v38 = vsel %vm95_vm3, %v79_v25, %v111_v31  ;;  %v112_v39 = vmul.f32 0.2, %v80_v26 }
   0xc   :  { %v298_v40 = vpack.c.bf16 %v127_v38, %v126_v37  ;;  %v113_v41 = vmul.f32 0.2, %v81_v27  ;;  %v276_v45 = vunpack.c.l.bf16 %v333_v34  ;;  %v277_v46 = vunpack.c.h.bf16 %v333_v34 }
   0xd   :  { %294 = vst [vmem:[%s458_s3] sm:$0xff] %v293_v36   ;;  %v128_v44 = vsel %vm96_vm4, %v80_v26, %v112_v39  ;;  %v280_v47 = vunpack.c.l.bf16 %v334_v35  ;;  %vm98_vm6 = vcmp.ge.f32.partialorder %v82_v42, 0.0  ;;  %vm99_vm7 = vcmp.ge.f32.partialorder %v83_v43, 0.0 }
   0xe   :  { %337 = vst [vmem:[%s458_s3 + $0x8] sm:$0xff] %v298_v40   ;;  %v129_v49 = vsel %vm97_vm5, %v81_v27, %v113_v41  ;;  %v114_v50 = vmul.f32 0.2, %v82_v42  ;;  %v115_v52 = vmul.f32 0.2, %v83_v43  ;;  %v61_v53 = vmul.f32 %v276_v45, %v370_v1 }
   0xf   :  { %v303_v51 = vpack.c.bf16 %v129_v49, %v128_v44  ;;  %v62_v54 = vmul.f32 %v277_v46, %v370_v1  ;;  %v281_v56 = vunpack.c.h.bf16 %v334_v35  ;;  %v63_v57 = vmul.f32 %v280_v47, %v370_v1 }
  0x10   :  { %v130_v55 = vsel %vm98_vm6, %v82_v42, %v114_v50  ;;  %v284_v58 = vunpack.c.l.bf16 %v335_v48  ;;  %v131_v59 = vsel %vm99_vm7, %v83_v43, %v115_v52  ;;  %v84_v60 = vadd.f32 %v384_v7, %v61_v53 }
  0x11   :  { %338 = vst [vmem:[%s458_s3 + $0x10] sm:$0xff] %v303_v51   ;;  %v85_v61 = vadd.f32 %v384_v7, %v62_v54  ;;  %v285_v62 = vunpack.c.h.bf16 %v335_v48  ;;  %v308_v63 = vpack.c.bf16 %v131_v59, %v130_v55  ;;  %v64_v0 = vmul.f32 %v281_v56, %v370_v1 }
  0x12   :  { %v86_v2 = vadd.f32 %v384_v7, %v63_v57  ;;  %v65_v3 = vmul.f32 %v284_v58, %v370_v1  ;;  %vm100_vm8 = vcmp.ge.f32.partialorder %v84_v60, 0.0  ;;  %v116_v5 = vmul.f32 0.2, %v84_v60 }
  0x13   :  { %vm101_vm9 = vcmp.ge.f32.partialorder %v85_v61, 0.0  ;;  %v117_v6 = vmul.f32 0.2, %v85_v61  ;;  %339 = vst [vmem:[%s458_s3 + $0x18] sm:$0xff] %v308_v63   ;;  %v87_v8 = vadd.f32 %v384_v7, %v64_v0  ;;  %v66_v10 = vmul.f32 %v285_v62, %v370_v1 }
  0x14   :  { %vm102_vm10 = vcmp.ge.f32.partialorder %v86_v2, 0.0  ;;  %v118_v9 = vmul.f32 0.2, %v86_v2  ;;  %v132_v11 = vsel %vm100_vm8, %v84_v60, %v116_v5  ;;  %v88_v13 = vadd.f32 %v384_v7, %v65_v3 }
  0x15   :  { %v133_v12 = vsel %vm101_vm9, %v85_v61, %v117_v6  ;;  %v288_v14 = vunpack.c.l.bf16 %v336_v4  ;;  %vm103_vm11 = vcmp.ge.f32.partialorder %v87_v8, 0.0  ;;  %v119_v16 = vmul.f32 0.2, %v87_v8 }
  0x16   :  { %v313_v15 = vpack.c.bf16 %v133_v12, %v132_v11  ;;  %v134_v17 = vsel %vm102_vm10, %v86_v2, %v118_v9  ;;  %v89_v18 = vadd.f32 %v384_v7, %v66_v10  ;;  %vm104_vm12 = vcmp.ge.f32.partialorder %v88_v13, 0.0 }
  0x17   :  { %v120_v19 = vmul.f32 0.2, %v88_v13  ;;  %v289_v20 = vunpack.c.h.bf16 %v336_v4  ;;  %v135_v21 = vsel %vm103_vm11, %v87_v8, %v119_v16  ;;  %v67_v22 = vmul.f32 %v288_v14, %v370_v1 }
  0x18   :  { %340 = vst [vmem:[%s458_s3 + $0x20] sm:$0xff] %v313_v15   ;;  %v318_v23 = vpack.c.bf16 %v135_v21, %v134_v17  ;;  %vm105_vm13 = vcmp.ge.f32.partialorder %v89_v18, 0.0  ;;  %v121_v24 = vmul.f32 0.2, %v89_v18 }
  0x19   :  { %v136_v25 = vsel %vm104_vm12, %v88_v13, %v120_v19  ;;  %v68_v26 = vmul.f32 %v289_v20, %v370_v1  ;;  %v90_v27 = vadd.f32 %v384_v7, %v67_v22 }
  0x1a   :  { %341 = vst [vmem:[%s458_s3 + $0x28] sm:$0xff] %v318_v23   ;;  %v137_v28 = vsel %vm105_vm13, %v89_v18, %v121_v24 }
  0x1b   :  { %v323_v29 = vpack.c.bf16 %v137_v28, %v136_v25  ;;  %v91_v30 = vadd.f32 %v384_v7, %v68_v26  ;;  %vm106_vm14 = vcmp.ge.f32.partialorder %v90_v27, 0.0  ;;  %v122_v31 = vmul.f32 0.2, %v90_v27 }
  0x1d   :  { %342 = vst [vmem:[%s458_s3 + $0x30] sm:$0xff] %v323_v29   ;;  %vm107_vm15 = vcmp.ge.f32.partialorder %v91_v30, 0.0  ;;  %v123_v32 = vmul.f32 0.2, %v91_v30  ;;  %v138_v33 = vsel %vm106_vm14, %v90_v27, %v122_v31 }
  0x1f   :  { %v139_v1 = vsel %vm107_vm15, %v91_v30, %v123_v32 }
  0x20   :  { %v328_v34 = vpack.c.bf16 %v139_v1, %v138_v33 }
  0x22   :  { %343 = vst [vmem:[%s458_s3 + $0x38] sm:$0xff] %v328_v34  }

// kernel: _lambda_.20
= control target key start
LH: loop header
LB: loop body
LE: loop exit
PB: predicated region body
PF: predicated region fallthrough
CT: control target
= control target key end

     0   :  { %s524_s1 = inlined_call_operand.vmem [shape: bf16[1,256,128], index: 1, kind: input, shape index: {}]   ;;  %s525_s0 = inlined_call_operand.vmem [shape: bf16[1,32,256], index: 0, kind: input, shape index: {}]   ;;  %s526_s2 = inlined_call_operand.vmem [shape: f32[1,128], index: 2, kind: input, shape index: {}]   ;;  %s527_s3 = inlined_call_operand.vmem [shape: bf16[1,32,128], index: 3, kind: output, shape index: {0}]   ;;  %s528_s4 = inlined_call_operand.vmem [shape: f32[1,8,128], index: 4, kind: output, shape index: {1}]   ;;  %s529_s5 = inlined_call_operand.vmem [shape: f32[1,8,128], index: 5, kind: output, shape index: {2}]  }
   0x1   :  { %v397_v0 = vld [vmem:[%s524_s1 + $0x40] sm:$0xff]   ;;  %v399_v2 = vld [vmem:[%s524_s1 + $0x48] sm:$0xff]   ;;  %v401_v4 = vld [vmem:[%s524_s1 + $0x50] sm:$0xff]  }
   0x2   :  { %v398_v1 = vld [vmem:[%s524_s1] sm:$0xff]   ;;  %353 = vmatprep.subr.bf16.mxu0 %v397_v0  ;;  %381 = vmatprep.subr.bf16.mxu1 %v397_v0  ;;  %v400_v3 = vld [vmem:[%s524_s1 + $0x8] sm:$0xff]   ;;  %v402_v5 = vld [vmem:[%s524_s1 + $0x10] sm:$0xff]  }
   0x3   :  { %354 = vmatpush3.bf16.msra.mxu0 %v398_v1  ;;  %389 = vmatpush3.bf16.msra.mxu1 %v398_v1  ;;  %v403_v6 = vld [vmem:[%s524_s1 + $0x58] sm:$0xff]   ;;  %v405_v8 = vld [vmem:[%s524_s1 + $0x60] sm:$0xff]   ;;  %v407_v10 = vld [vmem:[%s524_s1 + $0x68] sm:$0xff]  }
   0x4   :  { %355 = vmatprep.subr.bf16.mxu0 %v399_v2  ;;  %382 = vmatprep.subr.bf16.mxu1 %v399_v2  ;;  %v404_v7 = vld [vmem:[%s524_s1 + $0x18] sm:$0xff]   ;;  %v406_v9 = vld [vmem:[%s524_s1 + $0x20] sm:$0xff]   ;;  %v408_v13 = vld [vmem:[%s524_s1 + $0x28] sm:$0xff]  }
   0x5   :  { %v415_v11 = vld [vmem:[%s525_s0 + $0x4] ss:$8 sps:$4 sm:$0xff]   ;;  %v418_v12 = vld [vmem:[%s525_s0 + $0x14] ss:$8 sps:$4 sm:$0xff]   ;;  %v413_v18 = vld [vmem:[%s525_s0] ss:$8 sps:$4 sm:$0xff]  }
   0x6   :  { %v409_v14 = vld [vmem:[%s524_s1 + $0x70] sm:$0xff]   ;;  %214 = vmatprep.mubr.bf16.mxu0 %v415_v11  ;;  %222 = vmatprep.mubr.bf16.mxu1 %v418_v12  ;;  %v411_v16 = vld [vmem:[%s524_s1 + $0x78] sm:$0xff]   ;;  %v333_v23 = vld [vmem:[%s526_s2] ss:$0 sm:$0xff] }
   0x7   :  { %356 = vmatpush3.bf16.msra.mxu0 %v400_v3  ;;  %390 = vmatpush3.bf16.msra.mxu1 %v400_v3  ;;  %v410_v15 = vld [vmem:[%s524_s1 + $0x30] sm:$0xff]   ;;  %v412_v17 = vld [vmem:[%s524_s1 + $0x38] sm:$0xff]  }
   0x8   :  { %357 = vmatprep.subr.bf16.mxu0 %v401_v4  ;;  %383 = vmatprep.subr.bf16.mxu1 %v401_v4  ;;  %v416_v19 = vld [vmem:[%s525_s0 + $0x10] ss:$8 sps:$4 sm:$0xff]  }
   0xb   :  { %358 = vmatpush3.bf16.msra.mxu0 %v402_v5  ;;  %391 = vmatpush3.bf16.msra.mxu1 %v402_v5 }
   0xc   :  { %359 = vmatprep.subr.bf16.mxu0 %v403_v6  ;;  %384 = vmatprep.subr.bf16.mxu1 %v403_v6 }
   0xf   :  { %360 = vmatpush3.bf16.msra.mxu0 %v404_v7  ;;  %392 = vmatpush3.bf16.msra.mxu1 %v404_v7 }
  0x10   :  { %361 = vmatprep.subr.bf16.mxu0 %v405_v8  ;;  %385 = vmatprep.subr.bf16.mxu1 %v405_v8 }
  0x13   :  { %362 = vmatpush3.bf16.msra.mxu0 %v406_v9  ;;  %393 = vmatpush3.bf16.msra.mxu1 %v406_v9 }
  0x14   :  { %363 = vmatprep.subr.bf16.mxu0 %v407_v10  ;;  %386 = vmatprep.subr.bf16.mxu1 %v407_v10 }
  0x17   :  { %364 = vmatpush3.bf16.msra.mxu0 %v408_v13  ;;  %394 = vmatpush3.bf16.msra.mxu1 %v408_v13 }
  0x18   :  { %365 = vmatprep.subr.bf16.mxu0 %v409_v14  ;;  %387 = vmatprep.subr.bf16.mxu1 %v409_v14 }
  0x1b   :  { %366 = vmatpush3.bf16.msra.mxu0 %v410_v15  ;;  %395 = vmatpush3.bf16.msra.mxu1 %v410_v15 }
  0x1c   :  { %367 = vmatprep.subr.bf16.mxu0 %v411_v16  ;;  %388 = vmatprep.subr.bf16.mxu1 %v411_v16 }
  0x1f   :  { %368 = vmatpush3.bf16.msra.mxu0 %v412_v17  ;;  %396 = vmatpush3.bf16.msra.mxu1 %v412_v17 }
  0x22   :  { %215 = vmatmul.mubr.bf16.vlgmr.msra.gmra.mrb[0].mxu0 %v413_v18  ;;  %223 = vmatmul.mubr.bf16.vlgmr.msra.gmra.mrb[0].mxu1 %v416_v19 }
  0xf5   :  { %v369_v20 = vpop.f32.mrb[0].mxu0  ;;  %v375_v21 = vpop.f32.mrb[0].mxu1 }
  0xf6   :  { %v370_v22 = vpop.f32.mrb[1].mxu0  ;;  %v376_v24 = vpop.f32.mrb[1].mxu1 }
  0xf7   :  { %v371_v25 = vadd.f32 %v370_v22, %v369_v20  ;;  %v372_v26 = vpop.f32.mrb[2].mxu0  ;;  %v377_v27 = vadd.f32 %v376_v24, %v375_v21  ;;  %v378_v28 = vpop.f32.mrb[2].mxu1 }
  0xf8   :  { %v373_v29 = vpop.f32.mrb[3].mxu0  ;;  %v379_v30 = vpop.f32.mrb[3].mxu1 }
  0xf9   :  { %v253_v31 = vadd.f32 %v371_v25, %v333_v23  ;;  %v255_v32 = vadd.f32 %v377_v27, %v333_v23  ;;  %v374_v33 = vadd.f32 %v373_v29, %v372_v26  ;;  %v380_v34 = vadd.f32 %v379_v30, %v378_v28 }
  0xfb   :  { %v254_v35 = vadd.f32 %v374_v33, %v333_v23  ;;  %v256_v36 = vadd.f32 %v380_v34, %v333_v23  ;;  %v286_v37 = vmul.f32 %v253_v31, %v253_v31  ;;  %v288_v38 = vmul.f32 %v255_v32, %v255_v32 }
  0xfd   :  { %v345_v39 = vpack.c.bf16 %v254_v35, %v253_v31  ;;  %v277_v40 = vadd.f32 %v254_v35, %v253_v31  ;;  %v287_v41 = vmul.f32 %v254_v35, %v254_v35  ;;  %v350_v42 = vpack.c.bf16 %v256_v36, %v255_v32 }
  0xfe   :  { %v289_v46 = vmul.f32 %v256_v36, %v256_v36 }
  0xff   :  { %346 = vst [vmem:[%s527_s3] sm:$0xff] %v345_v39   ;;  %v290_v43 = vadd.f32 %v287_v41, %v286_v37  ;;  %352 = vst [vmem:[%s527_s3 + $0x8] sm:$0xff] %v350_v42   ;;  %v278_v44 = vadd.f32 %v277_v40, %v255_v32 }
 0x101   :  { %v279_v45 = vadd.f32 %v278_v44, %v256_v36  ;;  %v291_v47 = vadd.f32 %v290_v43, %v288_v38 }
 0x103   :  { %v280_v48 = vrot.slane %v279_v45, 4  ;;  %v292_v49 = vadd.f32 %v291_v47, %v289_v46 }
 0x105   :  { %v281_v50 = vadd.f32 %v280_v48, %v279_v45  ;;  %v293_v51 = vrot.slane %v292_v49, 4 }
 0x107   :  { %v282_v52 = vrot.slane %v281_v50, 2  ;;  %v294_v53 = vadd.f32 %v293_v51, %v292_v49 }
 0x109   :  { %v283_v54 = vadd.f32 %v282_v52, %v281_v50  ;;  %v295_v55 = vrot.slane %v294_v53, 2 }
 0x10b   :  { %v284_v56 = vrot.slane %v283_v54, 1  ;;  %v296_v57 = vadd.f32 %v295_v55, %v294_v53 }
 0x10d   :  { %v285_v58 = vadd.f32 %v284_v56, %v283_v54  ;;  %v297_v59 = vrot.slane %v296_v57, 1 }
 0x10f   :  { %v298_v60 = vadd.f32 %v297_v59, %v296_v57  ;;  %299 = vst [vmem:[%s528_s4] sm:$0xff] %v285_v58 }
 0x111   :  { %300 = vst [vmem:[%s529_s5] sm:$0xff] %v298_v60 }

// kernel: _lambda_.21
= control target key start
LH: loop header
LB: loop body
LE: loop exit
PB: predicated region body
PF: predicated region fallthrough
CT: control target
= control target key end

     0   :  { %s148_s0 = inlined_call_operand.vmem [shape: bf16[32,128], index: 0, kind: input, shape index: {}]   ;;  %s149_s1 = inlined_call_operand.vmem [shape: f32[1,128], index: 1, kind: input, shape index: {}]   ;;  %s150_s2 = inlined_call_operand.vmem [shape: f32[1,128], index: 2, kind: input, shape index: {}]   ;;  %s151_s3 = inlined_call_operand.vmem [shape: bf16[32,128], index: 3, kind: output, shape index: {}]  }
   0x1   :  { %v91_v0 = vld [vmem:[%s148_s0] sm:$0xff]   ;;  %v108_v4 = vld [vmem:[%s148_s0 + $0x8] sm:$0xff]  }
   0x2   :  { %v80_v1 = vld [vmem:[%s149_s1] ss:$0 sm:$0xff]  ;;  %v92_v2 = vunpack.c.l.bf16 %v91_v0  ;;  %v93_v3 = vunpack.c.h.bf16 %v91_v0  ;;  %v96_v6 = vunpack.c.l.bf16 %v108_v4  ;;  %v97_v7 = vunpack.c.h.bf16 %v108_v4 }
   0x3   :  { %v81_v5 = vld [vmem:[%s150_s2] ss:$0 sm:$0xff] }
   0x4   :  { %v29_v8 = vmul.f32 %v92_v2, %v80_v1  ;;  %v30_v9 = vmul.f32 %v93_v3, %v80_v1  ;;  %v31_v10 = vmul.f32 %v96_v6, %v80_v1  ;;  %v32_v11 = vmul.f32 %v97_v7, %v80_v1 }
   0x6   :  { %v40_v12 = vadd.f32 %v81_v5, %v29_v8  ;;  %v41_v13 = vadd.f32 %v81_v5, %v30_v9  ;;  %v42_v14 = vadd.f32 %v81_v5, %v31_v10  ;;  %v43_v15 = vadd.f32 %v81_v5, %v32_v11 }
   0x8   :  { %vm44_vm0 = vcmp.ge.f32.partialorder %v40_v12, 0.0  ;;  %vm45_vm1 = vcmp.ge.f32.partialorder %v41_v13, 0.0  ;;  %v48_v16 = vmul.f32 0.2, %v40_v12  ;;  %v49_v17 = vmul.f32 0.2, %v41_v13 }
   0x9   :  { %vm46_vm2 = vcmp.ge.f32.partialorder %v42_v14, 0.0  ;;  %vm47_vm3 = vcmp.ge.f32.partialorder %v43_v15, 0.0  ;;  %v50_v18 = vmul.f32 0.2, %v42_v14  ;;  %v51_v19 = vmul.f32 0.2, %v43_v15 }
   0xa   :  { %v52_v20 = vsel %vm44_vm0, %v40_v12, %v48_v16  ;;  %v53_v21 = vsel %vm45_vm1, %v41_v13, %v49_v17 }
   0xb   :  { %v101_v22 = vpack.c.bf16 %v53_v21, %v52_v20  ;;  %v54_v23 = vsel %vm46_vm2, %v42_v14, %v50_v18  ;;  %v55_v24 = vsel %vm47_vm3, %v43_v15, %v51_v19 }
   0xc   :  { %v106_v25 = vpack.c.bf16 %v55_v24, %v54_v23 }
   0xd   :  { %102 = vst [vmem:[%s151_s3] sm:$0xff] %v101_v22  }
   0xe   :  { %109 = vst [vmem:[%s151_s3 + $0x8] sm:$0xff] %v106_v25  }

// kernel: _lambda_.22
= control target key start
LH: loop header
LB: loop body
LE: loop exit
PB: predicated region body
PF: predicated region fallthrough
CT: control target
= control target key end

     0   :  { %s724_s1 = inlined_call_operand.vmem [shape: bf16[1,512,128], index: 1, kind: input, shape index: {}]   ;;  %s725_s0 = inlined_call_operand.vmem [shape: bf16[1,16,512], index: 0, kind: input, shape index: {}]   ;;  %s726_s2 = inlined_call_operand.vmem [shape: f32[1,128], index: 2, kind: input, shape index: {}]   ;;  %s727_s3 = inlined_call_operand.vmem [shape: bf16[1,16,128], index: 3, kind: output, shape index: {0}]   ;;  %s728_s4 = inlined_call_operand.vmem [shape: f32[1,8,128], index: 4, kind: output, shape index: {1}]   ;;  %s729_s5 = inlined_call_operand.vmem [shape: f32[1,8,128], index: 5, kind: output, shape index: {2}]  }
   0x1   :  { %v536_v0 = vld [vmem:[%s724_s1 + $0x40] sm:$0xff]   ;;  %v540_v4 = vld [vmem:[%s724_s1 + $0x48] sm:$0xff]   ;;  %v544_v8 = vld [vmem:[%s724_s1 + $0x50] sm:$0xff]  }
   0x2   :  { %v537_v1 = vld [vmem:[%s724_s1 + $0xc0] sm:$0xff]   ;;  %492 = vmatprep.subr.bf16.mxu0 %v536_v0  ;;  %v541_v5 = vld [vmem:[%s724_s1 + $0xc8] sm:$0xff]   ;;  %v545_v9 = vld [vmem:[%s724_s1 + $0xd0] sm:$0xff]  }
   0x3   :  { %v538_v2 = vld [vmem:[%s724_s1] sm:$0xff]   ;;  %514 = vmatprep.subr.bf16.mxu1 %v537_v1  ;;  %v542_v6 = vld [vmem:[%s724_s1 + $0x8] sm:$0xff]   ;;  %v546_v10 = vld [vmem:[%s724_s1 + $0x10] sm:$0xff]  }
   0x4   :  { %v539_v3 = vld [vmem:[%s724_s1 + $0x80] sm:$0xff]   ;;  %493 = vmatpush3.bf16.msra.mxu0 %v538_v2  ;;  %v543_v7 = vld [vmem:[%s724_s1 + $0x88] sm:$0xff]   ;;  %v547_v11 = vld [vmem:[%s724_s1 + $0x90] sm:$0xff]  }
   0x5   :  { %515 = vmatpush3.bf16.msra.mxu1 %v539_v3  ;;  %494 = vmatprep.subr.bf16.mxu0 %v540_v4  ;;  %v548_v12 = vld [vmem:[%s724_s1 + $0x58] sm:$0xff]   ;;  %v552_v16 = vld [vmem:[%s724_s1 + $0x60] sm:$0xff]   ;;  %v556_v20 = vld [vmem:[%s724_s1 + $0x68] sm:$0xff]  }
   0x6   :  { %516 = vmatprep.subr.bf16.mxu1 %v541_v5  ;;  %v549_v13 = vld [vmem:[%s724_s1 + $0xd8] sm:$0xff]   ;;  %v553_v17 = vld [vmem:[%s724_s1 + $0xe0] sm:$0xff]   ;;  %v557_v21 = vld [vmem:[%s724_s1 + $0xe8] sm:$0xff]  }
   0x7   :  { %v550_v14 = vld [vmem:[%s724_s1 + $0x18] sm:$0xff]   ;;  %v554_v18 = vld [vmem:[%s724_s1 + $0x20] sm:$0xff]   ;;  %v558_v22 = vld [vmem:[%s724_s1 + $0x28] sm:$0xff]  }
   0x8   :  { %495 = vmatpush3.bf16.msra.mxu0 %v542_v6  ;;  %v551_v15 = vld [vmem:[%s724_s1 + $0x98] sm:$0xff]   ;;  %v555_v19 = vld [vmem:[%s724_s1 + $0xa0] sm:$0xff]   ;;  %v559_v23 = vld [vmem:[%s724_s1 + $0xa8] sm:$0xff]  }
   0x9   :  { %517 = vmatpush3.bf16.msra.mxu1 %v543_v7  ;;  %496 = vmatprep.subr.bf16.mxu0 %v544_v8  ;;  %v560_v24 = vld [vmem:[%s724_s1 + $0x70] sm:$0xff]   ;;  %v564_v28 = vld [vmem:[%s724_s1 + $0x78] sm:$0xff]   ;;  %v482_v45 = vld [vmem:[%s726_s2] ss:$0 sm:$0xff] }
   0xa   :  { %518 = vmatprep.subr.bf16.mxu1 %v545_v9  ;;  %v561_v25 = vld [vmem:[%s724_s1 + $0xf0] sm:$0xff]   ;;  %v565_v29 = vld [vmem:[%s724_s1 + $0xf8] sm:$0xff]  }
   0xb   :  { %v562_v26 = vld [vmem:[%s724_s1 + $0x30] sm:$0xff]   ;;  %v566_v30 = vld [vmem:[%s724_s1 + $0x38] sm:$0xff]  }
   0xc   :  { %497 = vmatpush3.bf16.msra.mxu0 %v546_v10  ;;  %v563_v27 = vld [vmem:[%s724_s1 + $0xb0] sm:$0xff]   ;;  %v567_v31 = vld [vmem:[%s724_s1 + $0xb8] sm:$0xff]  }
   0xd   :  { %519 = vmatpush3.bf16.msra.mxu1 %v547_v11  ;;  %498 = vmatprep.subr.bf16.mxu0 %v548_v12  ;;  %v568_v32 = vld [vmem:[%s725_s0] ss:$16 sps:$4 sm:$0xff]   ;;  %v570_v33 = vld [vmem:[%s725_s0 + $0x4] ss:$16 sps:$4 sm:$0xff]   ;;  %v571_v34 = vld [vmem:[%s725_s0 + $0x8] ss:$16 sps:$4 sm:$0xff]  }
   0xe   :  { %520 = vmatprep.subr.bf16.mxu1 %v549_v13  ;;  %v573_v35 = vld [vmem:[%s725_s0 + $0xc] ss:$16 sps:$4 sm:$0xff]   ;;  %338 = vmatprep.mubr.bf16.mxu0 %v570_v33 }
   0xf   :  { %379 = vmatprep.mubr.bf16.mxu1 %v573_v35 }
  0x10   :  { %499 = vmatpush3.bf16.msra.mxu0 %v550_v14 }
  0x11   :  { %521 = vmatpush3.bf16.msra.mxu1 %v551_v15  ;;  %500 = vmatprep.subr.bf16.mxu0 %v552_v16 }
  0x12   :  { %522 = vmatprep.subr.bf16.mxu1 %v553_v17 }
  0x14   :  { %501 = vmatpush3.bf16.msra.mxu0 %v554_v18 }
  0x15   :  { %523 = vmatpush3.bf16.msra.mxu1 %v555_v19  ;;  %502 = vmatprep.subr.bf16.mxu0 %v556_v20 }
  0x16   :  { %524 = vmatprep.subr.bf16.mxu1 %v557_v21 }
  0x18   :  { %503 = vmatpush3.bf16.msra.mxu0 %v558_v22 }
  0x19   :  { %525 = vmatpush3.bf16.msra.mxu1 %v559_v23  ;;  %504 = vmatprep.subr.bf16.mxu0 %v560_v24 }
  0x1a   :  { %526 = vmatprep.subr.bf16.mxu1 %v561_v25 }
  0x1c   :  { %505 = vmatpush3.bf16.msra.mxu0 %v562_v26 }
  0x1d   :  { %527 = vmatpush3.bf16.msra.mxu1 %v563_v27  ;;  %506 = vmatprep.subr.bf16.mxu0 %v564_v28 }
  0x1e   :  { %528 = vmatprep.subr.bf16.mxu1 %v565_v29 }
  0x20   :  { %507 = vmatpush3.bf16.msra.mxu0 %v566_v30 }
  0x21   :  { %529 = vmatpush3.bf16.msra.mxu1 %v567_v31 }
  0x23   :  { %339 = vmatmul.mubr.bf16.vlgmr.msra.gmra.mrb[0].mxu0 %v568_v32 }
  0x24   :  { %380 = vmatmul.mubr.bf16.vlgmr.msra.gmra.mrb[0].mxu1 %v571_v34 }
  0xf6   :  { %v508_v36 = vpop.f32.mrb[0].mxu0 }
  0xf7   :  { %v530_v37 = vpop.f32.mrb[0].mxu1  ;;  %v509_v38 = vpop.f32.mrb[1].mxu0 }
  0xf8   :  { %v510_v39 = vadd.f32 %v509_v38, %v508_v36  ;;  %v531_v40 = vpop.f32.mrb[1].mxu1  ;;  %v511_v41 = vpop.f32.mrb[2].mxu0 }
  0xf9   :  { %v532_v42 = vadd.f32 %v531_v40, %v530_v37  ;;  %v533_v43 = vpop.f32.mrb[2].mxu1  ;;  %v512_v44 = vpop.f32.mrb[3].mxu0 }
  0xfa   :  { %v513_v46 = vadd.f32 %v512_v44, %v511_v41  ;;  %v534_v47 = vpop.f32.mrb[3].mxu1 }
  0xfb   :  { %v382_v48 = vadd.f32 %v532_v42, %v510_v39  ;;  %v535_v49 = vadd.f32 %v534_v47, %v533_v43 }
  0xfd   :  { %v404_v50 = vadd.f32 %v482_v45, %v382_v48  ;;  %v385_v51 = vadd.f32 %v535_v49, %v513_v46 }
  0xff   :  { %v405_v52 = vadd.f32 %v482_v45, %v385_v51  ;;  %v423_v53 = vmul.f32 %v404_v50, %v404_v50 }
 0x101   :  { %v490_v54 = vpack.c.bf16 %v405_v52, %v404_v50  ;;  %v416_v55 = vadd.f32 %v405_v52, %v404_v50  ;;  %v424_v56 = vmul.f32 %v405_v52, %v405_v52 }
 0x103   :  { %491 = vst [vmem:[%s727_s3] sm:$0xff] %v490_v54   ;;  %v417_v57 = vrot.slane %v416_v55, 4  ;;  %v425_v58 = vadd.f32 %v424_v56, %v423_v53 }
 0x105   :  { %v418_v59 = vadd.f32 %v417_v57, %v416_v55  ;;  %v426_v60 = vrot.slane %v425_v58, 4 }
 0x107   :  { %v419_v61 = vrot.slane %v418_v59, 2  ;;  %v427_v62 = vadd.f32 %v426_v60, %v425_v58 }
 0x109   :  { %v420_v63 = vadd.f32 %v419_v61, %v418_v59  ;;  %v428_v0 = vrot.slane %v427_v62, 2 }
 0x10b   :  { %v421_v1 = vrot.slane %v420_v63, 1  ;;  %v429_v2 = vadd.f32 %v428_v0, %v427_v62 }
 0x10d   :  { %v422_v3 = vadd.f32 %v421_v1, %v420_v63  ;;  %v430_v4 = vrot.slane %v429_v2, 1 }
 0x10f   :  { %v431_v5 = vadd.f32 %v430_v4, %v429_v2  ;;  %432 = vst [vmem:[%s728_s4] sm:$0xff] %v422_v3 }
 0x111   :  { %433 = vst [vmem:[%s729_s5] sm:$0xff] %v431_v5 }

// kernel: _lambda_.23
= control target key start
LH: loop header
LB: loop body
LE: loop exit
PB: predicated region body
PF: predicated region fallthrough
CT: control target
= control target key end

     0   :  { %s103_s0 = inlined_call_operand.vmem [shape: bf16[16,128], index: 0, kind: input, shape index: {}]   ;;  %s104_s1 = inlined_call_operand.vmem [shape: f32[1,128], index: 1, kind: input, shape index: {}]   ;;  %s105_s2 = inlined_call_operand.vmem [shape: f32[1,128], index: 2, kind: input, shape index: {}]   ;;  %s106_s3 = inlined_call_operand.vmem [shape: bf16[16,128], index: 3, kind: output, shape index: {}]  }
   0x1   :  { %v63_v0 = vld [vmem:[%s103_s0] sm:$0xff]  }
   0x2   :  { %v56_v1 = vld [vmem:[%s104_s1] ss:$0 sm:$0xff]  ;;  %v64_v2 = vunpack.c.l.bf16 %v63_v0  ;;  %v65_v3 = vunpack.c.h.bf16 %v63_v0 }
   0x3   :  { %v57_v4 = vld [vmem:[%s105_s2] ss:$0 sm:$0xff] }
   0x4   :  { %v25_v5 = vmul.f32 %v64_v2, %v56_v1  ;;  %v26_v6 = vmul.f32 %v65_v3, %v56_v1 }
   0x6   :  { %v34_v7 = vadd.f32 %v57_v4, %v25_v5  ;;  %v35_v8 = vadd.f32 %v57_v4, %v26_v6 }
   0x8   :  { %vm36_vm0 = vcmp.ge.f32.partialorder %v34_v7, 0.0  ;;  %vm37_vm1 = vcmp.ge.f32.partialorder %v35_v8, 0.0  ;;  %v38_v9 = vmul.f32 0.2, %v34_v7  ;;  %v39_v10 = vmul.f32 0.2, %v35_v8 }
   0xa   :  { %v40_v11 = vsel %vm36_vm0, %v34_v7, %v38_v9  ;;  %v41_v12 = vsel %vm37_vm1, %v35_v8, %v39_v10 }
   0xb   :  { %v69_v13 = vpack.c.bf16 %v41_v12, %v40_v11 }
   0xd   :  { %70 = vst [vmem:[%s106_s3] sm:$0xff] %v69_v13  }

// kernel: _lambda_.24
= control target key start
LH: loop header
LB: loop body
LE: loop exit
PB: predicated region body
PF: predicated region fallthrough
CT: control target
= control target key end

     0   :  { %s1102_s12 = smov 0   ;;  %s1104_s13 = smov 0   ;;  %s1215_s0 = inlined_call_operand.vmem [shape: bf16[1,16,1024], index: 0, kind: input, shape index: {}]   ;;  %s1216_s1 = inlined_call_operand.vmem [shape: bf16[1,1024,128], index: 1, kind: input, shape index: {}]   ;;  %s1217_s2 = inlined_call_operand.vmem [shape: f32[1,128], index: 2, kind: input, shape index: {}]   ;;  %s1218_s3 = inlined_call_operand.vmem [shape: bf16[1,16,128], index: 3, kind: output, shape index: {}]  }
   0x1   :  { %s1106_s14 = smov 0   ;;  %s1108_s15 = smov 0  }
   0x2   :  { %s1110_s16 = smov 0  }
   0x3 LB: > { %s28_s17 = sadd.s32 1, %s1075_s15  ;;  %p57_p1 = scmp.ne.s32.totalorder %s1067_s13, %s1063_s12  ;;  %s1079_s16 = sphi %s1110_s16, %s13_s16   ;;  %s1075_s15 = sphi %s1108_s15, %s1222_s15   ;;  %s1071_s14 = sphi %s1106_s14, %s1221_s14   ;;  %s1067_s13 = sphi %s1104_s13, %s1220_s13   ;;  %s1063_s12 = sphi %s1102_s12, %s1219_s12  }
   0x4   : > { %p29_p0 = scmp.ge.s32.totalorder %s28_s17, 2  ;;  %p58_p2 = scmp.eq.s32.totalorder %s1079_s16, 0 }
   0x5   : > { %s50_s19 = sadd.s32 1, %s1067_s13  ;;  %p857_p5 = scmp.ge.s32.totalorder %s1079_s16, 2 }
   0x6   : > { %s1224_s17 = smov (%p29_p0, %s28_s17), 0  ;;  %p59_p3 = por %p58_p2, %p57_p1 }
   0x7   : > { %s46_s18 = ssub.s32 %s1075_s15, %s1224_s17  ;;  %175 = sbr.rel (%p857_p5) target bundleno = 21 (0x15), region = 20 }
   0x8   : > { %p48_p4 = scmp.eq.s32.totalorder %s46_s18, 0 }
   0xa   : > { %s1137_s20 = scalar_select %p48_p4, %s1067_s13, %s50_s19  }
   0xe   : > { %178 = sbr.rel (!%p59_p3) target bundleno = 21 (0x15), region = 24  ;;  %s180_s21 = sand.u32 (%p59_p3), 1, %s1067_s13  }
   0xf   : > { %s910_s22 = sshll.u32 (%p59_p3), %s1075_s15, 4  ;;  %s858_s23 = sshll.u32 (%p59_p3), %s180_s21, 5 }
  0x10   : > { %s190_s26 = scalar_lea.vmem (%p59_p3), %s1215_s0, %s910_s22  ;;  %s182_s27 = scalar_lea.vmem (%p59_p3), [#allocation3], %s858_s23 }
  0x11   : > { %v203_v0 = vld [vmem:[%s190_s26] sm:$0xff] (%p59_p3)  ;;  %v205_v1 = vld [vmem:[%s190_s26 + $0x8] sm:$0xff] (%p59_p3) }
  0x12   : > { %v207_v2 = vld [vmem:[%s190_s26 + $0x20] sm:$0xff] (%p59_p3)  ;;  %204 = vst [vmem:[%s182_s27] sm:$0xff] (%p59_p3), %v203_v0  ;;  %206 = vst [vmem:[%s182_s27 + $0x8] sm:$0xff] (%p59_p3), %v205_v1  ;;  %v209_v3 = vld [vmem:[%s190_s26 + $0x28] sm:$0xff] (%p59_p3) }
  0x13   : > { %208 = vst [vmem:[%s182_s27 + $0x10] sm:$0xff] (%p59_p3), %v207_v2  ;;  %210 = vst [vmem:[%s182_s27 + $0x18] sm:$0xff] (%p59_p3), %v209_v3 }
  0x15 PF: > { %p861_p6 = scmp.ge.s32.totalorder %s1079_s16, 1  ;;  %p231_p7 = scmp.lt.s32.totalorder %s1079_s16, 3 }
  0x17   : > { %p232_p8 = pnand %p861_p6, %p231_p7 }
  0x18   : > { %s238_s28 = sand.u32 (!%p232_p8), 1, %s1063_s12   ;;  %s863_s29 = sshll.u32 (!%p232_p8), %s1071_s14, 6 }
  0x19   : > { %235 = sbr.rel (%p232_p8) target bundleno = 310 (0x136), region = 51  ;;  %s862_s30 = sshll.u32 (!%p232_p8), %s238_s28, 5 }
  0x1a   : > { %p288_p9 = scmp.lt.s32.totalorder (!%p232_p8), %s863_s29, 127  ;;  %s1154_s8 = scalar_lea.vmem (!%p232_p8), [#allocation3], %s862_s30 }
  0x1b   : > { %p865_p10 = scmp.ne.s32.totalorder (!%p232_p8), %s1071_s14, 0 }
  0x20   : > { %s1226_s29 = smov (!%p288_p9, %s863_s29), 127  ;;  %318 = sbr.rel (%p865_p10) target bundleno = 39 (0x27), region = 59 }
  0x21   : > { %s864_s4 = sshll.u32 %s1226_s29, 2  ;;  %v1081_v4 = vmov (!%p865_p10), 0.0  }
  0x22   : > { %s1152_s7 = scalar_lea.vmem %s1216_s1, %s864_s4  ;;  %319 = vst [vmem:[#allocation2] sm:$0xff] (!%p865_p10), %v1081_v4  ;;  %320 = vst [vmem:[#allocation2 + $0x8] sm:$0xff] (!%p865_p10), %v1081_v4 }
  0x27 PF: > { %v1003_v5 = vld [vmem:[%s1152_s7 + $0x40] sm:$0xff]   ;;  %v1007_v9 = vld [vmem:[%s1152_s7 + $0x48] sm:$0xff]   ;;  %v1011_v13 = vld [vmem:[%s1152_s7 + $0x50] sm:$0xff]   ;;  %p902_p11 = scmp.ne.s32.totalorder %s1071_s14, 1 }
  0x28   : > { %v1004_v6 = vld [vmem:[%s1152_s7 + $0xc0] sm:$0xff]   ;;  %918 = vmatprep.subr.bf16.mxu0 %v1003_v5  ;;  %v1008_v10 = vld [vmem:[%s1152_s7 + $0xc8] sm:$0xff]   ;;  %v1012_v14 = vld [vmem:[%s1152_s7 + $0xd0] sm:$0xff]  }
  0x29   : > { %v1005_v7 = vld [vmem:[%s1152_s7] sm:$0xff]   ;;  %940 = vmatprep.subr.bf16.mxu1 %v1004_v6  ;;  %v1009_v11 = vld [vmem:[%s1152_s7 + $0x8] sm:$0xff]   ;;  %v1013_v15 = vld [vmem:[%s1152_s7 + $0x10] sm:$0xff]  }
  0x2a   : > { %v1006_v8 = vld [vmem:[%s1152_s7 + $0x80] sm:$0xff]   ;;  %919 = vmatpush3.bf16.msra.mxu0 %v1005_v7  ;;  %v1010_v12 = vld [vmem:[%s1152_s7 + $0x88] sm:$0xff]   ;;  %v1014_v16 = vld [vmem:[%s1152_s7 + $0x90] sm:$0xff]  }
  0x2b   : > { %941 = vmatpush3.bf16.msra.mxu1 %v1006_v8  ;;  %920 = vmatprep.subr.bf16.mxu0 %v1007_v9  ;;  %v1015_v17 = vld [vmem:[%s1152_s7 + $0x58] sm:$0xff]   ;;  %v1019_v21 = vld [vmem:[%s1152_s7 + $0x60] sm:$0xff]   ;;  %v1023_v25 = vld [vmem:[%s1152_s7 + $0x68] sm:$0xff]  }
  0x2c   : > { %942 = vmatprep.subr.bf16.mxu1 %v1008_v10  ;;  %v1016_v18 = vld [vmem:[%s1152_s7 + $0xd8] sm:$0xff]   ;;  %v1020_v22 = vld [vmem:[%s1152_s7 + $0xe0] sm:$0xff]   ;;  %v1024_v26 = vld [vmem:[%s1152_s7 + $0xe8] sm:$0xff]  }
  0x2d   : > { %v1017_v19 = vld [vmem:[%s1152_s7 + $0x18] sm:$0xff]   ;;  %v1021_v23 = vld [vmem:[%s1152_s7 + $0x20] sm:$0xff]   ;;  %v1025_v27 = vld [vmem:[%s1152_s7 + $0x28] sm:$0xff]  }
  0x2e   : > { %921 = vmatpush3.bf16.msra.mxu0 %v1009_v11  ;;  %v1018_v20 = vld [vmem:[%s1152_s7 + $0x98] sm:$0xff]   ;;  %v1022_v24 = vld [vmem:[%s1152_s7 + $0xa0] sm:$0xff]   ;;  %v1026_v28 = vld [vmem:[%s1152_s7 + $0xa8] sm:$0xff]  }
  0x2f   : > { %943 = vmatpush3.bf16.msra.mxu1 %v1010_v12  ;;  %922 = vmatprep.subr.bf16.mxu0 %v1011_v13  ;;  %v1027_v29 = vld [vmem:[%s1152_s7 + $0x70] sm:$0xff]   ;;  %v1031_v33 = vld [vmem:[%s1152_s7 + $0x78] sm:$0xff]   ;;  %v321_v50 = vld [vmem:[#allocation2] sm:$0xff] }
  0x30   : > { %944 = vmatprep.subr.bf16.mxu1 %v1012_v14  ;;  %v1028_v30 = vld [vmem:[%s1152_s7 + $0xf0] sm:$0xff]   ;;  %v1032_v34 = vld [vmem:[%s1152_s7 + $0xf8] sm:$0xff]   ;;  %v322_v55 = vld [vmem:[#allocation2 + $0x8] sm:$0xff] }
  0x31   : > { %v1029_v31 = vld [vmem:[%s1152_s7 + $0x30] sm:$0xff]   ;;  %v1033_v35 = vld [vmem:[%s1152_s7 + $0x38] sm:$0xff]   ;;  %v903_v61 = vld [vmem:[%s1217_s2] ss:$0 sm:$0xff] (!%p902_p11) }
  0x32   : > { %923 = vmatpush3.bf16.msra.mxu0 %v1013_v15  ;;  %v1030_v32 = vld [vmem:[%s1152_s7 + $0xb0] sm:$0xff]   ;;  %v1034_v36 = vld [vmem:[%s1152_s7 + $0xb8] sm:$0xff]  }
  0x33   : > { %945 = vmatpush3.bf16.msra.mxu1 %v1014_v16  ;;  %924 = vmatprep.subr.bf16.mxu0 %v1015_v17  ;;  %v1035_v37 = vld [vmem:[%s1154_s8] ss:$16 sps:$4 sm:$0xff]   ;;  %v1037_v38 = vld [vmem:[%s1154_s8 + $0x4] ss:$16 sps:$4 sm:$0xff]   ;;  %v1038_v39 = vld [vmem:[%s1154_s8 + $0x8] ss:$16 sps:$4 sm:$0xff]  }
  0x34   : > { %946 = vmatprep.subr.bf16.mxu1 %v1016_v18  ;;  %v1040_v40 = vld [vmem:[%s1154_s8 + $0xc] ss:$16 sps:$4 sm:$0xff]   ;;  %635 = vmatprep.mubr.bf16.mxu0 %v1037_v38 }
  0x35   : > { %676 = vmatprep.mubr.bf16.mxu1 %v1040_v40 }
  0x36   : > { %925 = vmatpush3.bf16.msra.mxu0 %v1017_v19 }
  0x37   : > { %947 = vmatpush3.bf16.msra.mxu1 %v1018_v20  ;;  %926 = vmatprep.subr.bf16.mxu0 %v1019_v21 }
  0x38   : > { %948 = vmatprep.subr.bf16.mxu1 %v1020_v22 }
  0x3a   : > { %927 = vmatpush3.bf16.msra.mxu0 %v1021_v23 }
  0x3b   : > { %949 = vmatpush3.bf16.msra.mxu1 %v1022_v24  ;;  %928 = vmatprep.subr.bf16.mxu0 %v1023_v25 }
  0x3c   : > { %950 = vmatprep.subr.bf16.mxu1 %v1024_v26 }
  0x3e   : > { %929 = vmatpush3.bf16.msra.mxu0 %v1025_v27 }
  0x3f   : > { %951 = vmatpush3.bf16.msra.mxu1 %v1026_v28  ;;  %930 = vmatprep.subr.bf16.mxu0 %v1027_v29 }
  0x40   : > { %952 = vmatprep.subr.bf16.mxu1 %v1028_v30 }
  0x42   : > { %931 = vmatpush3.bf16.msra.mxu0 %v1029_v31 }
  0x43   : > { %953 = vmatpush3.bf16.msra.mxu1 %v1030_v32  ;;  %932 = vmatprep.subr.bf16.mxu0 %v1031_v33 }
  0x44   : > { %954 = vmatprep.subr.bf16.mxu1 %v1032_v34 }
  0x46   : > { %933 = vmatpush3.bf16.msra.mxu0 %v1033_v35 }
  0x47   : > { %955 = vmatpush3.bf16.msra.mxu1 %v1034_v36 }
  0x49   : > { %636 = vmatmul.mubr.bf16.vlgmr.msra.gmra.mrb[0].mxu0 %v1035_v37 }
  0x4a   : > { %677 = vmatmul.mubr.bf16.vlgmr.msra.gmra.mrb[0].mxu1 %v1038_v39 }
 0x11c   : > { %v934_v41 = vpop.f32.mrb[0].mxu0 }
 0x11d   : > { %v956_v42 = vpop.f32.mrb[0].mxu1  ;;  %v935_v43 = vpop.f32.mrb[1].mxu0 }
 0x11e   : > { %v936_v44 = vadd.f32 %v935_v43, %v934_v41  ;;  %v957_v45 = vpop.f32.mrb[1].mxu1  ;;  %v937_v46 = vpop.f32.mrb[2].mxu0 }
 0x11f   : > { %v958_v47 = vadd.f32 %v957_v45, %v956_v42  ;;  %v959_v48 = vpop.f32.mrb[2].mxu1  ;;  %v938_v49 = vpop.f32.mrb[3].mxu0 }
 0x120   : > { %v939_v51 = vadd.f32 %v938_v49, %v937_v46  ;;  %v960_v52 = vpop.f32.mrb[3].mxu1 }
 0x121   : > { %v679_v53 = vadd.f32 %v958_v47, %v936_v44  ;;  %v961_v54 = vadd.f32 %v960_v52, %v959_v48  ;;  %692 = sbr.rel (%p902_p11) target bundleno = 310 (0x136), region = 63 }
 0x123   : > { %v685_v56 = vadd.f32 %v679_v53, %v321_v50  ;;  %v682_v57 = vadd.f32 %v961_v54, %v939_v51 }
 0x125   : > { %687 = vst [vmem:[#allocation2] sm:$0xff] %v685_v56  ;;  %v686_v58 = vadd.f32 %v682_v57, %v322_v55 }
 0x127   : > { %688 = vst [vmem:[#allocation2 + $0x8] sm:$0xff] %v686_v58 }
 0x12c   : > { %v693_v59 = vld [vmem:[#allocation2] sm:$0xff] }
 0x12d   : > { %v702_v62 = vadd.f32 %v903_v61, %v693_v59 }
 0x12e   : > { %v694_v60 = vld [vmem:[#allocation2 + $0x8] sm:$0xff] }
 0x12f   : > { %v703_v63 = vadd.f32 %v903_v61, %v694_v60  ;;  %v704_v0 = vmax.f32 %v702_v62, 0.0 }
 0x131   : > { %v705_v1 = vmax.f32 %v703_v63, 0.0 }
 0x133   : > { %v916_v2 = vpack.c.bf16 %v705_v1, %v704_v0 }
 0x135   : > { %917 = vst [vmem:[%s1218_s3] sm:$0xff] %v916_v2  }
 0x136 PF: > { %s13_s16 = sadd.s32 1, %s1079_s16   ;;  %s1219_s12 = smov %s1067_s13 }
 0x137   : > { %p10_p12 = scmp.ge.s32.totalorder %s13_s16, 4   ;;  %s1220_s13 = smov %s1137_s20 }
 0x138   : > { %s1221_s14 = smov %s1075_s15  ;;  %s1222_s15 = smov %s1224_s17 }
 0x139   :  { %12 = sbr.rel (!%p10_p12) target bundleno = 3 (0x3), region = 104 }

// kernel: _lambda_.26
= control target key start
LH: loop header
LB: loop body
LE: loop exit
PB: predicated region body
PF: predicated region fallthrough
CT: control target
= control target key end

     0   :  { %s222_s0 = inlined_call_operand.vmem [shape: bf16[64,128], index: 0, kind: input, shape index: {}]   ;;  %s223_s1 = inlined_call_operand.vmem [shape: f32[1,128], index: 1, kind: input, shape index: {}]   ;;  %s224_s2 = inlined_call_operand.vmem [shape: f32[1,128], index: 2, kind: input, shape index: {}]   ;;  %s225_s3 = inlined_call_operand.vmem [shape: bf16[64,128], index: 3, kind: output, shape index: {}]  }
   0x1   :  { %v131_v0 = vld [vmem:[%s222_s0] sm:$0xff]   ;;  %v166_v4 = vld [vmem:[%s222_s0 + $0x8] sm:$0xff]   ;;  %v167_v5 = vld [vmem:[%s222_s0 + $0x10] sm:$0xff]  }
   0x2   :  { %v112_v1 = vld [vmem:[%s223_s1] ss:$0 sm:$0xff]  ;;  %v132_v2 = vunpack.c.l.bf16 %v131_v0  ;;  %v133_v3 = vunpack.c.h.bf16 %v131_v0  ;;  %v168_v6 = vld [vmem:[%s222_s0 + $0x18] sm:$0xff]   ;;  %v136_v8 = vunpack.c.l.bf16 %v166_v4  ;;  %v137_v9 = vunpack.c.h.bf16 %v166_v4 }
   0x3   :  { %v113_v7 = vld [vmem:[%s224_s2] ss:$0 sm:$0xff]  ;;  %v140_v10 = vunpack.c.l.bf16 %v167_v5  ;;  %v141_v11 = vunpack.c.h.bf16 %v167_v5  ;;  %v144_v14 = vunpack.c.l.bf16 %v168_v6  ;;  %v145_v15 = vunpack.c.h.bf16 %v168_v6 }
   0x4   :  { %v37_v12 = vmul.f32 %v132_v2, %v112_v1  ;;  %v38_v13 = vmul.f32 %v133_v3, %v112_v1  ;;  %v39_v16 = vmul.f32 %v136_v8, %v112_v1  ;;  %v40_v17 = vmul.f32 %v137_v9, %v112_v1 }
   0x5   :  { %v41_v18 = vmul.f32 %v140_v10, %v112_v1  ;;  %v42_v19 = vmul.f32 %v141_v11, %v112_v1  ;;  %v43_v22 = vmul.f32 %v144_v14, %v112_v1  ;;  %v44_v23 = vmul.f32 %v145_v15, %v112_v1 }
   0x6   :  { %v52_v20 = vadd.f32 %v113_v7, %v37_v12  ;;  %v53_v21 = vadd.f32 %v113_v7, %v38_v13  ;;  %v54_v24 = vadd.f32 %v113_v7, %v39_v16  ;;  %v55_v25 = vadd.f32 %v113_v7, %v40_v17 }
   0x7   :  { %v56_v26 = vadd.f32 %v113_v7, %v41_v18  ;;  %v57_v27 = vadd.f32 %v113_v7, %v42_v19  ;;  %v58_v30 = vadd.f32 %v113_v7, %v43_v22  ;;  %v59_v31 = vadd.f32 %v113_v7, %v44_v23 }
   0x8   :  { %v60_v28 = vmax.f32 %v52_v20, 0.0  ;;  %v61_v29 = vmax.f32 %v53_v21, 0.0  ;;  %v62_v32 = vmax.f32 %v54_v24, 0.0  ;;  %v63_v33 = vmax.f32 %v55_v25, 0.0 }
   0x9   :  { %v64_v34 = vmax.f32 %v56_v26, 0.0  ;;  %v65_v35 = vmax.f32 %v57_v27, 0.0  ;;  %v66_v37 = vmax.f32 %v58_v30, 0.0  ;;  %v67_v38 = vmax.f32 %v59_v31, 0.0 }
   0xa   :  { %v149_v36 = vpack.c.bf16 %v61_v29, %v60_v28  ;;  %v154_v39 = vpack.c.bf16 %v63_v33, %v62_v32 }
   0xb   :  { %v159_v40 = vpack.c.bf16 %v65_v35, %v64_v34  ;;  %v164_v41 = vpack.c.bf16 %v67_v38, %v66_v37 }
   0xc   :  { %150 = vst [vmem:[%s225_s3] sm:$0xff] %v149_v36   ;;  %169 = vst [vmem:[%s225_s3 + $0x8] sm:$0xff] %v154_v39  }
   0xd   :  { %170 = vst [vmem:[%s225_s3 + $0x10] sm:$0xff] %v159_v40   ;;  %171 = vst [vmem:[%s225_s3 + $0x18] sm:$0xff] %v164_v41  }

// kernel: _lambda_.25
= control target key start
LH: loop header
LB: loop body
LE: loop exit
PB: predicated region body
PF: predicated region fallthrough
CT: control target
= control target key end

     0   :  { %s1065_s18 = smov 0   ;;  %s1067_s19 = smov 0   ;;  %s1133_s0 = inlined_call_operand.vmem [shape: bf16[4,16,256], index: 0, kind: input, shape index: {}]   ;;  %s1134_s1 = inlined_call_operand.vmem [shape: bf16[4,256,128], index: 1, kind: input, shape index: {}]   ;;  %s1135_s2 = inlined_call_operand.vmem [shape: f32[1,128], index: 2, kind: input, shape index: {}]   ;;  %s1136_s3 = inlined_call_operand.vmem [shape: bf16[4,16,128], index: 3, kind: output, shape index: {0}]   ;;  %s1137_s4 = inlined_call_operand.vmem [shape: f32[4,8,128], index: 4, kind: output, shape index: {1}]   ;;  %s1138_s5 = inlined_call_operand.vmem [shape: f32[4,8,128], index: 5, kind: output, shape index: {2}]  }
   0x1   :  { %s1069_s20 = smov 0  }
   0x2 LB: > { %s42_s21 = sadd.s32 1, %s1029_s19  ;;  %p904_p0 = scmp.ge.s32.totalorder %s1033_s20, 1  ;;  %s1033_s20 = sphi %s1069_s20, %s16_s20   ;;  %s1029_s19 = sphi %s1067_s19, %s1140_s19   ;;  %s1025_s18 = sphi %s1065_s18, %s1139_s18  }
   0x3   : > { %p44_p1 = scmp.ge.s32.totalorder %s42_s21, 4  ;;  %p275_p2 = scmp.lt.s32.totalorder %s1033_s20, 5 }
   0x5   : > { %s1142_s21 = smov (%p44_p1, %s42_s21), 0  ;;  %p276_p3 = pnand %p904_p0, %p275_p2 }
   0x6   : > { %p356_p4 = scmp.lt.s32.totalorder (!%p276_p3), %s1025_s18, 3  ;;  %v931_v20 = vld [vmem:[%s1135_s2] ss:$0 sm:$0xff] (!%p276_p3) }
   0x7   : > { %279 = sbr.rel (%p276_p3) target bundleno = 286 (0x11e), region = 32 }
   0xe   : > { %s1144_s18 = smov (!%p356_p4, %s1025_s18), 3 }
   0xf   : > { %s937_s22 = sshll.u32 %s1144_s18, 7  ;;  %s936_s26 = sshll.u32 %s1144_s18, 4 }
  0x10   : > { %s1089_s25 = scalar_lea.vmem %s1134_s1, %s937_s22  ;;  %s367_s29 = scalar_lea.vmem %s1133_s0, %s936_s26 }
  0x11   : > { %v992_v0 = vld [vmem:[%s1089_s25 + $0x40] sm:$0xff]   ;;  %v994_v2 = vld [vmem:[%s1089_s25 + $0x48] sm:$0xff]   ;;  %v996_v4 = vld [vmem:[%s1089_s25 + $0x50] sm:$0xff]   ;;  %s938_s7 = sshll.u32 %s1144_s18, 3 }
  0x12   : > { %v993_v1 = vld [vmem:[%s1089_s25] sm:$0xff]   ;;  %946 = vmatprep.subr.bf16.mxu0 %v992_v0  ;;  %v995_v3 = vld [vmem:[%s1089_s25 + $0x8] sm:$0xff]   ;;  %v997_v5 = vld [vmem:[%s1089_s25 + $0x10] sm:$0xff]   ;;  %s397_s10 = scalar_lea.vmem %s1136_s3, %s938_s7  ;;  %s408_s13 = scalar_lea.vmem %s1137_s4, %s938_s7 }
  0x13   : > { %947 = vmatpush3.bf16.msra.mxu0 %v993_v1  ;;  %v998_v6 = vld [vmem:[%s1089_s25 + $0x58] sm:$0xff]   ;;  %v1000_v8 = vld [vmem:[%s1089_s25 + $0x60] sm:$0xff]   ;;  %v1002_v10 = vld [vmem:[%s1089_s25 + $0x68] sm:$0xff]   ;;  %s418_s16 = scalar_lea.vmem %s1138_s5, %s938_s7 }
  0x14   : > { %948 = vmatprep.subr.bf16.mxu0 %v994_v2  ;;  %v999_v7 = vld [vmem:[%s1089_s25 + $0x18] sm:$0xff]   ;;  %v1001_v9 = vld [vmem:[%s1089_s25 + $0x20] sm:$0xff]   ;;  %v1003_v12 = vld [vmem:[%s1089_s25 + $0x28] sm:$0xff]  }
  0x15   : > { %v1010_v11 = vld [vmem:[%s367_s29 + $0x4] ss:$8 sps:$4 sm:$0xff]   ;;  %v1004_v13 = vld [vmem:[%s1089_s25 + $0x70] sm:$0xff]   ;;  %v1006_v15 = vld [vmem:[%s1089_s25 + $0x78] sm:$0xff]  }
  0x16   : > { %600 = vmatprep.mubr.bf16.mxu0 %v1010_v11  ;;  %v1005_v14 = vld [vmem:[%s1089_s25 + $0x30] sm:$0xff]   ;;  %v1007_v16 = vld [vmem:[%s1089_s25 + $0x38] sm:$0xff]   ;;  %v1008_v17 = vld [vmem:[%s367_s29] ss:$8 sps:$4 sm:$0xff]  }
  0x17   : > { %949 = vmatpush3.bf16.msra.mxu0 %v995_v3 }
  0x18   : > { %950 = vmatprep.subr.bf16.mxu0 %v996_v4 }
  0x1b   : > { %951 = vmatpush3.bf16.msra.mxu0 %v997_v5 }
  0x1c   : > { %952 = vmatprep.subr.bf16.mxu0 %v998_v6 }
  0x1f   : > { %953 = vmatpush3.bf16.msra.mxu0 %v999_v7 }
  0x20   : > { %954 = vmatprep.subr.bf16.mxu0 %v1000_v8 }
  0x23   : > { %955 = vmatpush3.bf16.msra.mxu0 %v1001_v9 }
  0x24   : > { %956 = vmatprep.subr.bf16.mxu0 %v1002_v10 }
  0x27   : > { %957 = vmatpush3.bf16.msra.mxu0 %v1003_v12 }
  0x28   : > { %958 = vmatprep.subr.bf16.mxu0 %v1004_v13 }
  0x2b   : > { %959 = vmatpush3.bf16.msra.mxu0 %v1005_v14 }
  0x2c   : > { %960 = vmatprep.subr.bf16.mxu0 %v1006_v15 }
  0x2f   : > { %961 = vmatpush3.bf16.msra.mxu0 %v1007_v16 }
  0x32   : > { %601 = vmatmul.mubr.bf16.vlgmr.msra.gmra.mrb[0].mxu0 %v1008_v17 }
 0x105   : > { %v962_v18 = vpop.f32.mrb[0].mxu0 }
 0x106   : > { %v963_v19 = vpop.f32.mrb[1].mxu0 }
 0x107   : > { %v964_v21 = vadd.f32 %v963_v19, %v962_v18  ;;  %v965_v22 = vpop.f32.mrb[2].mxu0 }
 0x108   : > { %v966_v23 = vpop.f32.mrb[3].mxu0 }
 0x109   : > { %v625_v24 = vadd.f32 %v964_v21, %v931_v20  ;;  %v967_v25 = vadd.f32 %v966_v23, %v965_v22 }
 0x10b   : > { %v626_v26 = vadd.f32 %v967_v25, %v931_v20  ;;  %v644_v27 = vmul.f32 %v625_v24, %v625_v24 }
 0x10d   : > { %v944_v28 = vpack.c.bf16 %v626_v26, %v625_v24  ;;  %v637_v29 = vadd.f32 %v626_v26, %v625_v24  ;;  %v645_v30 = vmul.f32 %v626_v26, %v626_v26 }
 0x10f   : > { %945 = vst [vmem:[%s397_s10] sm:$0xff] %v944_v28   ;;  %v638_v31 = vrot.slane %v637_v29, 4  ;;  %v646_v32 = vadd.f32 %v645_v30, %v644_v27 }
 0x111   : > { %v639_v33 = vadd.f32 %v638_v31, %v637_v29  ;;  %v647_v34 = vrot.slane %v646_v32, 4 }
 0x113   : > { %v640_v35 = vrot.slane %v639_v33, 2  ;;  %v648_v36 = vadd.f32 %v647_v34, %v646_v32 }
 0x115   : > { %v641_v37 = vadd.f32 %v640_v35, %v639_v33  ;;  %v649_v38 = vrot.slane %v648_v36, 2 }
 0x117   : > { %v642_v39 = vrot.slane %v641_v37, 1  ;;  %v650_v40 = vadd.f32 %v649_v38, %v648_v36 }
 0x119   : > { %v643_v41 = vadd.f32 %v642_v39, %v641_v37  ;;  %v651_v42 = vrot.slane %v650_v40, 1 }
 0x11b   : > { %v652_v43 = vadd.f32 %v651_v42, %v650_v40  ;;  %653 = vst [vmem:[%s408_s13] sm:$0xff] %v643_v41 }
 0x11d   : > { %654 = vst [vmem:[%s418_s16] sm:$0xff] %v652_v43 }
 0x11e PF: > { %s16_s20 = sadd.s32 1, %s1033_s20   ;;  %s1139_s18 = smov %s1029_s19 }
 0x11f   : > { %p13_p5 = scmp.ge.s32.totalorder %s16_s20, 6   ;;  %s1140_s19 = smov %s1142_s21 }
 0x121   :  { %15 = sbr.rel (!%p13_p5) target bundleno = 2 (0x2), region = 100 }

// kernel: _lambda_.27
= control target key start
LH: loop header
LB: loop body
LE: loop exit
PB: predicated region body
PF: predicated region fallthrough
CT: control target
= control target key end

     0   :  { %s1305_s18 = smov 0   ;;  %s1307_s19 = smov 0   ;;  %s1389_s0 = inlined_call_operand.vmem [shape: bf16[4,16,512], index: 0, kind: input, shape index: {}]   ;;  %s1390_s1 = inlined_call_operand.vmem [shape: bf16[4,512,128], index: 1, kind: input, shape index: {}]   ;;  %s1391_s2 = inlined_call_operand.vmem [shape: f32[1,128], index: 2, kind: input, shape index: {}]   ;;  %s1392_s3 = inlined_call_operand.vmem [shape: bf16[4,16,128], index: 3, kind: output, shape index: {0}]   ;;  %s1393_s4 = inlined_call_operand.vmem [shape: f32[4,8,128], index: 4, kind: output, shape index: {1}]   ;;  %s1394_s5 = inlined_call_operand.vmem [shape: f32[4,8,128], index: 5, kind: output, shape index: {2}]  }
   0x1   :  { %s1309_s20 = smov 0  }
   0x2 LB: > { %s42_s21 = sadd.s32 1, %s1269_s19  ;;  %p1085_p0 = scmp.ge.s32.totalorder %s1273_s20, 1  ;;  %s1273_s20 = sphi %s1309_s20, %s16_s20   ;;  %s1269_s19 = sphi %s1307_s19, %s1396_s19   ;;  %s1265_s18 = sphi %s1305_s18, %s1395_s18  }
   0x3   : > { %p44_p1 = scmp.ge.s32.totalorder %s42_s21, 4  ;;  %p275_p2 = scmp.lt.s32.totalorder %s1273_s20, 5 }
   0x5   : > { %s1398_s21 = smov (%p44_p1, %s42_s21), 0  ;;  %p276_p3 = pnand %p1085_p0, %p275_p2 }
   0x6   : > { %p356_p4 = scmp.lt.s32.totalorder (!%p276_p3), %s1265_s18, 3  ;;  %v1130_v45 = vld [vmem:[%s1391_s2] ss:$0 sm:$0xff] (!%p276_p3) }
   0x7   : > { %279 = sbr.rel (%p276_p3) target bundleno = 290 (0x122), region = 32 }
   0xe   : > { %s1400_s18 = smov (!%p356_p4, %s1265_s18), 3 }
   0xf   : > { %s1136_s22 = sshll.u32 %s1400_s18, 8  ;;  %s1135_s26 = sshll.u32 %s1400_s18, 5 }
  0x10   : > { %s1329_s25 = scalar_lea.vmem %s1390_s1, %s1136_s22  ;;  %s367_s29 = scalar_lea.vmem %s1389_s0, %s1135_s26 }
  0x11   : > { %v1213_v0 = vld [vmem:[%s1329_s25 + $0x40] sm:$0xff]   ;;  %v1217_v4 = vld [vmem:[%s1329_s25 + $0x48] sm:$0xff]   ;;  %v1221_v8 = vld [vmem:[%s1329_s25 + $0x50] sm:$0xff]   ;;  %s1137_s7 = sshll.u32 %s1400_s18, 3 }
  0x12   : > { %v1214_v1 = vld [vmem:[%s1329_s25 + $0xc0] sm:$0xff]   ;;  %1145 = vmatprep.subr.bf16.mxu0 %v1213_v0  ;;  %v1218_v5 = vld [vmem:[%s1329_s25 + $0xc8] sm:$0xff]   ;;  %v1222_v9 = vld [vmem:[%s1329_s25 + $0xd0] sm:$0xff]   ;;  %s397_s10 = scalar_lea.vmem %s1392_s3, %s1137_s7  ;;  %s408_s13 = scalar_lea.vmem %s1393_s4, %s1137_s7 }
  0x13   : > { %v1215_v2 = vld [vmem:[%s1329_s25] sm:$0xff]   ;;  %1167 = vmatprep.subr.bf16.mxu1 %v1214_v1  ;;  %v1219_v6 = vld [vmem:[%s1329_s25 + $0x8] sm:$0xff]   ;;  %v1223_v10 = vld [vmem:[%s1329_s25 + $0x10] sm:$0xff]   ;;  %s418_s16 = scalar_lea.vmem %s1394_s5, %s1137_s7 }
  0x14   : > { %v1216_v3 = vld [vmem:[%s1329_s25 + $0x80] sm:$0xff]   ;;  %1146 = vmatpush3.bf16.msra.mxu0 %v1215_v2  ;;  %v1220_v7 = vld [vmem:[%s1329_s25 + $0x88] sm:$0xff]   ;;  %v1224_v11 = vld [vmem:[%s1329_s25 + $0x90] sm:$0xff]  }
  0x15   : > { %1168 = vmatpush3.bf16.msra.mxu1 %v1216_v3  ;;  %1147 = vmatprep.subr.bf16.mxu0 %v1217_v4  ;;  %v1225_v12 = vld [vmem:[%s1329_s25 + $0x58] sm:$0xff]   ;;  %v1229_v16 = vld [vmem:[%s1329_s25 + $0x60] sm:$0xff]   ;;  %v1233_v20 = vld [vmem:[%s1329_s25 + $0x68] sm:$0xff]  }
  0x16   : > { %1169 = vmatprep.subr.bf16.mxu1 %v1218_v5  ;;  %v1226_v13 = vld [vmem:[%s1329_s25 + $0xd8] sm:$0xff]   ;;  %v1230_v17 = vld [vmem:[%s1329_s25 + $0xe0] sm:$0xff]   ;;  %v1234_v21 = vld [vmem:[%s1329_s25 + $0xe8] sm:$0xff]  }
  0x17   : > { %v1227_v14 = vld [vmem:[%s1329_s25 + $0x18] sm:$0xff]   ;;  %v1231_v18 = vld [vmem:[%s1329_s25 + $0x20] sm:$0xff]   ;;  %v1235_v22 = vld [vmem:[%s1329_s25 + $0x28] sm:$0xff]  }
  0x18   : > { %1148 = vmatpush3.bf16.msra.mxu0 %v1219_v6  ;;  %v1228_v15 = vld [vmem:[%s1329_s25 + $0x98] sm:$0xff]   ;;  %v1232_v19 = vld [vmem:[%s1329_s25 + $0xa0] sm:$0xff]   ;;  %v1236_v23 = vld [vmem:[%s1329_s25 + $0xa8] sm:$0xff]  }
  0x19   : > { %1170 = vmatpush3.bf16.msra.mxu1 %v1220_v7  ;;  %1149 = vmatprep.subr.bf16.mxu0 %v1221_v8  ;;  %v1237_v24 = vld [vmem:[%s1329_s25 + $0x70] sm:$0xff]   ;;  %v1241_v28 = vld [vmem:[%s1329_s25 + $0x78] sm:$0xff]  }
  0x1a   : > { %1171 = vmatprep.subr.bf16.mxu1 %v1222_v9  ;;  %v1238_v25 = vld [vmem:[%s1329_s25 + $0xf0] sm:$0xff]   ;;  %v1242_v29 = vld [vmem:[%s1329_s25 + $0xf8] sm:$0xff]  }
  0x1b   : > { %v1239_v26 = vld [vmem:[%s1329_s25 + $0x30] sm:$0xff]   ;;  %v1243_v30 = vld [vmem:[%s1329_s25 + $0x38] sm:$0xff]  }
  0x1c   : > { %1150 = vmatpush3.bf16.msra.mxu0 %v1223_v10  ;;  %v1240_v27 = vld [vmem:[%s1329_s25 + $0xb0] sm:$0xff]   ;;  %v1244_v31 = vld [vmem:[%s1329_s25 + $0xb8] sm:$0xff]  }
  0x1d   : > { %1172 = vmatpush3.bf16.msra.mxu1 %v1224_v11  ;;  %1151 = vmatprep.subr.bf16.mxu0 %v1225_v12  ;;  %v1245_v32 = vld [vmem:[%s367_s29] ss:$16 sps:$4 sm:$0xff]   ;;  %v1247_v33 = vld [vmem:[%s367_s29 + $0x4] ss:$16 sps:$4 sm:$0xff]   ;;  %v1248_v34 = vld [vmem:[%s367_s29 + $0x8] ss:$16 sps:$4 sm:$0xff]  }
  0x1e   : > { %1173 = vmatprep.subr.bf16.mxu1 %v1226_v13  ;;  %v1250_v35 = vld [vmem:[%s367_s29 + $0xc] ss:$16 sps:$4 sm:$0xff]   ;;  %740 = vmatprep.mubr.bf16.mxu0 %v1247_v33 }
  0x1f   : > { %781 = vmatprep.mubr.bf16.mxu1 %v1250_v35 }
  0x20   : > { %1152 = vmatpush3.bf16.msra.mxu0 %v1227_v14 }
  0x21   : > { %1174 = vmatpush3.bf16.msra.mxu1 %v1228_v15  ;;  %1153 = vmatprep.subr.bf16.mxu0 %v1229_v16 }
  0x22   : > { %1175 = vmatprep.subr.bf16.mxu1 %v1230_v17 }
  0x24   : > { %1154 = vmatpush3.bf16.msra.mxu0 %v1231_v18 }
  0x25   : > { %1176 = vmatpush3.bf16.msra.mxu1 %v1232_v19  ;;  %1155 = vmatprep.subr.bf16.mxu0 %v1233_v20 }
  0x26   : > { %1177 = vmatprep.subr.bf16.mxu1 %v1234_v21 }
  0x28   : > { %1156 = vmatpush3.bf16.msra.mxu0 %v1235_v22 }
  0x29   : > { %1178 = vmatpush3.bf16.msra.mxu1 %v1236_v23  ;;  %1157 = vmatprep.subr.bf16.mxu0 %v1237_v24 }
  0x2a   : > { %1179 = vmatprep.subr.bf16.mxu1 %v1238_v25 }
  0x2c   : > { %1158 = vmatpush3.bf16.msra.mxu0 %v1239_v26 }
  0x2d   : > { %1180 = vmatpush3.bf16.msra.mxu1 %v1240_v27  ;;  %1159 = vmatprep.subr.bf16.mxu0 %v1241_v28 }
  0x2e   : > { %1181 = vmatprep.subr.bf16.mxu1 %v1242_v29 }
  0x30   : > { %1160 = vmatpush3.bf16.msra.mxu0 %v1243_v30 }
  0x31   : > { %1182 = vmatpush3.bf16.msra.mxu1 %v1244_v31 }
  0x33   : > { %741 = vmatmul.mubr.bf16.vlgmr.msra.gmra.mrb[0].mxu0 %v1245_v32 }
  0x34   : > { %782 = vmatmul.mubr.bf16.vlgmr.msra.gmra.mrb[0].mxu1 %v1248_v34 }
 0x106   : > { %v1161_v36 = vpop.f32.mrb[0].mxu0 }
 0x107   : > { %v1183_v37 = vpop.f32.mrb[0].mxu1  ;;  %v1162_v38 = vpop.f32.mrb[1].mxu0 }
 0x108   : > { %v1163_v39 = vadd.f32 %v1162_v38, %v1161_v36  ;;  %v1184_v40 = vpop.f32.mrb[1].mxu1  ;;  %v1164_v41 = vpop.f32.mrb[2].mxu0 }
 0x109   : > { %v1185_v42 = vadd.f32 %v1184_v40, %v1183_v37  ;;  %v1186_v43 = vpop.f32.mrb[2].mxu1  ;;  %v1165_v44 = vpop.f32.mrb[3].mxu0 }
 0x10a   : > { %v1166_v46 = vadd.f32 %v1165_v44, %v1164_v41  ;;  %v1187_v47 = vpop.f32.mrb[3].mxu1 }
 0x10b   : > { %v784_v48 = vadd.f32 %v1185_v42, %v1163_v39  ;;  %v1188_v49 = vadd.f32 %v1187_v47, %v1186_v43 }
 0x10d   : > { %v806_v50 = vadd.f32 %v1130_v45, %v784_v48  ;;  %v787_v51 = vadd.f32 %v1188_v49, %v1166_v46 }
 0x10f   : > { %v807_v52 = vadd.f32 %v1130_v45, %v787_v51  ;;  %v825_v53 = vmul.f32 %v806_v50, %v806_v50 }
 0x111   : > { %v1143_v54 = vpack.c.bf16 %v807_v52, %v806_v50  ;;  %v818_v55 = vadd.f32 %v807_v52, %v806_v50  ;;  %v826_v56 = vmul.f32 %v807_v52, %v807_v52 }
 0x113   : > { %1144 = vst [vmem:[%s397_s10] sm:$0xff] %v1143_v54   ;;  %v819_v57 = vrot.slane %v818_v55, 4  ;;  %v827_v58 = vadd.f32 %v826_v56, %v825_v53 }
 0x115   : > { %v820_v59 = vadd.f32 %v819_v57, %v818_v55  ;;  %v828_v60 = vrot.slane %v827_v58, 4 }
 0x117   : > { %v821_v61 = vrot.slane %v820_v59, 2  ;;  %v829_v62 = vadd.f32 %v828_v60, %v827_v58 }
 0x119   : > { %v822_v63 = vadd.f32 %v821_v61, %v820_v59  ;;  %v830_v0 = vrot.slane %v829_v62, 2 }
 0x11b   : > { %v823_v1 = vrot.slane %v822_v63, 1  ;;  %v831_v2 = vadd.f32 %v830_v0, %v829_v62 }
 0x11d   : > { %v824_v3 = vadd.f32 %v823_v1, %v822_v63  ;;  %v832_v4 = vrot.slane %v831_v2, 1 }
 0x11f   : > { %v833_v5 = vadd.f32 %v832_v4, %v831_v2  ;;  %834 = vst [vmem:[%s408_s13] sm:$0xff] %v824_v3 }
 0x121   : > { %835 = vst [vmem:[%s418_s16] sm:$0xff] %v833_v5 }
 0x122 PF: > { %s16_s20 = sadd.s32 1, %s1273_s20   ;;  %s1395_s18 = smov %s1269_s19 }
 0x123   : > { %p13_p5 = scmp.ge.s32.totalorder %s16_s20, 6   ;;  %s1396_s19 = smov %s1398_s21 }
 0x125   :  { %15 = sbr.rel (!%p13_p5) target bundleno = 2 (0x2), region = 100 }

// kernel: _lambda_.29
= control target key start
LH: loop header
LB: loop body
LE: loop exit
PB: predicated region body
PF: predicated region fallthrough
CT: control target
= control target key end

     0   :  { %s1150_s18 = smov 0   ;;  %s1152_s19 = smov 0   ;;  %s1219_s0 = inlined_call_operand.vmem [shape: bf16[4,32,256], index: 0, kind: input, shape index: {}]   ;;  %s1220_s1 = inlined_call_operand.vmem [shape: bf16[4,256,128], index: 1, kind: input, shape index: {}]   ;;  %s1221_s2 = inlined_call_operand.vmem [shape: f32[1,128], index: 2, kind: input, shape index: {}]   ;;  %s1222_s3 = inlined_call_operand.vmem [shape: bf16[4,32,128], index: 3, kind: output, shape index: {0}]   ;;  %s1223_s4 = inlined_call_operand.vmem [shape: f32[4,8,128], index: 4, kind: output, shape index: {1}]   ;;  %s1224_s5 = inlined_call_operand.vmem [shape: f32[4,8,128], index: 5, kind: output, shape index: {2}]  }
   0x1   :  { %s1154_s20 = smov 0  }
   0x2 LB: > { %s42_s21 = sadd.s32 1, %s1114_s19  ;;  %p952_p0 = scmp.ge.s32.totalorder %s1118_s20, 1  ;;  %s1118_s20 = sphi %s1154_s20, %s16_s20   ;;  %s1114_s19 = sphi %s1152_s19, %s1226_s19   ;;  %s1110_s18 = sphi %s1150_s18, %s1225_s18  }
   0x3   : > { %p44_p1 = scmp.ge.s32.totalorder %s42_s21, 4  ;;  %p275_p2 = scmp.lt.s32.totalorder %s1118_s20, 5 }
   0x5   : > { %s1228_s21 = smov (%p44_p1, %s42_s21), 0  ;;  %p276_p3 = pnand %p952_p0, %p275_p2 }
   0x6   : > { %p356_p4 = scmp.lt.s32.totalorder (!%p276_p3), %s1110_s18, 3  ;;  %v981_v23 = vld [vmem:[%s1221_s2] ss:$0 sm:$0xff] (!%p276_p3) }
   0x7   : > { %279 = sbr.rel (%p276_p3) target bundleno = 290 (0x122), region = 32 }
   0xe   : > { %s1230_s18 = smov (!%p356_p4, %s1110_s18), 3 }
   0xf   : > { %s989_s22 = sshll.u32 %s1230_s18, 7  ;;  %s988_s26 = sshll.u32 %s1230_s18, 5 }
  0x10   : > { %s1174_s25 = scalar_lea.vmem %s1220_s1, %s989_s22  ;;  %s367_s29 = scalar_lea.vmem %s1219_s0, %s988_s26 }
  0x11   : > { %v1074_v0 = vld [vmem:[%s1174_s25 + $0x40] sm:$0xff]   ;;  %v1076_v2 = vld [vmem:[%s1174_s25 + $0x48] sm:$0xff]   ;;  %v1078_v4 = vld [vmem:[%s1174_s25 + $0x50] sm:$0xff]   ;;  %s990_s7 = sshll.u32 %s1230_s18, 4  ;;  %s959_s11 = sshll.u32 %s1230_s18, 3 }
  0x12   : > { %v1075_v1 = vld [vmem:[%s1174_s25] sm:$0xff]   ;;  %1006 = vmatprep.subr.bf16.mxu0 %v1074_v0  ;;  %1034 = vmatprep.subr.bf16.mxu1 %v1074_v0  ;;  %v1077_v3 = vld [vmem:[%s1174_s25 + $0x8] sm:$0xff]   ;;  %v1079_v5 = vld [vmem:[%s1174_s25 + $0x10] sm:$0xff]   ;;  %s397_s10 = scalar_lea.vmem %s1222_s3, %s990_s7  ;;  %s408_s14 = scalar_lea.vmem %s1223_s4, %s959_s11 }
  0x13   : > { %1007 = vmatpush3.bf16.msra.mxu0 %v1075_v1  ;;  %1042 = vmatpush3.bf16.msra.mxu1 %v1075_v1  ;;  %v1080_v6 = vld [vmem:[%s1174_s25 + $0x58] sm:$0xff]   ;;  %v1082_v8 = vld [vmem:[%s1174_s25 + $0x60] sm:$0xff]   ;;  %v1084_v10 = vld [vmem:[%s1174_s25 + $0x68] sm:$0xff]   ;;  %s418_s17 = scalar_lea.vmem %s1224_s5, %s959_s11 }
  0x14   : > { %1008 = vmatprep.subr.bf16.mxu0 %v1076_v2  ;;  %1035 = vmatprep.subr.bf16.mxu1 %v1076_v2  ;;  %v1081_v7 = vld [vmem:[%s1174_s25 + $0x18] sm:$0xff]   ;;  %v1083_v9 = vld [vmem:[%s1174_s25 + $0x20] sm:$0xff]   ;;  %v1085_v13 = vld [vmem:[%s1174_s25 + $0x28] sm:$0xff]  }
  0x15   : > { %v1092_v11 = vld [vmem:[%s367_s29 + $0x4] ss:$8 sps:$4 sm:$0xff]   ;;  %v1095_v12 = vld [vmem:[%s367_s29 + $0x14] ss:$8 sps:$4 sm:$0xff]   ;;  %v1090_v18 = vld [vmem:[%s367_s29] ss:$8 sps:$4 sm:$0xff]  }
  0x16   : > { %v1086_v14 = vld [vmem:[%s1174_s25 + $0x70] sm:$0xff]   ;;  %616 = vmatprep.mubr.bf16.mxu0 %v1092_v11  ;;  %624 = vmatprep.mubr.bf16.mxu1 %v1095_v12  ;;  %v1088_v16 = vld [vmem:[%s1174_s25 + $0x78] sm:$0xff]  }
  0x17   : > { %1009 = vmatpush3.bf16.msra.mxu0 %v1077_v3  ;;  %1043 = vmatpush3.bf16.msra.mxu1 %v1077_v3  ;;  %v1087_v15 = vld [vmem:[%s1174_s25 + $0x30] sm:$0xff]   ;;  %v1089_v17 = vld [vmem:[%s1174_s25 + $0x38] sm:$0xff]  }
  0x18   : > { %1010 = vmatprep.subr.bf16.mxu0 %v1078_v4  ;;  %1036 = vmatprep.subr.bf16.mxu1 %v1078_v4  ;;  %v1093_v19 = vld [vmem:[%s367_s29 + $0x10] ss:$8 sps:$4 sm:$0xff]  }
  0x1b   : > { %1011 = vmatpush3.bf16.msra.mxu0 %v1079_v5  ;;  %1044 = vmatpush3.bf16.msra.mxu1 %v1079_v5 }
  0x1c   : > { %1012 = vmatprep.subr.bf16.mxu0 %v1080_v6  ;;  %1037 = vmatprep.subr.bf16.mxu1 %v1080_v6 }
  0x1f   : > { %1013 = vmatpush3.bf16.msra.mxu0 %v1081_v7  ;;  %1045 = vmatpush3.bf16.msra.mxu1 %v1081_v7 }
  0x20   : > { %1014 = vmatprep.subr.bf16.mxu0 %v1082_v8  ;;  %1038 = vmatprep.subr.bf16.mxu1 %v1082_v8 }
  0x23   : > { %1015 = vmatpush3.bf16.msra.mxu0 %v1083_v9  ;;  %1046 = vmatpush3.bf16.msra.mxu1 %v1083_v9 }
  0x24   : > { %1016 = vmatprep.subr.bf16.mxu0 %v1084_v10  ;;  %1039 = vmatprep.subr.bf16.mxu1 %v1084_v10 }
  0x27   : > { %1017 = vmatpush3.bf16.msra.mxu0 %v1085_v13  ;;  %1047 = vmatpush3.bf16.msra.mxu1 %v1085_v13 }
  0x28   : > { %1018 = vmatprep.subr.bf16.mxu0 %v1086_v14  ;;  %1040 = vmatprep.subr.bf16.mxu1 %v1086_v14 }
  0x2b   : > { %1019 = vmatpush3.bf16.msra.mxu0 %v1087_v15  ;;  %1048 = vmatpush3.bf16.msra.mxu1 %v1087_v15 }
  0x2c   : > { %1020 = vmatprep.subr.bf16.mxu0 %v1088_v16  ;;  %1041 = vmatprep.subr.bf16.mxu1 %v1088_v16 }
  0x2f   : > { %1021 = vmatpush3.bf16.msra.mxu0 %v1089_v17  ;;  %1049 = vmatpush3.bf16.msra.mxu1 %v1089_v17 }
  0x32   : > { %617 = vmatmul.mubr.bf16.vlgmr.msra.gmra.mrb[0].mxu0 %v1090_v18  ;;  %625 = vmatmul.mubr.bf16.vlgmr.msra.gmra.mrb[0].mxu1 %v1093_v19 }
 0x105   : > { %v1022_v20 = vpop.f32.mrb[0].mxu0  ;;  %v1028_v21 = vpop.f32.mrb[0].mxu1 }
 0x106   : > { %v1023_v22 = vpop.f32.mrb[1].mxu0  ;;  %v1029_v24 = vpop.f32.mrb[1].mxu1 }
 0x107   : > { %v1024_v25 = vadd.f32 %v1023_v22, %v1022_v20  ;;  %v1025_v26 = vpop.f32.mrb[2].mxu0  ;;  %v1030_v27 = vadd.f32 %v1029_v24, %v1028_v21  ;;  %v1031_v28 = vpop.f32.mrb[2].mxu1 }
 0x108   : > { %v1026_v29 = vpop.f32.mrb[3].mxu0  ;;  %v1032_v30 = vpop.f32.mrb[3].mxu1 }
 0x109   : > { %v655_v31 = vadd.f32 %v1024_v25, %v981_v23  ;;  %v657_v32 = vadd.f32 %v1030_v27, %v981_v23  ;;  %v1027_v33 = vadd.f32 %v1026_v29, %v1025_v26  ;;  %v1033_v34 = vadd.f32 %v1032_v30, %v1031_v28 }
 0x10b   : > { %v656_v35 = vadd.f32 %v1027_v33, %v981_v23  ;;  %v658_v36 = vadd.f32 %v1033_v34, %v981_v23  ;;  %v688_v37 = vmul.f32 %v655_v31, %v655_v31  ;;  %v690_v38 = vmul.f32 %v657_v32, %v657_v32 }
 0x10d   : > { %v998_v39 = vpack.c.bf16 %v656_v35, %v655_v31  ;;  %v679_v40 = vadd.f32 %v656_v35, %v655_v31  ;;  %v689_v41 = vmul.f32 %v656_v35, %v656_v35  ;;  %v1003_v42 = vpack.c.bf16 %v658_v36, %v657_v32 }
 0x10e   : > { %v691_v46 = vmul.f32 %v658_v36, %v658_v36 }
 0x10f   : > { %999 = vst [vmem:[%s397_s10] sm:$0xff] %v998_v39   ;;  %v692_v43 = vadd.f32 %v689_v41, %v688_v37  ;;  %1005 = vst [vmem:[%s397_s10 + $0x8] sm:$0xff] %v1003_v42   ;;  %v680_v44 = vadd.f32 %v679_v40, %v657_v32 }
 0x111   : > { %v681_v45 = vadd.f32 %v680_v44, %v658_v36  ;;  %v693_v47 = vadd.f32 %v692_v43, %v690_v38 }
 0x113   : > { %v682_v48 = vrot.slane %v681_v45, 4  ;;  %v694_v49 = vadd.f32 %v693_v47, %v691_v46 }
 0x115   : > { %v683_v50 = vadd.f32 %v682_v48, %v681_v45  ;;  %v695_v51 = vrot.slane %v694_v49, 4 }
 0x117   : > { %v684_v52 = vrot.slane %v683_v50, 2  ;;  %v696_v53 = vadd.f32 %v695_v51, %v694_v49 }
 0x119   : > { %v685_v54 = vadd.f32 %v684_v52, %v683_v50  ;;  %v697_v55 = vrot.slane %v696_v53, 2 }
 0x11b   : > { %v686_v56 = vrot.slane %v685_v54, 1  ;;  %v698_v57 = vadd.f32 %v697_v55, %v696_v53 }
 0x11d   : > { %v687_v58 = vadd.f32 %v686_v56, %v685_v54  ;;  %v699_v59 = vrot.slane %v698_v57, 1 }
 0x11f   : > { %v700_v60 = vadd.f32 %v699_v59, %v698_v57  ;;  %701 = vst [vmem:[%s408_s14] sm:$0xff] %v687_v58 }
 0x121   : > { %702 = vst [vmem:[%s418_s17] sm:$0xff] %v700_v60 }
 0x122 PF: > { %s16_s20 = sadd.s32 1, %s1118_s20   ;;  %s1225_s18 = smov %s1114_s19 }
 0x123   : > { %p13_p5 = scmp.ge.s32.totalorder %s16_s20, 6   ;;  %s1226_s19 = smov %s1228_s21 }
 0x125   :  { %15 = sbr.rel (!%p13_p5) target bundleno = 2 (0x2), region = 100 }

// kernel: _lambda_.30
= control target key start
LH: loop header
LB: loop body
LE: loop exit
PB: predicated region body
PF: predicated region fallthrough
CT: control target
= control target key end

     0   :  { %s422_s0 = inlined_call_operand.vmem [shape: bf16[128,128], index: 0, kind: input, shape index: {}]   ;;  %s423_s1 = inlined_call_operand.vmem [shape: f32[1,128], index: 1, kind: input, shape index: {}]   ;;  %s424_s2 = inlined_call_operand.vmem [shape: f32[1,128], index: 2, kind: input, shape index: {}]   ;;  %s425_s3 = inlined_call_operand.vmem [shape: bf16[128,128], index: 3, kind: output, shape index: {}]  }
   0x1   :  { %v227_v0 = vld [vmem:[%s422_s0] sm:$0xff]   ;;  %v298_v4 = vld [vmem:[%s422_s0 + $0x8] sm:$0xff]   ;;  %v299_v5 = vld [vmem:[%s422_s0 + $0x10] sm:$0xff]  }
   0x2   :  { %v338_v1 = vld [vmem:[%s423_s1] ss:$0 sm:$0xff]  ;;  %v228_v2 = vunpack.c.l.bf16 %v227_v0  ;;  %v229_v3 = vunpack.c.h.bf16 %v227_v0  ;;  %v300_v6 = vld [vmem:[%s422_s0 + $0x18] sm:$0xff]   ;;  %v232_v8 = vunpack.c.l.bf16 %v298_v4  ;;  %v233_v9 = vunpack.c.h.bf16 %v298_v4  ;;  %v302_v33 = vld [vmem:[%s422_s0 + $0x28] sm:$0xff]  }
   0x3   :  { %v352_v7 = vld [vmem:[%s424_s2] ss:$0 sm:$0xff]  ;;  %v236_v10 = vunpack.c.l.bf16 %v299_v5  ;;  %v237_v11 = vunpack.c.h.bf16 %v299_v5  ;;  %v240_v14 = vunpack.c.l.bf16 %v300_v6  ;;  %v241_v15 = vunpack.c.h.bf16 %v300_v6  ;;  %v303_v38 = vld [vmem:[%s422_s0 + $0x30] sm:$0xff]   ;;  %v304_v43 = vld [vmem:[%s422_s0 + $0x38] sm:$0xff]  }
   0x4   :  { %v53_v12 = vmul.f32 %v228_v2, %v338_v1  ;;  %v54_v13 = vmul.f32 %v229_v3, %v338_v1  ;;  %v55_v16 = vmul.f32 %v232_v8, %v338_v1  ;;  %v56_v17 = vmul.f32 %v233_v9, %v338_v1  ;;  %v301_v28 = vld [vmem:[%s422_s0 + $0x20] sm:$0xff]  }
   0x5   :  { %v57_v18 = vmul.f32 %v236_v10, %v338_v1  ;;  %v58_v19 = vmul.f32 %v237_v11, %v338_v1  ;;  %v59_v22 = vmul.f32 %v240_v14, %v338_v1  ;;  %v60_v23 = vmul.f32 %v241_v15, %v338_v1 }
   0x6   :  { %v76_v20 = vadd.f32 %v352_v7, %v53_v12  ;;  %v77_v21 = vadd.f32 %v352_v7, %v54_v13  ;;  %v78_v24 = vadd.f32 %v352_v7, %v55_v16  ;;  %v79_v25 = vadd.f32 %v352_v7, %v56_v17 }
   0x7   :  { %v80_v26 = vadd.f32 %v352_v7, %v57_v18  ;;  %v81_v27 = vadd.f32 %v352_v7, %v58_v19  ;;  %v82_v31 = vadd.f32 %v352_v7, %v59_v22  ;;  %v83_v32 = vadd.f32 %v352_v7, %v60_v23 }
   0x8   :  { %v92_v29 = vmax.f32 %v76_v20, 0.0  ;;  %v93_v30 = vmax.f32 %v77_v21, 0.0  ;;  %v94_v34 = vmax.f32 %v78_v24, 0.0  ;;  %v95_v35 = vmax.f32 %v79_v25, 0.0 }
   0x9   :  { %v96_v36 = vmax.f32 %v80_v26, 0.0  ;;  %v97_v37 = vmax.f32 %v81_v27, 0.0  ;;  %v98_v40 = vmax.f32 %v82_v31, 0.0  ;;  %v99_v41 = vmax.f32 %v83_v32, 0.0 }
   0xa   :  { %v261_v39 = vpack.c.bf16 %v93_v30, %v92_v29  ;;  %v244_v42 = vunpack.c.l.bf16 %v301_v28  ;;  %v266_v44 = vpack.c.bf16 %v95_v35, %v94_v34  ;;  %v245_v46 = vunpack.c.h.bf16 %v301_v28 }
   0xb   :  { %v271_v45 = vpack.c.bf16 %v97_v37, %v96_v36  ;;  %v248_v47 = vunpack.c.l.bf16 %v302_v33  ;;  %v276_v48 = vpack.c.bf16 %v99_v41, %v98_v40  ;;  %v249_v50 = vunpack.c.h.bf16 %v302_v33 }
   0xc   :  { %262 = vst [vmem:[%s425_s3] sm:$0xff] %v261_v39   ;;  %v61_v49 = vmul.f32 %v244_v42, %v338_v1  ;;  %v252_v51 = vunpack.c.l.bf16 %v303_v38  ;;  %305 = vst [vmem:[%s425_s3 + $0x8] sm:$0xff] %v266_v44   ;;  %v62_v52 = vmul.f32 %v245_v46, %v338_v1  ;;  %v253_v54 = vunpack.c.h.bf16 %v303_v38 }
   0xd   :  { %306 = vst [vmem:[%s425_s3 + $0x10] sm:$0xff] %v271_v45   ;;  %v63_v53 = vmul.f32 %v248_v47, %v338_v1  ;;  %v256_v55 = vunpack.c.l.bf16 %v304_v43  ;;  %307 = vst [vmem:[%s425_s3 + $0x18] sm:$0xff] %v276_v48   ;;  %v64_v57 = vmul.f32 %v249_v50, %v338_v1  ;;  %v257_v59 = vunpack.c.h.bf16 %v304_v43 }
   0xe   :  { %v84_v56 = vadd.f32 %v352_v7, %v61_v49  ;;  %v65_v58 = vmul.f32 %v252_v51, %v338_v1  ;;  %v85_v60 = vadd.f32 %v352_v7, %v62_v52  ;;  %v66_v62 = vmul.f32 %v253_v54, %v338_v1 }
   0xf   :  { %v86_v61 = vadd.f32 %v352_v7, %v63_v53  ;;  %v67_v63 = vmul.f32 %v256_v55, %v338_v1  ;;  %v87_v2 = vadd.f32 %v352_v7, %v64_v57  ;;  %v68_v4 = vmul.f32 %v257_v59, %v338_v1 }
  0x10   :  { %v100_v0 = vmax.f32 %v84_v56, 0.0  ;;  %v88_v3 = vadd.f32 %v352_v7, %v65_v58  ;;  %v101_v5 = vmax.f32 %v85_v60, 0.0  ;;  %v89_v8 = vadd.f32 %v352_v7, %v66_v62 }
  0x11   :  { %v102_v6 = vmax.f32 %v86_v61, 0.0  ;;  %v90_v9 = vadd.f32 %v352_v7, %v67_v63  ;;  %v103_v10 = vmax.f32 %v87_v2, 0.0  ;;  %v91_v12 = vadd.f32 %v352_v7, %v68_v4 }
  0x12   :  { %v104_v11 = vmax.f32 %v88_v3, 0.0  ;;  %v281_v13 = vpack.c.bf16 %v101_v5, %v100_v0  ;;  %v105_v14 = vmax.f32 %v89_v8, 0.0 }
  0x13   :  { %v106_v15 = vmax.f32 %v90_v9, 0.0  ;;  %v286_v16 = vpack.c.bf16 %v103_v10, %v102_v6  ;;  %v107_v17 = vmax.f32 %v91_v12, 0.0 }
  0x14   :  { %308 = vst [vmem:[%s425_s3 + $0x20] sm:$0xff] %v281_v13   ;;  %v291_v1 = vpack.c.bf16 %v105_v14, %v104_v11 }
  0x15   :  { %309 = vst [vmem:[%s425_s3 + $0x28] sm:$0xff] %v286_v16   ;;  %v296_v18 = vpack.c.bf16 %v107_v17, %v106_v15 }
  0x16   :  { %310 = vst [vmem:[%s425_s3 + $0x30] sm:$0xff] %v291_v1  }
  0x17   :  { %311 = vst [vmem:[%s425_s3 + $0x38] sm:$0xff] %v296_v18  }

// kernel: _lambda_.31
= control target key start
LH: loop header
LB: loop body
LE: loop exit
PB: predicated region body
PF: predicated region fallthrough
CT: control target
= control target key end

     0   :  { %s1401_s18 = smov 0   ;;  %s1403_s19 = smov 0   ;;  %s1503_s0 = inlined_call_operand.vmem [shape: bf16[4,128,128], index: 0, kind: input, shape index: {}]   ;;  %s1504_s1 = inlined_call_operand.vmem [shape: bf16[4,128,128], index: 1, kind: input, shape index: {}]   ;;  %s1505_s2 = inlined_call_operand.vmem [shape: f32[1,128], index: 2, kind: input, shape index: {}]   ;;  %s1506_s3 = inlined_call_operand.vmem [shape: bf16[4,128,128], index: 3, kind: output, shape index: {0}]   ;;  %s1507_s4 = inlined_call_operand.vmem [shape: f32[4,8,128], index: 4, kind: output, shape index: {1}]   ;;  %s1508_s5 = inlined_call_operand.vmem [shape: f32[4,8,128], index: 5, kind: output, shape index: {2}]  }
   0x1   :  { %s1405_s20 = smov 0  }
   0x2 LB: > { %s42_s21 = sadd.s32 1, %s1365_s19  ;;  %p1133_p0 = scmp.ge.s32.totalorder %s1369_s20, 1  ;;  %s1369_s20 = sphi %s1405_s20, %s16_s20   ;;  %s1365_s19 = sphi %s1403_s19, %s1510_s19   ;;  %s1361_s18 = sphi %s1401_s18, %s1509_s18  }
   0x3   : > { %p44_p1 = scmp.ge.s32.totalorder %s42_s21, 4  ;;  %p272_p2 = scmp.lt.s32.totalorder %s1369_s20, 5 }
   0x5   : > { %s1512_s21 = smov (%p44_p1, %s42_s21), 0  ;;  %p273_p3 = pnand %p1133_p0, %p272_p2 }
   0x6   : > { %p350_p4 = scmp.lt.s32.totalorder (!%p273_p3), %s1361_s18, 3  ;;  %v1158_v16 = vld [vmem:[%s1505_s2] ss:$0 sm:$0xff] (!%p273_p3) }
   0x7   : > { %276 = sbr.rel (%p273_p3) target bundleno = 312 (0x138), region = 32 }
   0xe   : > { %s1514_s18 = smov (!%p350_p4, %s1361_s18), 3 }
   0xf   : > { %s1422_s22 = sshll.u32 %s1514_s18, 6  ;;  %s1140_s9 = sshll.u32 %s1514_s18, 3 }
  0x10   : > { %s1428_s25 = scalar_lea.vmem %s1504_s1, %s1422_s22  ;;  %s1437_s28 = scalar_lea.vmem %s1503_s0, %s1422_s22 }
  0x11   : > { %v1331_v0 = vld [vmem:[%s1428_s25] sm:$0xff]   ;;  %v1332_v1 = vld [vmem:[%s1428_s25 + $0x8] sm:$0xff]   ;;  %v1333_v2 = vld [vmem:[%s1428_s25 + $0x10] sm:$0xff]   ;;  %s1465_s8 = scalar_lea.vmem %s1506_s3, %s1422_s22  ;;  %s400_s12 = scalar_lea.vmem %s1507_s4, %s1140_s9 }
  0x12   : > { %1259 = vmatprep.subr.bf16.mxu0 %v1331_v0  ;;  %1291 = vmatprep.subr.bf16.mxu1 %v1331_v0  ;;  %v1334_v3 = vld [vmem:[%s1428_s25 + $0x18] sm:$0xff]   ;;  %v1339_v4 = vld [vmem:[%s1437_s28] sm:$0xff]   ;;  %v1336_v7 = vld [vmem:[%s1428_s25 + $0x28] sm:$0xff]   ;;  %s410_s15 = scalar_lea.vmem %s1508_s5, %s1140_s9 }
  0x13   : > { %1260 = vmatpush3.bf16.msra.mxu0 %v1331_v0  ;;  %1299 = vmatpush3.bf16.msra.mxu1 %v1331_v0  ;;  %v1335_v5 = vld [vmem:[%s1428_s25 + $0x20] sm:$0xff]   ;;  %v1337_v8 = vld [vmem:[%s1428_s25 + $0x30] sm:$0xff]   ;;  %v1338_v9 = vld [vmem:[%s1428_s25 + $0x38] sm:$0xff]  }
  0x14   : > { %1261 = vmatprep.subr.bf16.mxu0 %v1332_v1  ;;  %1292 = vmatprep.subr.bf16.mxu1 %v1332_v1  ;;  %v1343_v6 = vld [vmem:[%s1437_s28 + $0x20] sm:$0xff]   ;;  %v1340_v10 = vld [vmem:[%s1437_s28 + $0x8] sm:$0xff]   ;;  %v1341_v12 = vld [vmem:[%s1437_s28 + $0x10] sm:$0xff]  }
  0x15   : > { %1275 = vmatprep.mubr.bf16.mxu0 %v1339_v4  ;;  %1283 = vmatprep.mubr.bf16.mxu1 %v1343_v6  ;;  %v1344_v11 = vld [vmem:[%s1437_s28 + $0x28] sm:$0xff]   ;;  %v1345_v13 = vld [vmem:[%s1437_s28 + $0x30] sm:$0xff]   ;;  %v1342_v14 = vld [vmem:[%s1437_s28 + $0x18] sm:$0xff]  }
  0x16   : > { %v1346_v15 = vld [vmem:[%s1437_s28 + $0x38] sm:$0xff]  }
  0x17   : > { %1262 = vmatpush3.bf16.msra.mxu0 %v1332_v1  ;;  %1300 = vmatpush3.bf16.msra.mxu1 %v1332_v1 }
  0x18   : > { %1263 = vmatprep.subr.bf16.mxu0 %v1333_v2  ;;  %1293 = vmatprep.subr.bf16.mxu1 %v1333_v2 }
  0x1b   : > { %1264 = vmatpush3.bf16.msra.mxu0 %v1333_v2  ;;  %1301 = vmatpush3.bf16.msra.mxu1 %v1333_v2 }
  0x1c   : > { %1265 = vmatprep.subr.bf16.mxu0 %v1334_v3  ;;  %1294 = vmatprep.subr.bf16.mxu1 %v1334_v3 }
  0x1f   : > { %1266 = vmatpush3.bf16.msra.mxu0 %v1334_v3  ;;  %1302 = vmatpush3.bf16.msra.mxu1 %v1334_v3 }
  0x20   : > { %1267 = vmatprep.subr.bf16.mxu0 %v1335_v5  ;;  %1295 = vmatprep.subr.bf16.mxu1 %v1335_v5 }
  0x23   : > { %1268 = vmatpush3.bf16.msra.mxu0 %v1335_v5  ;;  %1303 = vmatpush3.bf16.msra.mxu1 %v1335_v5 }
  0x24   : > { %1269 = vmatprep.subr.bf16.mxu0 %v1336_v7  ;;  %1296 = vmatprep.subr.bf16.mxu1 %v1336_v7 }
  0x27   : > { %1270 = vmatpush3.bf16.msra.mxu0 %v1336_v7  ;;  %1304 = vmatpush3.bf16.msra.mxu1 %v1336_v7 }
  0x28   : > { %1271 = vmatprep.subr.bf16.mxu0 %v1337_v8  ;;  %1297 = vmatprep.subr.bf16.mxu1 %v1337_v8 }
  0x2b   : > { %1272 = vmatpush3.bf16.msra.mxu0 %v1337_v8  ;;  %1305 = vmatpush3.bf16.msra.mxu1 %v1337_v8 }
  0x2c   : > { %1273 = vmatprep.subr.bf16.mxu0 %v1338_v9  ;;  %1298 = vmatprep.subr.bf16.mxu1 %v1338_v9 }
  0x2f   : > { %1274 = vmatpush3.bf16.msra.mxu0 %v1338_v9  ;;  %1306 = vmatpush3.bf16.msra.mxu1 %v1338_v9 }
  0x32   : > { %1276 = vmatmul.mubr.bf16.vlgmr.msra.gmra.mrb[0].mxu0 %v1340_v10  ;;  %1284 = vmatmul.mubr.bf16.vlgmr.msra.gmra.mrb[0].mxu1 %v1344_v11 }
  0x33   : > { %1279 = vmatprep.mubr.bf16.mxu0 %v1341_v12  ;;  %1287 = vmatprep.mubr.bf16.mxu1 %v1345_v13 }
  0x3a   : > { %1280 = vmatmul.mubr.bf16.gmra.mrb[4].mxu0 %v1342_v14  ;;  %1288 = vmatmul.mubr.bf16.gmra.mrb[4].mxu1 %v1346_v15 }
 0x105   : > { %v1277_v17 = vpop.f32.mrb[0].mxu0  ;;  %v1285_v18 = vpop.f32.mrb[0].mxu1 }
 0x106   : > { %v610_v19 = vpop.f32.mrb[1].mxu0  ;;  %v1455_v20 = vadd.f32 %v1285_v18, %v1158_v16  ;;  %v642_v21 = vpop.f32.mrb[1].mxu1  ;;  %v733_v26 = vadd.f32 %v1277_v17, %v1158_v16 }
 0x107   : > { %v731_v22 = vadd.f32 %v1158_v16, %v610_v19  ;;  %v1278_v23 = vpop.f32.mrb[2].mxu0  ;;  %v1457_v24 = vadd.f32 %v1158_v16, %v642_v21  ;;  %v1286_v25 = vpop.f32.mrb[2].mxu1 }
 0x108   : > { %v734_v27 = vadd.f32 %v1278_v23, %v1158_v16  ;;  %v613_v28 = vpop.f32.mrb[3].mxu0  ;;  %v1459_v29 = vadd.f32 %v1286_v25, %v1158_v16  ;;  %v645_v30 = vpop.f32.mrb[3].mxu1  ;;  %v850_v40 = vmul.f32 %v733_v26, %v733_v26 }
 0x109   : > { %v732_v31 = vadd.f32 %v1158_v16, %v613_v28  ;;  %v740_v32 = vadd.f32 %v1158_v16, %v645_v30  ;;  %v848_v33 = vmul.f32 %v731_v22, %v731_v22  ;;  %v856_v14 = vmul.f32 %v1457_v24, %v1457_v24 }
 0x10a   : > { %v1204_v34 = vpack.c.bf16 %v734_v27, %v733_v26  ;;  %v1224_v35 = vpack.c.bf16 %v1459_v29, %v1455_v20  ;;  %v851_v48 = vmul.f32 %v734_v27, %v734_v27  ;;  %v859_v25 = vmul.f32 %v1459_v29, %v1459_v29 }
 0x10b   : > { %v1199_v36 = vpack.c.bf16 %v732_v31, %v731_v22  ;;  %v827_v37 = vadd.f32 %v732_v31, %v731_v22  ;;  %v849_v38 = vmul.f32 %v732_v31, %v732_v31  ;;  %v1219_v39 = vpack.c.bf16 %v740_v32, %v1457_v24 }
 0x10c   : > { %1236 = vst [vmem:[%s1465_s8 + $0x8] sm:$0xff] %v1204_v34   ;;  %1240 = vst [vmem:[%s1465_s8 + $0x28] sm:$0xff] %v1224_v35   ;;  %v857_v21 = vmul.f32 %v740_v32, %v740_v32 }
 0x10d   : > { %1200 = vst [vmem:[%s1465_s8] sm:$0xff] %v1199_v36   ;;  %v828_v41 = vadd.f32 %v827_v37, %v733_v26  ;;  %v864_v42 = vadd.f32 %v849_v38, %v848_v33  ;;  %v1281_v43 = vpop.f32.mrb[4].mxu0  ;;  %1239 = vst [vmem:[%s1465_s8 + $0x20] sm:$0xff] %v1219_v39   ;;  %v1289_v44 = vpop.f32.mrb[4].mxu1 }
 0x10e   : > { %v626_v45 = vpop.f32.mrb[5].mxu0  ;;  %v745_v46 = vadd.f32 %v1289_v44, %v1158_v16  ;;  %v658_v47 = vpop.f32.mrb[5].mxu1  ;;  %v737_v54 = vadd.f32 %v1281_v43, %v1158_v16 }
 0x10f   : > { %v865_v49 = vadd.f32 %v864_v42, %v850_v40  ;;  %v735_v50 = vadd.f32 %v1158_v16, %v626_v45  ;;  %v829_v51 = vadd.f32 %v828_v41, %v734_v27  ;;  %v1282_v52 = vpop.f32.mrb[6].mxu0  ;;  %v1290_v53 = vpop.f32.mrb[6].mxu1  ;;  %v743_v0 = vadd.f32 %v1158_v16, %v658_v47 }
 0x110   : > { %v738_v55 = vadd.f32 %v1282_v52, %v1158_v16  ;;  %v629_v56 = vpop.f32.mrb[7].mxu0  ;;  %v746_v57 = vadd.f32 %v1290_v53, %v1158_v16  ;;  %v661_v58 = vpop.f32.mrb[7].mxu1  ;;  %v854_v7 = vmul.f32 %v737_v54, %v737_v54 }
 0x111   : > { %v830_v59 = vadd.f32 %v829_v51, %v735_v50  ;;  %v852_v60 = vmul.f32 %v735_v50, %v735_v50  ;;  %v866_v61 = vadd.f32 %v865_v49, %v851_v48  ;;  %v736_v62 = vadd.f32 %v1158_v16, %v629_v56 }
 0x112   : > { %v1214_v63 = vpack.c.bf16 %v738_v55, %v737_v54  ;;  %v1234_v1 = vpack.c.bf16 %v746_v57, %v745_v46  ;;  %v744_v6 = vadd.f32 %v1158_v16, %v661_v58  ;;  %v855_v11 = vmul.f32 %v738_v55, %v738_v55 }
 0x113   : > { %v867_v2 = vadd.f32 %v866_v61, %v852_v60  ;;  %v1209_v3 = vpack.c.bf16 %v736_v62, %v735_v50  ;;  %v831_v4 = vadd.f32 %v830_v59, %v736_v62  ;;  %v853_v5 = vmul.f32 %v736_v62, %v736_v62 }
 0x114   : > { %1238 = vst [vmem:[%s1465_s8 + $0x18] sm:$0xff] %v1214_v63   ;;  %1242 = vst [vmem:[%s1465_s8 + $0x38] sm:$0xff] %v1234_v1   ;;  %v1229_v10 = vpack.c.bf16 %v744_v6, %v743_v0  ;;  %v858_v16 = vmul.f32 %v1455_v20, %v1455_v20  ;;  %v860_v28 = vmul.f32 %v743_v0, %v743_v0 }
 0x115   : > { %1237 = vst [vmem:[%s1465_s8 + $0x10] sm:$0xff] %v1209_v3   ;;  %v832_v8 = vadd.f32 %v831_v4, %v737_v54  ;;  %v868_v9 = vadd.f32 %v867_v2, %v853_v5  ;;  %v861_v34 = vmul.f32 %v744_v6, %v744_v6  ;;  %v863_v37 = vmul.f32 %v746_v57, %v746_v57 }
 0x116   : > { %1241 = vst [vmem:[%s1465_s8 + $0x30] sm:$0xff] %v1229_v10  }
 0x117   : > { %v869_v12 = vadd.f32 %v868_v9, %v854_v7  ;;  %v833_v13 = vadd.f32 %v832_v8, %v738_v55 }
 0x119   : > { %v834_v15 = vadd.f32 %v833_v13, %v1457_v24  ;;  %v870_v17 = vadd.f32 %v869_v12, %v855_v11 }
 0x11b   : > { %v871_v18 = vadd.f32 %v870_v17, %v856_v14  ;;  %v835_v19 = vadd.f32 %v834_v15, %v740_v32  ;;  %v862_v32 = vmul.f32 %v745_v46, %v745_v46 }
 0x11d   : > { %v836_v22 = vadd.f32 %v835_v19, %v1455_v20  ;;  %v872_v23 = vadd.f32 %v871_v18, %v857_v21 }
 0x11f   : > { %v873_v26 = vadd.f32 %v872_v23, %v858_v16  ;;  %v837_v27 = vadd.f32 %v836_v22, %v1459_v29 }
 0x121   : > { %v838_v30 = vadd.f32 %v837_v27, %v743_v0  ;;  %v874_v31 = vadd.f32 %v873_v26, %v859_v25 }
 0x123   : > { %v875_v24 = vadd.f32 %v874_v31, %v860_v28  ;;  %v839_v33 = vadd.f32 %v838_v30, %v744_v6 }
 0x125   : > { %v840_v35 = vadd.f32 %v839_v33, %v745_v46  ;;  %v876_v36 = vadd.f32 %v875_v24, %v861_v34 }
 0x127   : > { %v841_v38 = vadd.f32 %v840_v35, %v746_v57  ;;  %v877_v20 = vadd.f32 %v876_v36, %v862_v32 }
 0x129   : > { %v842_v39 = vrot.slane %v841_v38, 4  ;;  %v878_v40 = vadd.f32 %v877_v20, %v863_v37 }
 0x12b   : > { %v843_v41 = vadd.f32 %v842_v39, %v841_v38  ;;  %v879_v42 = vrot.slane %v878_v40, 4 }
 0x12d   : > { %v844_v43 = vrot.slane %v843_v41, 2  ;;  %v880_v44 = vadd.f32 %v879_v42, %v878_v40 }
 0x12f   : > { %v845_v29 = vadd.f32 %v844_v43, %v843_v41  ;;  %v881_v45 = vrot.slane %v880_v44, 2 }
 0x131   : > { %v846_v47 = vrot.slane %v845_v29, 1  ;;  %v882_v48 = vadd.f32 %v881_v45, %v880_v44 }
 0x133   : > { %v847_v46 = vadd.f32 %v846_v47, %v845_v29  ;;  %v883_v49 = vrot.slane %v882_v48, 1 }
 0x135   : > { %v884_v50 = vadd.f32 %v883_v49, %v882_v48  ;;  %885 = vst [vmem:[%s400_s12] sm:$0xff] %v847_v46 }
 0x137   : > { %886 = vst [vmem:[%s410_s15] sm:$0xff] %v884_v50 }
 0x138 PF: > { %s16_s20 = sadd.s32 1, %s1369_s20   ;;  %s1509_s18 = smov %s1365_s19 }
 0x139   : > { %p13_p5 = scmp.ge.s32.totalorder %s16_s20, 6   ;;  %s1510_s19 = smov %s1512_s21 }
 0x13b   :  { %15 = sbr.rel (!%p13_p5) target bundleno = 2 (0x2), region = 100 }

// kernel: _lambda_.32
= control target key start
LH: loop header
LB: loop body
LE: loop exit
PB: predicated region body
PF: predicated region fallthrough
CT: control target
= control target key end

     0   :  { %s1502_s0 = inlined_call_operand.vmem [shape: bf16[512,128], index: 0, kind: input, shape index: {}]   ;;  %s1503_s1 = inlined_call_operand.vmem [shape: f32[1,128], index: 1, kind: input, shape index: {}]   ;;  %s1504_s2 = inlined_call_operand.vmem [shape: f32[1,128], index: 2, kind: input, shape index: {}]   ;;  %s1505_s3 = inlined_call_operand.vmem [shape: bf16[512,128], index: 3, kind: output, shape index: {}]  }
   0x1   :  { %v803_v0 = vld [vmem:[%s1502_s0] sm:$0xff]   ;;  %v1090_v4 = vld [vmem:[%s1502_s0 + $0x8] sm:$0xff]   ;;  %v1091_v5 = vld [vmem:[%s1502_s0 + $0x10] sm:$0xff]  }
   0x2   :  { %v1178_v1 = vld [vmem:[%s1503_s1] ss:$0 sm:$0xff]  ;;  %v804_v2 = vunpack.c.l.bf16 %v803_v0  ;;  %v805_v3 = vunpack.c.h.bf16 %v803_v0  ;;  %v1092_v6 = vld [vmem:[%s1502_s0 + $0x18] sm:$0xff]   ;;  %v808_v8 = vunpack.c.l.bf16 %v1090_v4  ;;  %v809_v9 = vunpack.c.h.bf16 %v1090_v4  ;;  %v1094_v33 = vld [vmem:[%s1502_s0 + $0x28] sm:$0xff]  }
   0x3   :  { %v1192_v7 = vld [vmem:[%s1504_s2] ss:$0 sm:$0xff]  ;;  %v812_v10 = vunpack.c.l.bf16 %v1091_v5  ;;  %v813_v11 = vunpack.c.h.bf16 %v1091_v5  ;;  %v816_v14 = vunpack.c.l.bf16 %v1092_v6  ;;  %v817_v15 = vunpack.c.h.bf16 %v1092_v6  ;;  %v1095_v38 = vld [vmem:[%s1502_s0 + $0x30] sm:$0xff]   ;;  %v1096_v43 = vld [vmem:[%s1502_s0 + $0x38] sm:$0xff]  }
   0x4   :  { %v149_v12 = vmul.f32 %v804_v2, %v1178_v1  ;;  %v150_v13 = vmul.f32 %v805_v3, %v1178_v1  ;;  %v151_v16 = vmul.f32 %v808_v8, %v1178_v1  ;;  %v152_v17 = vmul.f32 %v809_v9, %v1178_v1  ;;  %v1093_v28 = vld [vmem:[%s1502_s0 + $0x20] sm:$0xff]  }
   0x5   :  { %v153_v18 = vmul.f32 %v812_v10, %v1178_v1  ;;  %v154_v19 = vmul.f32 %v813_v11, %v1178_v1  ;;  %v155_v22 = vmul.f32 %v816_v14, %v1178_v1  ;;  %v156_v23 = vmul.f32 %v817_v15, %v1178_v1  ;;  %v1097_v0 = vld [vmem:[%s1502_s0 + $0x40] sm:$0xff]   ;;  %v1098_v11 = vld [vmem:[%s1502_s0 + $0x48] sm:$0xff]  }
   0x6   :  { %v220_v20 = vadd.f32 %v1192_v7, %v149_v12  ;;  %v221_v21 = vadd.f32 %v1192_v7, %v150_v13  ;;  %v222_v24 = vadd.f32 %v1192_v7, %v151_v16  ;;  %v223_v25 = vadd.f32 %v1192_v7, %v152_v17  ;;  %v1099_v16 = vld [vmem:[%s1502_s0 + $0x50] sm:$0xff]  }
   0x7   :  { %v224_v26 = vadd.f32 %v1192_v7, %v153_v18  ;;  %v225_v27 = vadd.f32 %v1192_v7, %v154_v19  ;;  %v226_v31 = vadd.f32 %v1192_v7, %v155_v22  ;;  %v227_v32 = vadd.f32 %v1192_v7, %v156_v23 }
   0x8   :  { %v284_v29 = vmax.f32 %v220_v20, 0.0  ;;  %v285_v30 = vmax.f32 %v221_v21, 0.0  ;;  %v286_v34 = vmax.f32 %v222_v24, 0.0  ;;  %v287_v35 = vmax.f32 %v223_v25, 0.0  ;;  %v1100_v25 = vld [vmem:[%s1502_s0 + $0x58] sm:$0xff]  }
   0x9   :  { %v288_v36 = vmax.f32 %v224_v26, 0.0  ;;  %v289_v37 = vmax.f32 %v225_v27, 0.0  ;;  %v290_v40 = vmax.f32 %v226_v31, 0.0  ;;  %v291_v41 = vmax.f32 %v227_v32, 0.0 }
   0xa   :  { %v933_v39 = vpack.c.bf16 %v285_v30, %v284_v29  ;;  %v820_v42 = vunpack.c.l.bf16 %v1093_v28  ;;  %v938_v44 = vpack.c.bf16 %v287_v35, %v286_v34  ;;  %v821_v46 = vunpack.c.h.bf16 %v1093_v28 }
   0xb   :  { %v943_v45 = vpack.c.bf16 %v289_v37, %v288_v36  ;;  %v824_v47 = vunpack.c.l.bf16 %v1094_v33  ;;  %v948_v48 = vpack.c.bf16 %v291_v41, %v290_v40  ;;  %v825_v50 = vunpack.c.h.bf16 %v1094_v33 }
   0xc   :  { %934 = vst [vmem:[%s1505_s3] sm:$0xff] %v933_v39   ;;  %v157_v49 = vmul.f32 %v820_v42, %v1178_v1  ;;  %v828_v51 = vunpack.c.l.bf16 %v1095_v38  ;;  %1121 = vst [vmem:[%s1505_s3 + $0x8] sm:$0xff] %v938_v44   ;;  %v158_v52 = vmul.f32 %v821_v46, %v1178_v1  ;;  %v829_v54 = vunpack.c.h.bf16 %v1095_v38  ;;  %v1101_v38 = vld [vmem:[%s1502_s0 + $0x60] sm:$0xff]  }
   0xd   :  { %1122 = vst [vmem:[%s1505_s3 + $0x10] sm:$0xff] %v943_v45   ;;  %v159_v53 = vmul.f32 %v824_v47, %v1178_v1  ;;  %v832_v55 = vunpack.c.l.bf16 %v1096_v43  ;;  %1123 = vst [vmem:[%s1505_s3 + $0x18] sm:$0xff] %v948_v48   ;;  %v160_v57 = vmul.f32 %v825_v50, %v1178_v1  ;;  %v833_v59 = vunpack.c.h.bf16 %v1096_v43 }
   0xe   :  { %v228_v56 = vadd.f32 %v1192_v7, %v157_v49  ;;  %v161_v58 = vmul.f32 %v828_v51, %v1178_v1  ;;  %v229_v60 = vadd.f32 %v1192_v7, %v158_v52  ;;  %v162_v62 = vmul.f32 %v829_v54, %v1178_v1  ;;  %v1102_v51 = vld [vmem:[%s1502_s0 + $0x68] sm:$0xff]  }
   0xf   :  { %v230_v61 = vadd.f32 %v1192_v7, %v159_v53  ;;  %v163_v63 = vmul.f32 %v832_v55, %v1178_v1  ;;  %v231_v3 = vadd.f32 %v1192_v7, %v160_v57  ;;  %v164_v5 = vmul.f32 %v833_v59, %v1178_v1 }
  0x10   :  { %v292_v2 = vmax.f32 %v228_v56, 0.0  ;;  %v232_v4 = vadd.f32 %v1192_v7, %v161_v58  ;;  %v293_v6 = vmax.f32 %v229_v60, 0.0  ;;  %v233_v9 = vadd.f32 %v1192_v7, %v162_v62  ;;  %v1103_v60 = vld [vmem:[%s1502_s0 + $0x70] sm:$0xff]  }
  0x11   :  { %v294_v8 = vmax.f32 %v230_v61, 0.0  ;;  %v234_v10 = vadd.f32 %v1192_v7, %v163_v63  ;;  %v295_v12 = vmax.f32 %v231_v3, 0.0  ;;  %v235_v14 = vadd.f32 %v1192_v7, %v164_v5 }
  0x12   :  { %v296_v13 = vmax.f32 %v232_v4, 0.0  ;;  %v836_v15 = vunpack.c.l.bf16 %v1097_v0  ;;  %v953_v17 = vpack.c.bf16 %v293_v6, %v292_v2  ;;  %v297_v18 = vmax.f32 %v233_v9, 0.0  ;;  %v1104_v2 = vld [vmem:[%s1502_s0 + $0x78] sm:$0xff]  }
  0x13   :  { %v298_v19 = vmax.f32 %v234_v10, 0.0  ;;  %v837_v20 = vunpack.c.h.bf16 %v1097_v0  ;;  %v958_v21 = vpack.c.bf16 %v295_v12, %v294_v8  ;;  %v299_v22 = vmax.f32 %v235_v14, 0.0  ;;  %v1105_v12 = vld [vmem:[%s1502_s0 + $0x80] sm:$0xff]  }
  0x14   :  { %v165_v23 = vmul.f32 %v836_v15, %v1178_v1  ;;  %v840_v24 = vunpack.c.l.bf16 %v1098_v11  ;;  %1124 = vst [vmem:[%s1505_s3 + $0x20] sm:$0xff] %v953_v17   ;;  %v963_v26 = vpack.c.bf16 %v297_v18, %v296_v13  ;;  %v841_v28 = vunpack.c.h.bf16 %v1098_v11 }
  0x15   :  { %v166_v27 = vmul.f32 %v837_v20, %v1178_v1  ;;  %v844_v29 = vunpack.c.l.bf16 %v1099_v16  ;;  %1125 = vst [vmem:[%s1505_s3 + $0x28] sm:$0xff] %v958_v21   ;;  %v968_v30 = vpack.c.bf16 %v299_v22, %v298_v19  ;;  %v845_v33 = vunpack.c.h.bf16 %v1099_v16 }
  0x16   :  { %v236_v31 = vadd.f32 %v1192_v7, %v165_v23  ;;  %v167_v32 = vmul.f32 %v840_v24, %v1178_v1  ;;  %1126 = vst [vmem:[%s1505_s3 + $0x30] sm:$0xff] %v963_v26   ;;  %v168_v35 = vmul.f32 %v841_v28, %v1178_v1  ;;  %v848_v37 = vunpack.c.l.bf16 %v1100_v25 }
  0x17   :  { %v237_v34 = vadd.f32 %v1192_v7, %v166_v27  ;;  %v169_v36 = vmul.f32 %v844_v29, %v1178_v1  ;;  %1127 = vst [vmem:[%s1505_s3 + $0x38] sm:$0xff] %v968_v30   ;;  %v170_v41 = vmul.f32 %v845_v33, %v1178_v1  ;;  %v849_v42 = vunpack.c.h.bf16 %v1100_v25  ;;  %v1106_v29 = vld [vmem:[%s1502_s0 + $0x88] sm:$0xff]  }
  0x18   :  { %v300_v39 = vmax.f32 %v236_v31, 0.0  ;;  %v238_v40 = vadd.f32 %v1192_v7, %v167_v32  ;;  %v239_v44 = vadd.f32 %v1192_v7, %v168_v35  ;;  %v171_v46 = vmul.f32 %v848_v37, %v1178_v1 }
  0x19   :  { %v301_v43 = vmax.f32 %v237_v34, 0.0  ;;  %v240_v45 = vadd.f32 %v1192_v7, %v169_v36  ;;  %v241_v48 = vadd.f32 %v1192_v7, %v170_v41  ;;  %v172_v49 = vmul.f32 %v849_v42, %v1178_v1  ;;  %v1107_v34 = vld [vmem:[%s1502_s0 + $0x90] sm:$0xff]  }
  0x1a   :  { %v302_v47 = vmax.f32 %v238_v40, 0.0  ;;  %v852_v50 = vunpack.c.l.bf16 %v1101_v38  ;;  %v303_v53 = vmax.f32 %v239_v44, 0.0  ;;  %v242_v55 = vadd.f32 %v1192_v7, %v171_v46 }
  0x1b   :  { %v973_v52 = vpack.c.bf16 %v301_v43, %v300_v39  ;;  %v304_v54 = vmax.f32 %v240_v45, 0.0  ;;  %v305_v56 = vmax.f32 %v241_v48, 0.0  ;;  %v243_v57 = vadd.f32 %v1192_v7, %v172_v49  ;;  %v1108_v43 = vld [vmem:[%s1502_s0 + $0x98] sm:$0xff]  }
  0x1c   :  { %v853_v58 = vunpack.c.h.bf16 %v1101_v38  ;;  %v173_v59 = vmul.f32 %v852_v50, %v1178_v1  ;;  %v978_v61 = vpack.c.bf16 %v303_v53, %v302_v47  ;;  %v306_v62 = vmax.f32 %v242_v55, 0.0 }
  0x1d   :  { %1128 = vst [vmem:[%s1505_s3 + $0x40] sm:$0xff] %v973_v52   ;;  %v856_v63 = vunpack.c.l.bf16 %v1102_v51  ;;  %v857_v0 = vunpack.c.h.bf16 %v1102_v51  ;;  %v983_v3 = vpack.c.bf16 %v305_v56, %v304_v54  ;;  %v307_v4 = vmax.f32 %v243_v57, 0.0  ;;  %v1109_v56 = vld [vmem:[%s1502_s0 + $0xa0] sm:$0xff]  }
  0x1e   :  { %v174_v5 = vmul.f32 %v853_v58, %v1178_v1  ;;  %v244_v6 = vadd.f32 %v1192_v7, %v173_v59  ;;  %1129 = vst [vmem:[%s1505_s3 + $0x48] sm:$0xff] %v978_v61   ;;  %v860_v10 = vunpack.c.l.bf16 %v1103_v60  ;;  %v861_v11 = vunpack.c.h.bf16 %v1103_v60 }
  0x1f   :  { %v175_v8 = vmul.f32 %v856_v63, %v1178_v1  ;;  %v176_v9 = vmul.f32 %v857_v0, %v1178_v1  ;;  %1130 = vst [vmem:[%s1505_s3 + $0x50] sm:$0xff] %v983_v3   ;;  %v988_v13 = vpack.c.bf16 %v307_v4, %v306_v62  ;;  %v864_v16 = vunpack.c.l.bf16 %v1104_v2 }
  0x20   :  { %v245_v14 = vadd.f32 %v1192_v7, %v174_v5  ;;  %v308_v15 = vmax.f32 %v244_v6, 0.0  ;;  %v177_v19 = vmul.f32 %v860_v10, %v1178_v1  ;;  %v178_v20 = vmul.f32 %v861_v11, %v1178_v1 }
  0x21   :  { %v246_v17 = vadd.f32 %v1192_v7, %v175_v8  ;;  %v247_v18 = vadd.f32 %v1192_v7, %v176_v9  ;;  %1131 = vst [vmem:[%s1505_s3 + $0x58] sm:$0xff] %v988_v13   ;;  %v865_v22 = vunpack.c.h.bf16 %v1104_v2  ;;  %v179_v23 = vmul.f32 %v864_v16, %v1178_v1  ;;  %v1110_v2 = vld [vmem:[%s1502_s0 + $0xa8] sm:$0xff]   ;;  %v1111_v16 = vld [vmem:[%s1502_s0 + $0xb0] sm:$0xff]  }
  0x22   :  { %v309_v21 = vmax.f32 %v245_v14, 0.0  ;;  %v868_v24 = vunpack.c.l.bf16 %v1105_v12  ;;  %v248_v27 = vadd.f32 %v1192_v7, %v177_v19  ;;  %v249_v28 = vadd.f32 %v1192_v7, %v178_v20 }
  0x23   :  { %v310_v25 = vmax.f32 %v246_v17, 0.0  ;;  %v311_v26 = vmax.f32 %v247_v18, 0.0  ;;  %v180_v31 = vmul.f32 %v865_v22, %v1178_v1  ;;  %v250_v32 = vadd.f32 %v1192_v7, %v179_v23 }
  0x24   :  { %v993_v30 = vpack.c.bf16 %v309_v21, %v308_v15  ;;  %v869_v33 = vunpack.c.h.bf16 %v1105_v12  ;;  %v312_v36 = vmax.f32 %v248_v27, 0.0  ;;  %v313_v37 = vmax.f32 %v249_v28, 0.0  ;;  %v1112_v21 = vld [vmem:[%s1502_s0 + $0xb8] sm:$0xff]  }
  0x25   :  { %v998_v35 = vpack.c.bf16 %v311_v26, %v310_v25  ;;  %v181_v38 = vmul.f32 %v868_v24, %v1178_v1  ;;  %v251_v39 = vadd.f32 %v1192_v7, %v180_v31  ;;  %v314_v40 = vmax.f32 %v250_v32, 0.0 }
  0x26   :  { %1132 = vst [vmem:[%s1505_s3 + $0x60] sm:$0xff] %v993_v30   ;;  %v182_v41 = vmul.f32 %v869_v33, %v1178_v1  ;;  %v872_v42 = vunpack.c.l.bf16 %v1106_v29  ;;  %v1003_v44 = vpack.c.bf16 %v313_v37, %v312_v36  ;;  %v873_v46 = vunpack.c.h.bf16 %v1106_v29 }
  0x27   :  { %1133 = vst [vmem:[%s1505_s3 + $0x68] sm:$0xff] %v998_v35   ;;  %v252_v45 = vadd.f32 %v1192_v7, %v181_v38  ;;  %v876_v47 = vunpack.c.l.bf16 %v1107_v34  ;;  %v315_v48 = vmax.f32 %v251_v39, 0.0  ;;  %v877_v51 = vunpack.c.h.bf16 %v1107_v34  ;;  %v1113_v34 = vld [vmem:[%s1502_s0 + $0xc0] sm:$0xff]  }
  0x28   :  { %v253_v49 = vadd.f32 %v1192_v7, %v182_v41  ;;  %v183_v50 = vmul.f32 %v872_v42, %v1178_v1  ;;  %1134 = vst [vmem:[%s1505_s3 + $0x70] sm:$0xff] %v1003_v44   ;;  %v184_v53 = vmul.f32 %v873_v46, %v1178_v1  ;;  %v880_v55 = vunpack.c.l.bf16 %v1108_v43 }
  0x29   :  { %v316_v52 = vmax.f32 %v252_v45, 0.0  ;;  %v185_v54 = vmul.f32 %v876_v47, %v1178_v1  ;;  %v1008_v57 = vpack.c.bf16 %v315_v48, %v314_v40  ;;  %v186_v60 = vmul.f32 %v877_v51, %v1178_v1  ;;  %v1114_v47 = vld [vmem:[%s1502_s0 + $0xc8] sm:$0xff]  }
  0x2a   :  { %v317_v58 = vmax.f32 %v253_v49, 0.0  ;;  %v254_v59 = vadd.f32 %v1192_v7, %v183_v50  ;;  %v255_v61 = vadd.f32 %v1192_v7, %v184_v53  ;;  %v881_v63 = vunpack.c.h.bf16 %v1108_v43 }
  0x2b   :  { %v256_v62 = vadd.f32 %v1192_v7, %v185_v54  ;;  %v187_v0 = vmul.f32 %v880_v55, %v1178_v1  ;;  %1135 = vst [vmem:[%s1505_s3 + $0x78] sm:$0xff] %v1008_v57   ;;  %v257_v5 = vadd.f32 %v1192_v7, %v186_v60  ;;  %v884_v6 = vunpack.c.l.bf16 %v1109_v56 }
  0x2c   :  { %v1013_v3 = vpack.c.bf16 %v317_v58, %v316_v52  ;;  %v318_v4 = vmax.f32 %v254_v59, 0.0  ;;  %v319_v8 = vmax.f32 %v255_v61, 0.0  ;;  %v188_v10 = vmul.f32 %v881_v63, %v1178_v1  ;;  %v1115_v52 = vld [vmem:[%s1502_s0 + $0xd0] sm:$0xff]   ;;  %v1116_v61 = vld [vmem:[%s1502_s0 + $0xd8] sm:$0xff]  }
  0x2d   :  { %v320_v9 = vmax.f32 %v256_v62, 0.0  ;;  %v258_v11 = vadd.f32 %v1192_v7, %v187_v0  ;;  %v321_v12 = vmax.f32 %v257_v5, 0.0  ;;  %v885_v13 = vunpack.c.h.bf16 %v1109_v56 }
  0x2e   :  { %1136 = vst [vmem:[%s1505_s3 + $0x80] sm:$0xff] %v1013_v3   ;;  %v189_v14 = vmul.f32 %v884_v6, %v1178_v1  ;;  %v888_v15 = vunpack.c.l.bf16 %v1110_v2  ;;  %v1018_v17 = vpack.c.bf16 %v319_v8, %v318_v4  ;;  %v259_v18 = vadd.f32 %v1192_v7, %v188_v10 }
  0x2f   :  { %v322_v19 = vmax.f32 %v258_v11, 0.0  ;;  %v889_v20 = vunpack.c.h.bf16 %v1110_v2  ;;  %v1023_v22 = vpack.c.bf16 %v321_v12, %v320_v9  ;;  %v190_v23 = vmul.f32 %v885_v13, %v1178_v1  ;;  %v1117_v12 = vld [vmem:[%s1502_s0 + $0xe0] sm:$0xff]  }
  0x30   :  { %v260_v24 = vadd.f32 %v1192_v7, %v189_v14  ;;  %v191_v25 = vmul.f32 %v888_v15, %v1178_v1  ;;  %1137 = vst [vmem:[%s1505_s3 + $0x88] sm:$0xff] %v1018_v17   ;;  %v323_v26 = vmax.f32 %v259_v18, 0.0  ;;  %v892_v28 = vunpack.c.l.bf16 %v1111_v16 }
  0x31   :  { %v192_v27 = vmul.f32 %v889_v20, %v1178_v1  ;;  %v893_v29 = vunpack.c.h.bf16 %v1111_v16  ;;  %1138 = vst [vmem:[%s1505_s3 + $0x90] sm:$0xff] %v1023_v22   ;;  %v261_v30 = vadd.f32 %v1192_v7, %v190_v23  ;;  %v896_v33 = vunpack.c.l.bf16 %v1112_v21 }
  0x32   :  { %v324_v31 = vmax.f32 %v260_v24, 0.0  ;;  %v262_v32 = vadd.f32 %v1192_v7, %v191_v25  ;;  %v1028_v35 = vpack.c.bf16 %v323_v26, %v322_v19  ;;  %v193_v37 = vmul.f32 %v892_v28, %v1178_v1 }
  0x33   :  { %v263_v36 = vadd.f32 %v1192_v7, %v192_v27  ;;  %v194_v38 = vmul.f32 %v893_v29, %v1178_v1  ;;  %v325_v39 = vmax.f32 %v261_v30, 0.0  ;;  %v897_v41 = vunpack.c.h.bf16 %v1112_v21  ;;  %v1118_v21 = vld [vmem:[%s1502_s0 + $0xe8] sm:$0xff]  }
  0x34   :  { %v326_v40 = vmax.f32 %v262_v32, 0.0  ;;  %v195_v42 = vmul.f32 %v896_v33, %v1178_v1  ;;  %1139 = vst [vmem:[%s1505_s3 + $0x98] sm:$0xff] %v1028_v35   ;;  %v264_v44 = vadd.f32 %v1192_v7, %v193_v37  ;;  %v900_v46 = vunpack.c.l.bf16 %v1113_v34 }
  0x35   :  { %v327_v43 = vmax.f32 %v263_v36, 0.0  ;;  %v265_v45 = vadd.f32 %v1192_v7, %v194_v38  ;;  %v1033_v48 = vpack.c.bf16 %v325_v39, %v324_v31  ;;  %v196_v49 = vmul.f32 %v897_v41, %v1178_v1  ;;  %v1120_v39 = vld [vmem:[%s1502_s0 + $0xf8] sm:$0xff]  }
  0x36   :  { %v266_v50 = vadd.f32 %v1192_v7, %v195_v42  ;;  %v901_v51 = vunpack.c.h.bf16 %v1113_v34  ;;  %v328_v54 = vmax.f32 %v264_v44, 0.0  ;;  %v197_v56 = vmul.f32 %v900_v46, %v1178_v1  ;;  %v1119_v34 = vld [vmem:[%s1502_s0 + $0xf0] sm:$0xff]  }
  0x37   :  { %v1038_v53 = vpack.c.bf16 %v327_v43, %v326_v40  ;;  %v329_v55 = vmax.f32 %v265_v45, 0.0  ;;  %1140 = vst [vmem:[%s1505_s3 + $0xa0] sm:$0xff] %v1033_v48   ;;  %v267_v57 = vadd.f32 %v1192_v7, %v196_v49  ;;  %v904_v60 = vunpack.c.l.bf16 %v1114_v47 }
  0x38   :  { %v330_v58 = vmax.f32 %v266_v50, 0.0  ;;  %v198_v59 = vmul.f32 %v901_v51, %v1178_v1  ;;  %v268_v63 = vadd.f32 %v1192_v7, %v197_v56  ;;  %v905_v0 = vunpack.c.h.bf16 %v1114_v47 }
  0x39   :  { %1141 = vst [vmem:[%s1505_s3 + $0xa8] sm:$0xff] %v1038_v53   ;;  %v1043_v62 = vpack.c.bf16 %v329_v55, %v328_v54  ;;  %v908_v2 = vunpack.c.l.bf16 %v1115_v52  ;;  %v331_v3 = vmax.f32 %v267_v57, 0.0  ;;  %v199_v5 = vmul.f32 %v904_v60, %v1178_v1 }
  0x3a   :  { %v269_v4 = vadd.f32 %v1192_v7, %v198_v59  ;;  %v909_v6 = vunpack.c.h.bf16 %v1115_v52  ;;  %v332_v8 = vmax.f32 %v268_v63, 0.0  ;;  %v200_v9 = vmul.f32 %v905_v0, %v1178_v1 }
  0x3b   :  { %1142 = vst [vmem:[%s1505_s3 + $0xb0] sm:$0xff] %v1043_v62   ;;  %v201_v10 = vmul.f32 %v908_v2, %v1178_v1  ;;  %v912_v11 = vunpack.c.l.bf16 %v1116_v61  ;;  %v1048_v13 = vpack.c.bf16 %v331_v3, %v330_v58  ;;  %v270_v15 = vadd.f32 %v1192_v7, %v199_v5 }
  0x3c   :  { %v333_v14 = vmax.f32 %v269_v4, 0.0  ;;  %v202_v16 = vmul.f32 %v909_v6, %v1178_v1  ;;  %v271_v17 = vadd.f32 %v1192_v7, %v200_v9  ;;  %v913_v19 = vunpack.c.h.bf16 %v1116_v61 }
  0x3d   :  { %v272_v18 = vadd.f32 %v1192_v7, %v201_v10  ;;  %v203_v20 = vmul.f32 %v912_v11, %v1178_v1  ;;  %1143 = vst [vmem:[%s1505_s3 + $0xb8] sm:$0xff] %v1048_v13   ;;  %v334_v23 = vmax.f32 %v270_v15, 0.0  ;;  %v916_v25 = vunpack.c.l.bf16 %v1117_v12 }
  0x3e   :  { %v1053_v22 = vpack.c.bf16 %v333_v14, %v332_v8  ;;  %v273_v24 = vadd.f32 %v1192_v7, %v202_v16  ;;  %v335_v26 = vmax.f32 %v271_v17, 0.0  ;;  %v204_v28 = vmul.f32 %v913_v19, %v1178_v1 }
  0x3f   :  { %v336_v27 = vmax.f32 %v272_v18, 0.0  ;;  %v274_v29 = vadd.f32 %v1192_v7, %v203_v20  ;;  %v917_v31 = vunpack.c.h.bf16 %v1117_v12  ;;  %v205_v32 = vmul.f32 %v916_v25, %v1178_v1 }
  0x40   :  { %1144 = vst [vmem:[%s1505_s3 + $0xc0] sm:$0xff] %v1053_v22   ;;  %v337_v30 = vmax.f32 %v273_v24, 0.0  ;;  %v920_v33 = vunpack.c.l.bf16 %v1118_v21  ;;  %v1058_v35 = vpack.c.bf16 %v335_v26, %v334_v23  ;;  %v275_v36 = vadd.f32 %v1192_v7, %v204_v28 }
  0x41   :  { %v338_v37 = vmax.f32 %v274_v29, 0.0  ;;  %v921_v38 = vunpack.c.h.bf16 %v1118_v21  ;;  %v206_v41 = vmul.f32 %v917_v31, %v1178_v1  ;;  %v276_v42 = vadd.f32 %v1192_v7, %v205_v32 }
  0x42   :  { %v1063_v40 = vpack.c.bf16 %v337_v30, %v336_v27  ;;  %v207_v43 = vmul.f32 %v920_v33, %v1178_v1  ;;  %1145 = vst [vmem:[%s1505_s3 + $0xc8] sm:$0xff] %v1058_v35   ;;  %v339_v44 = vmax.f32 %v275_v36, 0.0  ;;  %v924_v46 = vunpack.c.l.bf16 %v1119_v34 }
  0x43   :  { %v208_v45 = vmul.f32 %v921_v38, %v1178_v1  ;;  %v925_v47 = vunpack.c.h.bf16 %v1119_v34  ;;  %v277_v48 = vadd.f32 %v1192_v7, %v206_v41  ;;  %v340_v49 = vmax.f32 %v276_v42, 0.0 }
  0x44   :  { %1146 = vst [vmem:[%s1505_s3 + $0xd0] sm:$0xff] %v1063_v40   ;;  %v278_v50 = vadd.f32 %v1192_v7, %v207_v43  ;;  %v928_v51 = vunpack.c.l.bf16 %v1120_v39  ;;  %v1068_v52 = vpack.c.bf16 %v339_v44, %v338_v37  ;;  %v209_v54 = vmul.f32 %v924_v46, %v1178_v1 }
  0x45   :  { %v279_v53 = vadd.f32 %v1192_v7, %v208_v45  ;;  %v210_v55 = vmul.f32 %v925_v47, %v1178_v1  ;;  %v341_v56 = vmax.f32 %v277_v48, 0.0  ;;  %v929_v58 = vunpack.c.h.bf16 %v1120_v39 }
  0x46   :  { %v342_v57 = vmax.f32 %v278_v50, 0.0  ;;  %v211_v59 = vmul.f32 %v928_v51, %v1178_v1  ;;  %1147 = vst [vmem:[%s1505_s3 + $0xd8] sm:$0xff] %v1068_v52   ;;  %v280_v61 = vadd.f32 %v1192_v7, %v209_v54 }
  0x47   :  { %v343_v60 = vmax.f32 %v279_v53, 0.0  ;;  %v281_v62 = vadd.f32 %v1192_v7, %v210_v55  ;;  %v1073_v63 = vpack.c.bf16 %v341_v56, %v340_v49  ;;  %v212_v0 = vmul.f32 %v929_v58, %v1178_v1 }
  0x48   :  { %v282_v2 = vadd.f32 %v1192_v7, %v211_v59  ;;  %v344_v4 = vmax.f32 %v280_v61, 0.0 }
  0x49   :  { %v1078_v3 = vpack.c.bf16 %v343_v60, %v342_v57  ;;  %v345_v5 = vmax.f32 %v281_v62, 0.0  ;;  %1148 = vst [vmem:[%s1505_s3 + $0xe0] sm:$0xff] %v1073_v63   ;;  %v283_v6 = vadd.f32 %v1192_v7, %v212_v0 }
  0x4a   :  { %v346_v8 = vmax.f32 %v282_v2, 0.0 }
  0x4b   :  { %1149 = vst [vmem:[%s1505_s3 + $0xe8] sm:$0xff] %v1078_v3   ;;  %v1083_v9 = vpack.c.bf16 %v345_v5, %v344_v4  ;;  %v347_v10 = vmax.f32 %v283_v6, 0.0 }
  0x4d   :  { %1150 = vst [vmem:[%s1505_s3 + $0xf0] sm:$0xff] %v1083_v9   ;;  %v1088_v1 = vpack.c.bf16 %v347_v10, %v346_v8 }
  0x4f   :  { %1151 = vst [vmem:[%s1505_s3 + $0xf8] sm:$0xff] %v1088_v1  }

// kernel: _lambda_.33
= control target key start
LH: loop header
LB: loop body
LE: loop exit
PB: predicated region body
PF: predicated region fallthrough
CT: control target
= control target key end

     0   :  { %s2009_s12 = smov 0   ;;  %s2011_s13 = smov 0   ;;  %s2229_s0 = inlined_call_operand.vmem [shape: bf16[4,512,128], index: 0, kind: input, shape index: {}]   ;;  %s2230_s1 = inlined_call_operand.vmem [shape: bf16[4,128,128], index: 1, kind: input, shape index: {}]   ;;  %s2231_s2 = inlined_call_operand.vmem [shape: f32[1,128], index: 2, kind: input, shape index: {}]   ;;  %s2232_s3 = inlined_call_operand.vmem [shape: f32[4,512,128], index: 3, kind: output, shape index: {}]  }
   0x1   :  { %s2013_s14 = smov 0  }
   0x2 LB: > { %s39_s15 = sadd.s32 1, %s1983_s13  ;;  %p1584_p0 = scmp.ge.s32.totalorder %s1987_s14, 1  ;;  %s1987_s14 = sphi %s2013_s14, %s13_s14   ;;  %s1983_s13 = sphi %s2011_s13, %s2234_s13   ;;  %s1979_s12 = sphi %s2009_s12, %s2233_s12  }
   0x3   : > { %p41_p1 = scmp.ge.s32.totalorder %s39_s15, 4  ;;  %p209_p2 = scmp.lt.s32.totalorder %s1987_s14, 5 }
   0x5   : > { %s2236_s15 = smov (%p41_p1, %s39_s15), 0  ;;  %p210_p3 = pnand %p1584_p0, %p209_p2 }
   0x6   : > { %p263_p4 = scmp.lt.s32.totalorder (!%p210_p3), %s1979_s12, 3  ;;  %v2084_v40 = vld [vmem:[%s2231_s2] ss:$0 sm:$0xff] (!%p210_p3) }
   0x7   : > { %213 = sbr.rel (%p210_p3) target bundleno = 342 (0x156), region = 32 }
   0xe   : > { %s2238_s12 = smov (!%p263_p4, %s1979_s12), 3 }
   0xf   : > { %s1635_s16 = sshll.u32 %s2238_s12, 6  ;;  %s1634_s20 = sshll.u32 %s2238_s12, 8 }
  0x10   : > { %s2033_s19 = scalar_lea.vmem %s2230_s1, %s1635_s16  ;;  %s2042_s23 = scalar_lea.vmem %s2229_s0, %s1634_s20 }
  0x11   : > { %v1797_v0 = vld [vmem:[%s2033_s19] sm:$0xff]   ;;  %v1798_v1 = vld [vmem:[%s2033_s19 + $0x8] sm:$0xff]   ;;  %v1799_v2 = vld [vmem:[%s2033_s19 + $0x10] sm:$0xff]   ;;  %s1636_s26 = sshll.u32 %s2238_s12, 9 }
  0x12   : > { %1677 = vmatprep.subr.bf16.mxu0 %v1797_v0  ;;  %1757 = vmatprep.subr.bf16.mxu1 %v1797_v0  ;;  %v1800_v3 = vld [vmem:[%s2033_s19 + $0x18] sm:$0xff]   ;;  %v1805_v4 = vld [vmem:[%s2042_s23] sm:$0xff]   ;;  %v1802_v7 = vld [vmem:[%s2033_s19 + $0x28] sm:$0xff]   ;;  %s2102_s29 = scalar_lea.vmem %s2232_s3, %s1636_s26 }
  0x13   : > { %1678 = vmatpush3.bf16.msra.mxu0 %v1797_v0  ;;  %1765 = vmatpush3.bf16.msra.mxu1 %v1797_v0  ;;  %v1806_v5 = vld [vmem:[%s2042_s23 + $0x80] sm:$0xff]   ;;  %v1803_v8 = vld [vmem:[%s2033_s19 + $0x30] sm:$0xff]   ;;  %v1804_v9 = vld [vmem:[%s2033_s19 + $0x38] sm:$0xff]  }
  0x14   : > { %1679 = vmatprep.subr.bf16.mxu0 %v1798_v1  ;;  %1758 = vmatprep.subr.bf16.mxu1 %v1798_v1  ;;  %v1801_v6 = vld [vmem:[%s2033_s19 + $0x20] sm:$0xff]   ;;  %v1807_v10 = vld [vmem:[%s2042_s23 + $0x8] sm:$0xff]   ;;  %v1809_v12 = vld [vmem:[%s2042_s23 + $0x10] sm:$0xff]  }
  0x15   : > { %1693 = vmatprep.mubr.bf16.mxu0 %v1805_v4  ;;  %1725 = vmatprep.mubr.bf16.mxu1 %v1806_v5  ;;  %v1808_v11 = vld [vmem:[%s2042_s23 + $0x88] sm:$0xff]   ;;  %v1810_v13 = vld [vmem:[%s2042_s23 + $0x90] sm:$0xff]   ;;  %v1811_v14 = vld [vmem:[%s2042_s23 + $0x18] sm:$0xff]  }
  0x16   : > { %v1812_v15 = vld [vmem:[%s2042_s23 + $0x98] sm:$0xff]   ;;  %v1813_v16 = vld [vmem:[%s2042_s23 + $0x20] sm:$0xff]   ;;  %v1815_v18 = vld [vmem:[%s2042_s23 + $0x28] sm:$0xff]  }
  0x17   : > { %1680 = vmatpush3.bf16.msra.mxu0 %v1798_v1  ;;  %1766 = vmatpush3.bf16.msra.mxu1 %v1798_v1  ;;  %v1814_v17 = vld [vmem:[%s2042_s23 + $0xa0] sm:$0xff]   ;;  %v1816_v19 = vld [vmem:[%s2042_s23 + $0xa8] sm:$0xff]   ;;  %v1817_v20 = vld [vmem:[%s2042_s23 + $0x30] sm:$0xff]  }
  0x18   : > { %1681 = vmatprep.subr.bf16.mxu0 %v1799_v2  ;;  %1759 = vmatprep.subr.bf16.mxu1 %v1799_v2  ;;  %v1818_v21 = vld [vmem:[%s2042_s23 + $0xb0] sm:$0xff]   ;;  %v1819_v22 = vld [vmem:[%s2042_s23 + $0x38] sm:$0xff]   ;;  %v1821_v24 = vld [vmem:[%s2042_s23 + $0x40] sm:$0xff]  }
  0x19   : > { %v1820_v23 = vld [vmem:[%s2042_s23 + $0xb8] sm:$0xff]   ;;  %v1822_v25 = vld [vmem:[%s2042_s23 + $0xc0] sm:$0xff]   ;;  %v1823_v26 = vld [vmem:[%s2042_s23 + $0x48] sm:$0xff]  }
  0x1a   : > { %v1824_v27 = vld [vmem:[%s2042_s23 + $0xc8] sm:$0xff]   ;;  %v1825_v28 = vld [vmem:[%s2042_s23 + $0x50] sm:$0xff]   ;;  %v1827_v30 = vld [vmem:[%s2042_s23 + $0x58] sm:$0xff]  }
  0x1b   : > { %1682 = vmatpush3.bf16.msra.mxu0 %v1799_v2  ;;  %1767 = vmatpush3.bf16.msra.mxu1 %v1799_v2  ;;  %v1826_v29 = vld [vmem:[%s2042_s23 + $0xd0] sm:$0xff]   ;;  %v1828_v31 = vld [vmem:[%s2042_s23 + $0xd8] sm:$0xff]   ;;  %v1829_v32 = vld [vmem:[%s2042_s23 + $0x60] sm:$0xff]  }
  0x1c   : > { %1683 = vmatprep.subr.bf16.mxu0 %v1800_v3  ;;  %1760 = vmatprep.subr.bf16.mxu1 %v1800_v3  ;;  %v1830_v33 = vld [vmem:[%s2042_s23 + $0xe0] sm:$0xff]   ;;  %v1831_v34 = vld [vmem:[%s2042_s23 + $0x68] sm:$0xff]   ;;  %v1833_v36 = vld [vmem:[%s2042_s23 + $0x70] sm:$0xff]  }
  0x1d   : > { %v1832_v35 = vld [vmem:[%s2042_s23 + $0xe8] sm:$0xff]   ;;  %v1834_v37 = vld [vmem:[%s2042_s23 + $0xf0] sm:$0xff]   ;;  %v1835_v38 = vld [vmem:[%s2042_s23 + $0x78] sm:$0xff]  }
  0x1e   : > { %v1836_v39 = vld [vmem:[%s2042_s23 + $0xf8] sm:$0xff]  }
  0x1f   : > { %1684 = vmatpush3.bf16.msra.mxu0 %v1800_v3  ;;  %1768 = vmatpush3.bf16.msra.mxu1 %v1800_v3 }
  0x20   : > { %1685 = vmatprep.subr.bf16.mxu0 %v1801_v6  ;;  %1761 = vmatprep.subr.bf16.mxu1 %v1801_v6 }
  0x23   : > { %1686 = vmatpush3.bf16.msra.mxu0 %v1801_v6  ;;  %1769 = vmatpush3.bf16.msra.mxu1 %v1801_v6 }
  0x24   : > { %1687 = vmatprep.subr.bf16.mxu0 %v1802_v7  ;;  %1762 = vmatprep.subr.bf16.mxu1 %v1802_v7 }
  0x27   : > { %1688 = vmatpush3.bf16.msra.mxu0 %v1802_v7  ;;  %1770 = vmatpush3.bf16.msra.mxu1 %v1802_v7 }
  0x28   : > { %1689 = vmatprep.subr.bf16.mxu0 %v1803_v8  ;;  %1763 = vmatprep.subr.bf16.mxu1 %v1803_v8 }
  0x2b   : > { %1690 = vmatpush3.bf16.msra.mxu0 %v1803_v8  ;;  %1771 = vmatpush3.bf16.msra.mxu1 %v1803_v8 }
  0x2c   : > { %1691 = vmatprep.subr.bf16.mxu0 %v1804_v9  ;;  %1764 = vmatprep.subr.bf16.mxu1 %v1804_v9 }
  0x2f   : > { %1692 = vmatpush3.bf16.msra.mxu0 %v1804_v9  ;;  %1772 = vmatpush3.bf16.msra.mxu1 %v1804_v9 }
  0x32   : > { %1694 = vmatmul.mubr.bf16.vlgmr.msra.gmra.mrb[0].mxu0 %v1807_v10  ;;  %1726 = vmatmul.mubr.bf16.vlgmr.msra.gmra.mrb[0].mxu1 %v1808_v11 }
  0x33   : > { %1697 = vmatprep.mubr.bf16.mxu0 %v1809_v12  ;;  %1729 = vmatprep.mubr.bf16.mxu1 %v1810_v13 }
  0x3a   : > { %1698 = vmatmul.mubr.bf16.gmra.mrb[4].mxu0 %v1811_v14  ;;  %1730 = vmatmul.mubr.bf16.gmra.mrb[4].mxu1 %v1812_v15 }
  0x3b   : > { %1701 = vmatprep.mubr.bf16.mxu0 %v1813_v16  ;;  %1733 = vmatprep.mubr.bf16.mxu1 %v1814_v17 }
  0x42   : > { %1702 = vmatmul.mubr.bf16.gmra.mrb[8].mxu0 %v1815_v18  ;;  %1734 = vmatmul.mubr.bf16.gmra.mrb[8].mxu1 %v1816_v19 }
  0x43   : > { %1705 = vmatprep.mubr.bf16.mxu0 %v1817_v20  ;;  %1737 = vmatprep.mubr.bf16.mxu1 %v1818_v21 }
  0x4a   : > { %1706 = vmatmul.mubr.bf16.gmra.mrb[12].mxu0 %v1819_v22  ;;  %1738 = vmatmul.mubr.bf16.gmra.mrb[12].mxu1 %v1820_v23 }
  0x4b   : > { %1709 = vmatprep.mubr.bf16.mxu0 %v1821_v24  ;;  %1741 = vmatprep.mubr.bf16.mxu1 %v1822_v25 }
  0x52   : > { %1710 = vmatmul.mubr.bf16.gmra.mrb[16].mxu0 %v1823_v26  ;;  %1742 = vmatmul.mubr.bf16.gmra.mrb[16].mxu1 %v1824_v27 }
  0x53   : > { %1713 = vmatprep.mubr.bf16.mxu0 %v1825_v28  ;;  %1745 = vmatprep.mubr.bf16.mxu1 %v1826_v29 }
  0x5a   : > { %1714 = vmatmul.mubr.bf16.gmra.mrb[20].mxu0 %v1827_v30  ;;  %1746 = vmatmul.mubr.bf16.gmra.mrb[20].mxu1 %v1828_v31 }
  0x5b   : > { %1717 = vmatprep.mubr.bf16.mxu0 %v1829_v32  ;;  %1749 = vmatprep.mubr.bf16.mxu1 %v1830_v33 }
  0x62   : > { %1718 = vmatmul.mubr.bf16.gmra.mrb[24].mxu0 %v1831_v34  ;;  %1750 = vmatmul.mubr.bf16.gmra.mrb[24].mxu1 %v1832_v35 }
  0x63   : > { %1721 = vmatprep.mubr.bf16.mxu0 %v1833_v36  ;;  %1753 = vmatprep.mubr.bf16.mxu1 %v1834_v37 }
  0x6a   : > { %1722 = vmatmul.mubr.bf16.gmra.mrb[28].mxu0 %v1835_v38  ;;  %1754 = vmatmul.mubr.bf16.gmra.mrb[28].mxu1 %v1836_v39 }
 0x105   : > { %v1695_v41 = vpop.f32.mrb[0].mxu0  ;;  %v1727_v42 = vpop.f32.mrb[0].mxu1 }
 0x106   : > { %v1250_v43 = vadd.f32 %v1695_v41, %v2084_v40  ;;  %v1282_v44 = vadd.f32 %v1727_v42, %v2084_v40  ;;  %v791_v45 = vpop.f32.mrb[1].mxu0  ;;  %v919_v46 = vpop.f32.mrb[1].mxu1 }
 0x107   : > { %v1248_v47 = vadd.f32 %v2084_v40, %v791_v45  ;;  %v1280_v48 = vadd.f32 %v2084_v40, %v919_v46  ;;  %v1696_v49 = vpop.f32.mrb[2].mxu0  ;;  %v1728_v50 = vpop.f32.mrb[2].mxu1 }
 0x108   : > { %1837 = vtanh.f32 %v1250_v43  ;;  %v1251_v51 = vadd.f32 %v1696_v49, %v2084_v40  ;;  %v794_v52 = vpop.f32.mrb[3].mxu0  ;;  %v922_v53 = vpop.f32.mrb[3].mxu1  ;;  %v1283_v54 = vadd.f32 %v1728_v50, %v2084_v40 }
 0x109   : > { %1839 = vtanh.f32 %v1282_v44  ;;  %v1249_v55 = vadd.f32 %v2084_v40, %v794_v52  ;;  %v1281_v56 = vadd.f32 %v2084_v40, %v922_v53 }
 0x10a   : > { %1841 = vtanh.f32 %v1248_v47 }
 0x10b   : > { %1843 = vtanh.f32 %v1280_v48 }
 0x10c   : > { %1845 = vtanh.f32 %v1251_v51 }
 0x10d   : > { %1847 = vtanh.f32 %v1283_v54  ;;  %v1699_v57 = vpop.f32.mrb[4].mxu0  ;;  %v1731_v58 = vpop.f32.mrb[4].mxu1 }
 0x10e   : > { %1849 = vtanh.f32 %v1249_v55  ;;  %v1254_v59 = vadd.f32 %v1699_v57, %v2084_v40  ;;  %v1286_v60 = vadd.f32 %v1731_v58, %v2084_v40  ;;  %v807_v61 = vpop.f32.mrb[5].mxu0  ;;  %v935_v62 = vpop.f32.mrb[5].mxu1 }
 0x10f   : > { %1851 = vtanh.f32 %v1281_v56  ;;  %v1252_v63 = vadd.f32 %v2084_v40, %v807_v61  ;;  %v1284_v0 = vadd.f32 %v2084_v40, %v935_v62  ;;  %v1700_v1 = vpop.f32.mrb[6].mxu0  ;;  %v1732_v2 = vpop.f32.mrb[6].mxu1 }
 0x110   : > { %1853 = vtanh.f32 %v1254_v59  ;;  %v1255_v3 = vadd.f32 %v1700_v1, %v2084_v40  ;;  %v810_v4 = vpop.f32.mrb[7].mxu0  ;;  %v938_v5 = vpop.f32.mrb[7].mxu1  ;;  %v1287_v6 = vadd.f32 %v1732_v2, %v2084_v40 }
 0x111   : > { %1855 = vtanh.f32 %v1286_v60  ;;  %v1253_v8 = vadd.f32 %v2084_v40, %v810_v4  ;;  %v1285_v10 = vadd.f32 %v2084_v40, %v938_v5 }
 0x112   : > { %v1838_v7 = vpop.eup %1837  ;;  %1857 = vtanh.f32 %v1252_v63 }
 0x113   : > { %v1840_v9 = vpop.eup %1839  ;;  %1378 = vst [vmem:[%s2102_s29 + $0x10] sm:$0xff] %v1838_v7  ;;  %1859 = vtanh.f32 %v1284_v0 }
 0x114   : > { %v1842_v11 = vpop.eup %1841  ;;  %1410 = vst [vmem:[%s2102_s29 + $0x110] sm:$0xff] %v1840_v9  ;;  %1861 = vtanh.f32 %v1255_v3 }
 0x115   : > { %v1844_v12 = vpop.eup %1843  ;;  %1376 = vst [vmem:[%s2102_s29] sm:$0xff] %v1842_v11  ;;  %1863 = vtanh.f32 %v1287_v6  ;;  %v1703_v13 = vpop.f32.mrb[8].mxu0 }
 0x116   : > { %v1735_v14 = vpop.f32.mrb[8].mxu1  ;;  %v1846_v15 = vpop.eup %1845  ;;  %1408 = vst [vmem:[%s2102_s29 + $0x100] sm:$0xff] %v1844_v12  ;;  %1865 = vtanh.f32 %v1253_v8  ;;  %v1258_v16 = vadd.f32 %v1703_v13, %v2084_v40 }
 0x117   : > { %v1290_v17 = vadd.f32 %v1735_v14, %v2084_v40  ;;  %v823_v18 = vpop.f32.mrb[9].mxu0  ;;  %v951_v19 = vpop.f32.mrb[9].mxu1  ;;  %1379 = vst [vmem:[%s2102_s29 + $0x18] sm:$0xff] %v1846_v15  ;;  %1867 = vtanh.f32 %v1285_v10 }
 0x118   : > { %v1848_v20 = vpop.eup %1847  ;;  %v1256_v21 = vadd.f32 %v2084_v40, %v823_v18  ;;  %v1288_v22 = vadd.f32 %v2084_v40, %v951_v19  ;;  %v1704_v23 = vpop.f32.mrb[10].mxu0  ;;  %1869 = vtanh.f32 %v1258_v16 }
 0x119   : > { %v1736_v24 = vpop.f32.mrb[10].mxu1  ;;  %v1850_v25 = vpop.eup %1849  ;;  %1411 = vst [vmem:[%s2102_s29 + $0x118] sm:$0xff] %v1848_v20  ;;  %v1259_v26 = vadd.f32 %v1704_v23, %v2084_v40  ;;  %1871 = vtanh.f32 %v1290_v17 }
 0x11a   : > { %v826_v27 = vpop.f32.mrb[11].mxu0  ;;  %v954_v28 = vpop.f32.mrb[11].mxu1  ;;  %1377 = vst [vmem:[%s2102_s29 + $0x8] sm:$0xff] %v1850_v25  ;;  %v1291_v30 = vadd.f32 %v1736_v24, %v2084_v40  ;;  %1873 = vtanh.f32 %v1256_v21 }
 0x11b   : > { %v1852_v29 = vpop.eup %1851  ;;  %v1257_v32 = vadd.f32 %v2084_v40, %v826_v27  ;;  %1875 = vtanh.f32 %v1288_v22  ;;  %v1289_v34 = vadd.f32 %v2084_v40, %v954_v28 }
 0x11c   : > { %v1854_v31 = vpop.eup %1853  ;;  %1409 = vst [vmem:[%s2102_s29 + $0x108] sm:$0xff] %v1852_v29  ;;  %1877 = vtanh.f32 %v1259_v26 }
 0x11d   : > { %v1856_v33 = vpop.eup %1855  ;;  %1382 = vst [vmem:[%s2102_s29 + $0x30] sm:$0xff] %v1854_v31  ;;  %1879 = vtanh.f32 %v1291_v30  ;;  %v1707_v37 = vpop.f32.mrb[12].mxu0 }
 0x11e   : > { %v1858_v35 = vpop.eup %1857  ;;  %1414 = vst [vmem:[%s2102_s29 + $0x130] sm:$0xff] %v1856_v33  ;;  %v1739_v38 = vpop.f32.mrb[12].mxu1  ;;  %1881 = vtanh.f32 %v1257_v32  ;;  %v1262_v41 = vadd.f32 %v1707_v37, %v2084_v40 }
 0x11f   : > { %v1860_v36 = vpop.eup %1859  ;;  %1380 = vst [vmem:[%s2102_s29 + $0x20] sm:$0xff] %v1858_v35  ;;  %v1294_v42 = vadd.f32 %v1739_v38, %v2084_v40  ;;  %v839_v43 = vpop.f32.mrb[13].mxu0  ;;  %1883 = vtanh.f32 %v1289_v34 }
 0x120   : > { %v1862_v39 = vpop.eup %1861  ;;  %1412 = vst [vmem:[%s2102_s29 + $0x120] sm:$0xff] %v1860_v36  ;;  %v967_v44 = vpop.f32.mrb[13].mxu1  ;;  %v1260_v46 = vadd.f32 %v2084_v40, %v839_v43  ;;  %1885 = vtanh.f32 %v1262_v41 }
 0x121   : > { %v1864_v45 = vpop.eup %1863  ;;  %1383 = vst [vmem:[%s2102_s29 + $0x38] sm:$0xff] %v1862_v39  ;;  %v1292_v47 = vadd.f32 %v2084_v40, %v967_v44  ;;  %v1708_v48 = vpop.f32.mrb[14].mxu0  ;;  %1887 = vtanh.f32 %v1294_v42 }
 0x122   : > { %v1740_v49 = vpop.f32.mrb[14].mxu1  ;;  %v1866_v50 = vpop.eup %1865  ;;  %1415 = vst [vmem:[%s2102_s29 + $0x138] sm:$0xff] %v1864_v45  ;;  %v1263_v51 = vadd.f32 %v1708_v48, %v2084_v40  ;;  %1889 = vtanh.f32 %v1260_v46 }
 0x123   : > { %v842_v52 = vpop.f32.mrb[15].mxu0  ;;  %v970_v53 = vpop.f32.mrb[15].mxu1  ;;  %1381 = vst [vmem:[%s2102_s29 + $0x28] sm:$0xff] %v1866_v50  ;;  %v1295_v55 = vadd.f32 %v1740_v49, %v2084_v40  ;;  %1891 = vtanh.f32 %v1292_v47 }
 0x124   : > { %v1868_v54 = vpop.eup %1867  ;;  %v1261_v57 = vadd.f32 %v2084_v40, %v842_v52  ;;  %v1293_v59 = vadd.f32 %v2084_v40, %v970_v53  ;;  %1893 = vtanh.f32 %v1263_v51 }
 0x125   : > { %v1870_v56 = vpop.eup %1869  ;;  %1413 = vst [vmem:[%s2102_s29 + $0x128] sm:$0xff] %v1868_v54  ;;  %1895 = vtanh.f32 %v1295_v55  ;;  %v1711_v62 = vpop.f32.mrb[16].mxu0 }
 0x126   : > { %v1872_v58 = vpop.eup %1871  ;;  %1386 = vst [vmem:[%s2102_s29 + $0x50] sm:$0xff] %v1870_v56  ;;  %v1743_v63 = vpop.f32.mrb[16].mxu1  ;;  %1897 = vtanh.f32 %v1261_v57  ;;  %v1266_v1 = vadd.f32 %v1711_v62, %v2084_v40 }
 0x127   : > { %v1874_v60 = vpop.eup %1873  ;;  %1418 = vst [vmem:[%s2102_s29 + $0x150] sm:$0xff] %v1872_v58  ;;  %v1298_v2 = vadd.f32 %v1743_v63, %v2084_v40  ;;  %v855_v3 = vpop.f32.mrb[17].mxu0  ;;  %1899 = vtanh.f32 %v1293_v59 }
 0x128   : > { %v1876_v61 = vpop.eup %1875  ;;  %1384 = vst [vmem:[%s2102_s29 + $0x40] sm:$0xff] %v1874_v60  ;;  %v983_v4 = vpop.f32.mrb[17].mxu1  ;;  %v1264_v6 = vadd.f32 %v2084_v40, %v855_v3  ;;  %1901 = vtanh.f32 %v1266_v1 }
 0x129   : > { %v1878_v0 = vpop.eup %1877  ;;  %1416 = vst [vmem:[%s2102_s29 + $0x140] sm:$0xff] %v1876_v61  ;;  %v1296_v7 = vadd.f32 %v2084_v40, %v983_v4  ;;  %v1712_v8 = vpop.f32.mrb[18].mxu0  ;;  %1903 = vtanh.f32 %v1298_v2 }
 0x12a   : > { %v1880_v5 = vpop.eup %1879  ;;  %1387 = vst [vmem:[%s2102_s29 + $0x58] sm:$0xff] %v1878_v0  ;;  %v1744_v9 = vpop.f32.mrb[18].mxu1  ;;  %v1267_v11 = vadd.f32 %v1712_v8, %v2084_v40  ;;  %1905 = vtanh.f32 %v1264_v6 }
 0x12b   : > { %v1882_v10 = vpop.eup %1881  ;;  %1419 = vst [vmem:[%s2102_s29 + $0x158] sm:$0xff] %v1880_v5  ;;  %v858_v12 = vpop.f32.mrb[19].mxu0  ;;  %v1299_v15 = vadd.f32 %v1744_v9, %v2084_v40  ;;  %1907 = vtanh.f32 %v1296_v7 }
 0x12c   : > { %v986_v13 = vpop.f32.mrb[19].mxu1  ;;  %v1884_v14 = vpop.eup %1883  ;;  %1385 = vst [vmem:[%s2102_s29 + $0x48] sm:$0xff] %v1882_v10  ;;  %v1265_v17 = vadd.f32 %v2084_v40, %v858_v12  ;;  %1909 = vtanh.f32 %v1267_v11 }
 0x12d   : > { %v1886_v16 = vpop.eup %1885  ;;  %1417 = vst [vmem:[%s2102_s29 + $0x148] sm:$0xff] %v1884_v14  ;;  %v1297_v19 = vadd.f32 %v2084_v40, %v986_v13  ;;  %1911 = vtanh.f32 %v1299_v15  ;;  %v1715_v22 = vpop.f32.mrb[20].mxu0 }
 0x12e   : > { %v1888_v18 = vpop.eup %1887  ;;  %1390 = vst [vmem:[%s2102_s29 + $0x70] sm:$0xff] %v1886_v16  ;;  %v1747_v23 = vpop.f32.mrb[20].mxu1  ;;  %1913 = vtanh.f32 %v1265_v17  ;;  %v1270_v25 = vadd.f32 %v1715_v22, %v2084_v40 }
 0x12f   : > { %v1890_v20 = vpop.eup %1889  ;;  %1422 = vst [vmem:[%s2102_s29 + $0x170] sm:$0xff] %v1888_v18  ;;  %v1302_v26 = vadd.f32 %v1747_v23, %v2084_v40  ;;  %v871_v27 = vpop.f32.mrb[21].mxu0  ;;  %1915 = vtanh.f32 %v1297_v19 }
 0x130   : > { %v1892_v21 = vpop.eup %1891  ;;  %1388 = vst [vmem:[%s2102_s29 + $0x60] sm:$0xff] %v1890_v20  ;;  %v999_v28 = vpop.f32.mrb[21].mxu1  ;;  %v1268_v30 = vadd.f32 %v2084_v40, %v871_v27  ;;  %1917 = vtanh.f32 %v1270_v25 }
 0x131   : > { %v1894_v24 = vpop.eup %1893  ;;  %1420 = vst [vmem:[%s2102_s29 + $0x160] sm:$0xff] %v1892_v21  ;;  %v1300_v31 = vadd.f32 %v2084_v40, %v999_v28  ;;  %v1716_v32 = vpop.f32.mrb[22].mxu0  ;;  %1919 = vtanh.f32 %v1302_v26 }
 0x132   : > { %v1896_v29 = vpop.eup %1895  ;;  %1391 = vst [vmem:[%s2102_s29 + $0x78] sm:$0xff] %v1894_v24  ;;  %v1748_v33 = vpop.f32.mrb[22].mxu1  ;;  %v1271_v35 = vadd.f32 %v1716_v32, %v2084_v40  ;;  %1921 = vtanh.f32 %v1268_v30 }
 0x133   : > { %v1898_v34 = vpop.eup %1897  ;;  %1423 = vst [vmem:[%s2102_s29 + $0x178] sm:$0xff] %v1896_v29  ;;  %v874_v36 = vpop.f32.mrb[23].mxu0  ;;  %v1303_v39 = vadd.f32 %v1748_v33, %v2084_v40  ;;  %1923 = vtanh.f32 %v1300_v31 }
 0x134   : > { %v1002_v37 = vpop.f32.mrb[23].mxu1  ;;  %v1900_v38 = vpop.eup %1899  ;;  %1389 = vst [vmem:[%s2102_s29 + $0x68] sm:$0xff] %v1898_v34  ;;  %v1269_v42 = vadd.f32 %v2084_v40, %v874_v36  ;;  %1925 = vtanh.f32 %v1271_v35 }
 0x135   : > { %v1902_v41 = vpop.eup %1901  ;;  %1421 = vst [vmem:[%s2102_s29 + $0x168] sm:$0xff] %v1900_v38  ;;  %v1301_v44 = vadd.f32 %v2084_v40, %v1002_v37  ;;  %1927 = vtanh.f32 %v1303_v39  ;;  %v1719_v47 = vpop.f32.mrb[24].mxu0 }
 0x136   : > { %v1904_v43 = vpop.eup %1903  ;;  %1394 = vst [vmem:[%s2102_s29 + $0x90] sm:$0xff] %v1902_v41  ;;  %v1751_v48 = vpop.f32.mrb[24].mxu1  ;;  %1929 = vtanh.f32 %v1269_v42  ;;  %v1274_v50 = vadd.f32 %v1719_v47, %v2084_v40 }
 0x137   : > { %v1906_v45 = vpop.eup %1905  ;;  %1426 = vst [vmem:[%s2102_s29 + $0x190] sm:$0xff] %v1904_v43  ;;  %v1306_v51 = vadd.f32 %v1751_v48, %v2084_v40  ;;  %v887_v52 = vpop.f32.mrb[25].mxu0  ;;  %1931 = vtanh.f32 %v1301_v44 }
 0x138   : > { %v1908_v46 = vpop.eup %1907  ;;  %1392 = vst [vmem:[%s2102_s29 + $0x80] sm:$0xff] %v1906_v45  ;;  %v1015_v53 = vpop.f32.mrb[25].mxu1  ;;  %v1272_v55 = vadd.f32 %v2084_v40, %v887_v52  ;;  %1933 = vtanh.f32 %v1274_v50 }
 0x139   : > { %v1910_v49 = vpop.eup %1909  ;;  %1424 = vst [vmem:[%s2102_s29 + $0x180] sm:$0xff] %v1908_v46  ;;  %v1304_v56 = vadd.f32 %v2084_v40, %v1015_v53  ;;  %v1720_v57 = vpop.f32.mrb[26].mxu0  ;;  %1935 = vtanh.f32 %v1306_v51 }
 0x13a   : > { %v1912_v54 = vpop.eup %1911  ;;  %1395 = vst [vmem:[%s2102_s29 + $0x98] sm:$0xff] %v1910_v49  ;;  %v1752_v58 = vpop.f32.mrb[26].mxu1  ;;  %v1275_v60 = vadd.f32 %v1720_v57, %v2084_v40  ;;  %1937 = vtanh.f32 %v1272_v55 }
 0x13b   : > { %v1914_v59 = vpop.eup %1913  ;;  %1427 = vst [vmem:[%s2102_s29 + $0x198] sm:$0xff] %v1912_v54  ;;  %v890_v61 = vpop.f32.mrb[27].mxu0  ;;  %v1307_v0 = vadd.f32 %v1752_v58, %v2084_v40  ;;  %1939 = vtanh.f32 %v1304_v56 }
 0x13c   : > { %v1018_v62 = vpop.f32.mrb[27].mxu1  ;;  %v1916_v63 = vpop.eup %1915  ;;  %1393 = vst [vmem:[%s2102_s29 + $0x88] sm:$0xff] %v1914_v59  ;;  %v1273_v2 = vadd.f32 %v2084_v40, %v890_v61  ;;  %1941 = vtanh.f32 %v1275_v60 }
 0x13d   : > { %v1918_v1 = vpop.eup %1917  ;;  %1425 = vst [vmem:[%s2102_s29 + $0x188] sm:$0xff] %v1916_v63  ;;  %v1305_v4 = vadd.f32 %v2084_v40, %v1018_v62  ;;  %1943 = vtanh.f32 %v1307_v0  ;;  %v1723_v7 = vpop.f32.mrb[28].mxu0 }
 0x13e   : > { %v1920_v3 = vpop.eup %1919  ;;  %1398 = vst [vmem:[%s2102_s29 + $0xb0] sm:$0xff] %v1918_v1  ;;  %v1755_v8 = vpop.f32.mrb[28].mxu1  ;;  %1945 = vtanh.f32 %v1273_v2  ;;  %v1278_v10 = vadd.f32 %v1723_v7, %v2084_v40 }
 0x13f   : > { %v1922_v5 = vpop.eup %1921  ;;  %1430 = vst [vmem:[%s2102_s29 + $0x1b0] sm:$0xff] %v1920_v3  ;;  %v1310_v11 = vadd.f32 %v1755_v8, %v2084_v40  ;;  %v903_v12 = vpop.f32.mrb[29].mxu0  ;;  %1947 = vtanh.f32 %v1305_v4 }
 0x140   : > { %v1924_v6 = vpop.eup %1923  ;;  %1396 = vst [vmem:[%s2102_s29 + $0xa0] sm:$0xff] %v1922_v5  ;;  %v1031_v13 = vpop.f32.mrb[29].mxu1  ;;  %v1276_v15 = vadd.f32 %v2084_v40, %v903_v12  ;;  %1949 = vtanh.f32 %v1278_v10 }
 0x141   : > { %v1926_v9 = vpop.eup %1925  ;;  %1428 = vst [vmem:[%s2102_s29 + $0x1a0] sm:$0xff] %v1924_v6  ;;  %v1308_v16 = vadd.f32 %v2084_v40, %v1031_v13  ;;  %v1724_v17 = vpop.f32.mrb[30].mxu0  ;;  %1951 = vtanh.f32 %v1310_v11 }
 0x142   : > { %v1928_v14 = vpop.eup %1927  ;;  %1399 = vst [vmem:[%s2102_s29 + $0xb8] sm:$0xff] %v1926_v9  ;;  %v1756_v18 = vpop.f32.mrb[30].mxu1  ;;  %v1279_v20 = vadd.f32 %v1724_v17, %v2084_v40  ;;  %1953 = vtanh.f32 %v1276_v15 }
 0x143   : > { %v1930_v19 = vpop.eup %1929  ;;  %1431 = vst [vmem:[%s2102_s29 + $0x1b8] sm:$0xff] %v1928_v14  ;;  %v906_v21 = vpop.f32.mrb[31].mxu0  ;;  %v1311_v24 = vadd.f32 %v1756_v18, %v2084_v40  ;;  %1955 = vtanh.f32 %v1308_v16 }
 0x144   : > { %v1034_v22 = vpop.f32.mrb[31].mxu1  ;;  %v1932_v23 = vpop.eup %1931  ;;  %1397 = vst [vmem:[%s2102_s29 + $0xa8] sm:$0xff] %v1930_v19  ;;  %v1277_v26 = vadd.f32 %v2084_v40, %v906_v21  ;;  %1957 = vtanh.f32 %v1279_v20 }
 0x145   : > { %v1934_v25 = vpop.eup %1933  ;;  %1429 = vst [vmem:[%s2102_s29 + $0x1a8] sm:$0xff] %v1932_v23  ;;  %v1309_v28 = vadd.f32 %v2084_v40, %v1034_v22  ;;  %1959 = vtanh.f32 %v1311_v24 }
 0x146   : > { %v1936_v27 = vpop.eup %1935  ;;  %1402 = vst [vmem:[%s2102_s29 + $0xd0] sm:$0xff] %v1934_v25  ;;  %1961 = vtanh.f32 %v1277_v26 }
 0x147   : > { %v1938_v29 = vpop.eup %1937  ;;  %1434 = vst [vmem:[%s2102_s29 + $0x1d0] sm:$0xff] %v1936_v27  ;;  %1963 = vtanh.f32 %v1309_v28 }
 0x148   : > { %v1940_v30 = vpop.eup %1939  ;;  %1400 = vst [vmem:[%s2102_s29 + $0xc0] sm:$0xff] %v1938_v29 }
 0x149   : > { %v1942_v31 = vpop.eup %1941  ;;  %1432 = vst [vmem:[%s2102_s29 + $0x1c0] sm:$0xff] %v1940_v30 }
 0x14a   : > { %v1944_v32 = vpop.eup %1943  ;;  %1403 = vst [vmem:[%s2102_s29 + $0xd8] sm:$0xff] %v1942_v31 }
 0x14b   : > { %v1946_v40 = vpop.eup %1945  ;;  %1435 = vst [vmem:[%s2102_s29 + $0x1d8] sm:$0xff] %v1944_v32 }
 0x14c   : > { %v1948_v33 = vpop.eup %1947  ;;  %1401 = vst [vmem:[%s2102_s29 + $0xc8] sm:$0xff] %v1946_v40 }
 0x14d   : > { %v1950_v34 = vpop.eup %1949  ;;  %1433 = vst [vmem:[%s2102_s29 + $0x1c8] sm:$0xff] %v1948_v33 }
 0x14e   : > { %v1952_v35 = vpop.eup %1951  ;;  %1406 = vst [vmem:[%s2102_s29 + $0xf0] sm:$0xff] %v1950_v34 }
 0x14f   : > { %v1954_v36 = vpop.eup %1953  ;;  %1438 = vst [vmem:[%s2102_s29 + $0x1f0] sm:$0xff] %v1952_v35 }
 0x150   : > { %v1956_v37 = vpop.eup %1955  ;;  %1404 = vst [vmem:[%s2102_s29 + $0xe0] sm:$0xff] %v1954_v36 }
 0x151   : > { %v1958_v38 = vpop.eup %1957  ;;  %1436 = vst [vmem:[%s2102_s29 + $0x1e0] sm:$0xff] %v1956_v37 }
 0x152   : > { %v1960_v39 = vpop.eup %1959  ;;  %1407 = vst [vmem:[%s2102_s29 + $0xf8] sm:$0xff] %v1958_v38 }
 0x153   : > { %v1962_v41 = vpop.eup %1961  ;;  %1439 = vst [vmem:[%s2102_s29 + $0x1f8] sm:$0xff] %v1960_v39 }
 0x154   : > { %v1964_v42 = vpop.eup %1963  ;;  %1405 = vst [vmem:[%s2102_s29 + $0xe8] sm:$0xff] %v1962_v41 }
 0x155   : > { %1437 = vst [vmem:[%s2102_s29 + $0x1e8] sm:$0xff] %v1964_v42 }
 0x156 PF: > { %s13_s14 = sadd.s32 1, %s1987_s14   ;;  %s2233_s12 = smov %s1983_s13 }
 0x157   : > { %p10_p5 = scmp.ge.s32.totalorder %s13_s14, 6   ;;  %s2234_s13 = smov %s2236_s15 }
 0x159   :  { %12 = sbr.rel (!%p10_p5) target bundleno = 2 (0x2), region = 76 }

</bundles_post_ra>
